<compile_context>
chip_gen: v7x
topology: tpu7x:2x2x1
jax: 0.10.0
libtpu: 0.0.40
codegen_flags: <defaults>
</compile_context>

<pallas_src>
import jax
import jax.numpy as jnp
from jax import lax
from jax.experimental import pallas as pl
from jax.experimental.pallas import tpu as pltpu

# Module constants (from the PyTorch source)
HIDDEN_SIZE = 128
INPUT_SIZE = 162
NUM_CLASSES = 10
NUM_LAYERS = 2  # the two LSTM layers are hard-wired into the kernel


def _pick_chunk(T, max_chunk=32):
    """Largest divisor of T that is <= max_chunk (timesteps per grid step)."""
    for tb in range(min(T, max_chunk), 0, -1):
        if T % tb == 0:
            return tb
    return 1


def _gate_update(gates, c):
    """PyTorch gate order i, f, g, o.  gates: (B, 4H) f32, c: (B, H) f32."""
    H = c.shape[-1]
    i = jax.nn.sigmoid(gates[:, 0 * H:1 * H])
    f = jax.nn.sigmoid(gates[:, 1 * H:2 * H])
    g = jnp.tanh(gates[:, 2 * H:3 * H])
    o = jax.nn.sigmoid(gates[:, 3 * H:4 * H])
    c_new = f * c + i * g
    h_new = o * jnp.tanh(c_new)
    return h_new, c_new


def lstm_kernel(gx_ref,        # (TB, B, 4H) f32 : precomputed x @ Wih1 + b1 for this time chunk
                whh1_ref,      # (H, 4H)   bf16  : layer-1 recurrent weights
                w2_ref,        # (2H, 4H)  bf16  : concat([Wih2; Whh2]) for layer 2
                b2_ref,        # (1, 4H)   f32
                wfc_ref,       # (H, C)    bf16
                bfc_ref,       # (1, C)    f32
                out_ref,       # (B, C)    f32
                h1_sc, c1_sc, h2_sc, c2_sc):
    t = pl.program_id(0)
    tb = gx_ref.shape[0]  # static chunk length

    # h0 = c0 = 0 (matches torch.zeros init in forward)
    @pl.when(t == 0)
    def _():
        h1_sc[...] = jnp.zeros_like(h1_sc)
        c1_sc[...] = jnp.zeros_like(c1_sc)
        h2_sc[...] = jnp.zeros_like(h2_sc)
        c2_sc[...] = jnp.zeros_like(c2_sc)

    # Hoist weight loads out of the timestep loop.
    whh1 = whh1_ref[...]
    w2 = w2_ref[...]
    b2 = b2_ref[...]

    def step(i, carry):
        h1, c1, h2, c2 = carry
        # Layer 1: x-projection was hoisted; only the recurrent matmul remains
        # (bf16 operands, f32 accumulation).
        g1 = gx_ref[i] + jnp.dot(h1.astype(jnp.bfloat16), whh1,
                                 preferred_element_type=jnp.float32)
        h1, c1 = _gate_update(g1, c1)
        # Layer 2: fused input+recurrent matmul on [h1, h2] -> (B, 2H) @ (2H, 4H).
        h12 = jnp.concatenate([h1, h2], axis=-1).astype(jnp.bfloat16)
        g2 = jnp.dot(h12, w2, preferred_element_type=jnp.float32) + b2
        h2, c2 = _gate_update(g2, c2)
        return h1, c1, h2, c2

    carry = (h1_sc[...], c1_sc[...], h2_sc[...], c2_sc[...])
    carry = lax.fori_loop(0, tb, step, carry, unroll=True)
    h1, c1, h2, c2 = carry
    h1_sc[...] = h1
    c1_sc[...] = c1
    h2_sc[...] = h2
    c2_sc[...] = c2

    # fc(out[:, -1, :]) — write the (block-resident) output only on the final chunk.
    @pl.when(t == pl.num_programs(0) - 1)
    def _():
        out_ref[...] = (jnp.dot(h2.astype(jnp.bfloat16), wfc_ref[...],
                                preferred_element_type=jnp.float32)
                        + bfc_ref[...])


def init_params(key, input_size=INPUT_SIZE, hidden_size=HIDDEN_SIZE,
                num_classes=NUM_CLASSES):
    """Deterministic init mimicking PyTorch's U(-1/sqrt(H), 1/sqrt(H))."""
    H = hidden_size
    k = 1.0 / jnp.sqrt(jnp.float32(H))
    keys = jax.random.split(key, 10)
    u = lambda kk, shape: jax.random.uniform(kk, shape, jnp.float32, -k, k)
    return {
        # PyTorch-convention shapes (out, in)
        "w_ih_l0": u(keys[0], (4 * H, input_size)),
        "w_hh_l0": u(keys[1], (4 * H, H)),
        "b_ih_l0": u(keys[2], (4 * H,)),
        "b_hh_l0": u(keys[3], (4 * H,)),
        "w_ih_l1": u(keys[4], (4 * H, H)),
        "w_hh_l1": u(keys[5], (4 * H, H)),
        "b_ih_l1": u(keys[6], (4 * H,)),
        "b_hh_l1": u(keys[7], (4 * H,)),
        "w_fc": u(keys[8], (num_classes, H)),
        "b_fc": u(keys[9], (num_classes,)),
    }


@jax.jit
def lstm_model_forward(x, params):
    """x: (B, T, INPUT_SIZE) float32 -> (B, NUM_CLASSES) float32."""
    B, T, D = x.shape
    H = HIDDEN_SIZE
    C = NUM_CLASSES
    G = 4 * H
    tb = _pick_chunk(T)
    bf16 = jnp.bfloat16

    # Kernel-friendly weight layout: (in_features, 4H), bf16 for the MXU; biases combined.
    wih1 = params["w_ih_l0"].T.astype(bf16)                                   # (D, 4H)
    whh1 = params["w_hh_l0"].T.astype(bf16)                                   # (H, 4H)
    b1 = (params["b_ih_l0"] + params["b_hh_l0"]).astype(jnp.float32)          # (4H,)
    w2 = jnp.concatenate([params["w_ih_l1"].T, params["w_hh_l1"].T],
                         axis=0).astype(bf16)                                 # (2H, 4H)
    b2 = (params["b_ih_l1"] + params["b_hh_l1"]).reshape(1, G).astype(jnp.float32)
    wfc = params["w_fc"].T.astype(bf16)                                       # (H, C)
    bfc = params["b_fc"].reshape(1, C).astype(jnp.float32)                    # (1, C)

    # Hoisted layer-1 input projection: one big matmul over all T*B rows, emitted directly in
    # time-major order (x itself is consumed batch-first; no standalone transpose of x).
    gx = jnp.einsum("btd,dg->tbg", x.astype(bf16), wih1,
                    preferred_element_type=jnp.float32) + b1                  # (T, B, 4H) f32

    out = pl.pallas_call(
        lstm_kernel,
        out_shape=jax.ShapeDtypeStruct((B, C), jnp.float32),
        grid_spec=pltpu.PrefetchScalarGridSpec(
            num_scalar_prefetch=0,
            grid=(T // tb,),
            in_specs=[
                pl.BlockSpec((tb, B, G), lambda t: (t, 0, 0)),   # gx chunk (TB timesteps)
                pl.BlockSpec((H, G), lambda t: (0, 0)),          # whh1
                pl.BlockSpec((2 * H, G), lambda t: (0, 0)),      # w2 = [Wih2; Whh2]
                pl.BlockSpec((1, G), lambda t: (0, 0)),          # b2
                pl.BlockSpec((H, C), lambda t: (0, 0)),          # wfc
                pl.BlockSpec((1, C), lambda t: (0, 0)),          # bfc
            ],
            out_specs=pl.BlockSpec((B, C), lambda t: (0, 0)),
            scratch_shapes=[
                pltpu.VMEM((B, H), jnp.float32),  # h1
                pltpu.VMEM((B, H), jnp.float32),  # c1
                pltpu.VMEM((B, H), jnp.float32),  # h2
                pltpu.VMEM((B, H), jnp.float32),  # c2
            ],
        ),
        compiler_params=pltpu.CompilerParams(
            dimension_semantics=("arbitrary",),  # time recurrence is strictly sequential
        ),
    )(gx, whh1, w2, b2, wfc, bfc)
    return out


def reference_forward(x, params):
    """Pure-JAX f32 reference mirroring nn.LSTM(batch_first=True) + Linear."""
    B, T, D = x.shape
    H = HIDDEN_SIZE

    def cell(x_t, h, c, w_ih, w_hh, b_ih, b_hh):
        gates = x_t @ w_ih.T + b_ih + h @ w_hh.T + b_hh
        i = jax.nn.sigmoid(gates[:, 0 * H:1 * H])
        f = jax.nn.sigmoid(gates[:, 1 * H:2 * H])
        g = jnp.tanh(gates[:, 2 * H:3 * H])
        o = jax.nn.sigmoid(gates[:, 3 * H:4 * H])
        c_new = f * c + i * g
        h_new = o * jnp.tanh(c_new)
        return h_new, c_new

    def step(carry, x_t):
        h1, c1, h2, c2 = carry
        h1, c1 = cell(x_t, h1, c1, params["w_ih_l0"], params["w_hh_l0"],
                      params["b_ih_l0"], params["b_hh_l0"])
        h2, c2 = cell(h1, h2, c2, params["w_ih_l1"], params["w_hh_l1"],
                      params["b_ih_l1"], params["b_hh_l1"])
        return (h1, c1, h2, c2), None

    zeros = jnp.zeros((B, H), jnp.float32)
    carry, _ = lax.scan(step, (zeros, zeros, zeros, zeros),
                        jnp.transpose(x, (1, 0, 2)))
    h2_last = carry[2]
    return h2_last @ params["w_fc"].T + params["b_fc"]


if __name__ == "__main__":
    key = jax.random.PRNGKey(0)
    pkey, xkey = jax.random.split(key)

    params = init_params(pkey)

    B, T = 2, 8
    x = jax.random.normal(xkey, (B, T, INPUT_SIZE), dtype=jnp.float32)

    out = jax.block_until_ready(lstm_model_forward(x, params))
    ref = reference_forward(x, params)

    assert out.shape == (B, NUM_CLASSES)
    max_diff = float(jnp.max(jnp.abs(out - ref)))
    # bf16 MXU operands with f32 accumulation => tolerance looser than a pure-f32 comparison.
    assert max_diff < 5e-2, f"max abs diff {max_diff}"
    print("KERNEL_OK")
</pallas_src>

<mosaic_0001>
module attributes {stable_mosaic.version = 11 : i64} {
  func.func @lstm_kernel(%arg0: i32, %arg1: memref<8x2x512xf32, #tpu.memory_space<vmem>>, %arg2: memref<128x512xbf16, #tpu.memory_space<vmem>>, %arg3: memref<256x512xbf16, #tpu.memory_space<vmem>>, %arg4: memref<1x512xf32, #tpu.memory_space<vmem>>, %arg5: memref<128x10xbf16, #tpu.memory_space<vmem>>, %arg6: memref<1x10xf32, #tpu.memory_space<vmem>>, %arg7: memref<2x10xf32, #tpu.memory_space<vmem>>, %arg8: memref<2x128xf32, #tpu.memory_space<vmem>>, %arg9: memref<2x128xf32, #tpu.memory_space<vmem>>, %arg10: memref<2x128xf32, #tpu.memory_space<vmem>>, %arg11: memref<2x128xf32, #tpu.memory_space<vmem>>) attributes {dimension_semantics = [#tpu.dimension_semantics<arbitrary>], iteration_bounds = array<i64: 1>, scalar_prefetch = 0 : i64, scratch_operands = 4 : i64, tpu.core_type = #tpu.core_type<tc>, window_params = [{transform_indices = @transform_0, window_bounds = array<i64: 8, 2, 512>}, {pipeline_mode = #tpu.pipeline_mode<synchronous>, transform_indices = @transform_1, window_bounds = array<i64: 128, 512>}, {pipeline_mode = #tpu.pipeline_mode<synchronous>, transform_indices = @transform_2, window_bounds = array<i64: 256, 512>}, {pipeline_mode = #tpu.pipeline_mode<synchronous>, transform_indices = @transform_3, window_bounds = array<i64: 1, 512>}, {pipeline_mode = #tpu.pipeline_mode<synchronous>, transform_indices = @transform_4, window_bounds = array<i64: 128, 10>}, {pipeline_mode = #tpu.pipeline_mode<synchronous>, transform_indices = @transform_5, window_bounds = array<i64: 1, 10>}, {pipeline_mode = #tpu.pipeline_mode<synchronous>, transform_indices = @transform_6, window_bounds = array<i64: 2, 10>}]} {
    %c0_i32 = arith.constant 0 : i32
    %0 = arith.cmpi eq, %arg0, %c0_i32 : i32
    %1 = arith.extui %0 : i1 to i32
    %c0_i32_0 = arith.constant 0 : i32
    %2 = arith.cmpi ne, %1, %c0_i32_0 : i32
    scf.if %2 {
      %cst_104 = arith.constant 0.000000e+00 : f32
      %505 = vector.broadcast %cst_104 : f32 to vector<2x128xf32>
      %c0_105 = arith.constant 0 : index
      %c0_106 = arith.constant 0 : index
      %506 = vector.load %arg8[%c0_105, %c0_106] : memref<2x128xf32, #tpu.memory_space<vmem>>, vector<2x128xf32>
      tpu.vector_store %arg8[%c0_105, %c0_106], %505 {strides = array<i32>} : memref<2x128xf32, #tpu.memory_space<vmem>>, vector<2x128xf32>,
      %cst_107 = arith.constant 0.000000e+00 : f32
      %507 = vector.broadcast %cst_107 : f32 to vector<2x128xf32>
      %c0_108 = arith.constant 0 : index
      %c0_109 = arith.constant 0 : index
      %508 = vector.load %arg9[%c0_108, %c0_109] : memref<2x128xf32, #tpu.memory_space<vmem>>, vector<2x128xf32>
      tpu.vector_store %arg9[%c0_108, %c0_109], %507 {strides = array<i32>} : memref<2x128xf32, #tpu.memory_space<vmem>>, vector<2x128xf32>,
      %cst_110 = arith.constant 0.000000e+00 : f32
      %509 = vector.broadcast %cst_110 : f32 to vector<2x128xf32>
      %c0_111 = arith.constant 0 : index
      %c0_112 = arith.constant 0 : index
      %510 = vector.load %arg10[%c0_111, %c0_112] : memref<2x128xf32, #tpu.memory_space<vmem>>, vector<2x128xf32>
      tpu.vector_store %arg10[%c0_111, %c0_112], %509 {strides = array<i32>} : memref<2x128xf32, #tpu.memory_space<vmem>>, vector<2x128xf32>,
      %cst_113 = arith.constant 0.000000e+00 : f32
      %511 = vector.broadcast %cst_113 : f32 to vector<2x128xf32>
      %c0_114 = arith.constant 0 : index
      %c0_115 = arith.constant 0 : index
      %512 = vector.load %arg11[%c0_114, %c0_115] : memref<2x128xf32, #tpu.memory_space<vmem>>, vector<2x128xf32>
      tpu.vector_store %arg11[%c0_114, %c0_115], %511 {strides = array<i32>} : memref<2x128xf32, #tpu.memory_space<vmem>>, vector<2x128xf32>,
    } else {
    }
    %c0 = arith.constant 0 : index
    %c0_1 = arith.constant 0 : index
    %3 = vector.load %arg2[%c0, %c0_1] : memref<128x512xbf16, #tpu.memory_space<vmem>>, vector<128x512xbf16>
    %c0_2 = arith.constant 0 : index
    %c0_3 = arith.constant 0 : index
    %4 = vector.load %arg3[%c0_2, %c0_3] : memref<256x512xbf16, #tpu.memory_space<vmem>>, vector<256x512xbf16>
    %c0_4 = arith.constant 0 : index
    %c0_5 = arith.constant 0 : index
    %5 = vector.load %arg4[%c0_4, %c0_5] : memref<1x512xf32, #tpu.memory_space<vmem>>, vector<1x512xf32>
    %c0_6 = arith.constant 0 : index
    %c0_7 = arith.constant 0 : index
    %6 = vector.load %arg8[%c0_6, %c0_7] : memref<2x128xf32, #tpu.memory_space<vmem>>, vector<2x128xf32>
    %c0_8 = arith.constant 0 : index
    %c0_9 = arith.constant 0 : index
    %7 = vector.load %arg9[%c0_8, %c0_9] : memref<2x128xf32, #tpu.memory_space<vmem>>, vector<2x128xf32>
    %c0_10 = arith.constant 0 : index
    %c0_11 = arith.constant 0 : index
    %8 = vector.load %arg10[%c0_10, %c0_11] : memref<2x128xf32, #tpu.memory_space<vmem>>, vector<2x128xf32>
    %c0_12 = arith.constant 0 : index
    %c0_13 = arith.constant 0 : index
    %9 = vector.load %arg11[%c0_12, %c0_13] : memref<2x128xf32, #tpu.memory_space<vmem>>, vector<2x128xf32>
    %c0_i32_14 = arith.constant 0 : i32
    %10 = arith.index_cast %c0_i32_14 : i32 to index
    %c0_15 = arith.constant 0 : index
    %c0_16 = arith.constant 0 : index
    %11 = vector.load %arg1[%10, %c0_15, %c0_16] : memref<8x2x512xf32, #tpu.memory_space<vmem>>, vector<1x2x512xf32>
    %12 = vector.shape_cast %11 : vector<1x2x512xf32> to vector<2x512xf32>
    %13 = arith.truncf %6 : vector<2x128xf32> to vector<2x128xbf16>
    %cst = arith.constant dense<0.000000e+00> : vector<2x512xf32>
    %14 = tpu.matmul %13, %3, %cst {dimension_numbers = #tpu.dot_dimension_numbers<[1], [0], [0], [1], [0, 0, 1, 1], [], []>} : vector<2x128xbf16>, vector<128x512xbf16>, vector<2x512xf32> -> vector<2x512xf32>
    %15 = arith.addf %12, %14 : vector<2x512xf32>
    %16 = vector.extract_strided_slice %15 {offsets = [0, 0], sizes = [2, 128], strides = [1, 1]} : vector<2x512xf32> to vector<2x128xf32>
    %17 = arith.negf %16 : vector<2x128xf32>
    %18 = math.exp %17 : vector<2x128xf32>
    %cst_17 = arith.constant 1.000000e+00 : f32
    %19 = vector.broadcast %cst_17 : f32 to vector<2x128xf32>
    %20 = arith.addf %19, %18 : vector<2x128xf32>
    %21 = arith.divf %19, %20 : vector<2x128xf32>
    %22 = vector.extract_strided_slice %15 {offsets = [0, 128], sizes = [2, 128], strides = [1, 1]} : vector<2x512xf32> to vector<2x128xf32>
    %23 = arith.negf %22 : vector<2x128xf32>
    %24 = math.exp %23 : vector<2x128xf32>
    %cst_18 = arith.constant 1.000000e+00 : f32
    %25 = vector.broadcast %cst_18 : f32 to vector<2x128xf32>
    %26 = arith.addf %25, %24 : vector<2x128xf32>
    %27 = arith.divf %25, %26 : vector<2x128xf32>
    %28 = vector.extract_strided_slice %15 {offsets = [0, 256], sizes = [2, 128], strides = [1, 1]} : vector<2x512xf32> to vector<2x128xf32>
    %29 = math.tanh %28 : vector<2x128xf32>
    %30 = vector.extract_strided_slice %15 {offsets = [0, 384], sizes = [2, 128], strides = [1, 1]} : vector<2x512xf32> to vector<2x128xf32>
    %31 = arith.negf %30 : vector<2x128xf32>
    %32 = math.exp %31 : vector<2x128xf32>
    %cst_19 = arith.constant 1.000000e+00 : f32
    %33 = vector.broadcast %cst_19 : f32 to vector<2x128xf32>
    %34 = arith.addf %33, %32 : vector<2x128xf32>
    %35 = arith.divf %33, %34 : vector<2x128xf32>
    %36 = arith.mulf %27, %7 : vector<2x128xf32>
    %37 = arith.mulf %21, %29 : vector<2x128xf32>
    %38 = arith.addf %36, %37 : vector<2x128xf32>
    %39 = math.tanh %38 : vector<2x128xf32>
    %40 = arith.mulf %35, %39 : vector<2x128xf32>
    %41 = tpu.concatenate %40, %8 in 1 : vector<2x128xf32>, vector<2x128xf32> -> vector<2x256xf32>
    %42 = arith.truncf %41 : vector<2x256xf32> to vector<2x256xbf16>
    %cst_20 = arith.constant dense<0.000000e+00> : vector<2x512xf32>
    %43 = tpu.matmul %42, %4, %cst_20 {dimension_numbers = #tpu.dot_dimension_numbers<[1], [0], [0], [1], [0, 0, 1, 1], [], []>} : vector<2x256xbf16>, vector<256x512xbf16>, vector<2x512xf32> -> vector<2x512xf32>
    %44 = vector.broadcast %5 : vector<1x512xf32> to vector<2x512xf32>
    %45 = arith.addf %43, %44 : vector<2x512xf32>
    %46 = vector.extract_strided_slice %45 {offsets = [0, 0], sizes = [2, 128], strides = [1, 1]} : vector<2x512xf32> to vector<2x128xf32>
    %47 = arith.negf %46 : vector<2x128xf32>
    %48 = math.exp %47 : vector<2x128xf32>
    %cst_21 = arith.constant 1.000000e+00 : f32
    %49 = vector.broadcast %cst_21 : f32 to vector<2x128xf32>
    %50 = arith.addf %49, %48 : vector<2x128xf32>
    %51 = arith.divf %49, %50 : vector<2x128xf32>
    %52 = vector.extract_strided_slice %45 {offsets = [0, 128], sizes = [2, 128], strides = [1, 1]} : vector<2x512xf32> to vector<2x128xf32>
    %53 = arith.negf %52 : vector<2x128xf32>
    %54 = math.exp %53 : vector<2x128xf32>
    %cst_22 = arith.constant 1.000000e+00 : f32
    %55 = vector.broadcast %cst_22 : f32 to vector<2x128xf32>
    %56 = arith.addf %55, %54 : vector<2x128xf32>
    %57 = arith.divf %55, %56 : vector<2x128xf32>
    %58 = vector.extract_strided_slice %45 {offsets = [0, 256], sizes = [2, 128], strides = [1, 1]} : vector<2x512xf32> to vector<2x128xf32>
    %59 = math.tanh %58 : vector<2x128xf32>
    %60 = vector.extract_strided_slice %45 {offsets = [0, 384], sizes = [2, 128], strides = [1, 1]} : vector<2x512xf32> to vector<2x128xf32>
    %61 = arith.negf %60 : vector<2x128xf32>
    %62 = math.exp %61 : vector<2x128xf32>
    %cst_23 = arith.constant 1.000000e+00 : f32
    %63 = vector.broadcast %cst_23 : f32 to vector<2x128xf32>
    %64 = arith.addf %63, %62 : vector<2x128xf32>
    %65 = arith.divf %63, %64 : vector<2x128xf32>
    %66 = arith.mulf %57, %9 : vector<2x128xf32>
    %67 = arith.mulf %51, %59 : vector<2x128xf32>
    %68 = arith.addf %66, %67 : vector<2x128xf32>
    %69 = math.tanh %68 : vector<2x128xf32>
    %70 = arith.mulf %65, %69 : vector<2x128xf32>
    %c1_i32 = arith.constant 1 : i32
    %71 = arith.index_cast %c1_i32 : i32 to index
    %c0_24 = arith.constant 0 : index
    %c0_25 = arith.constant 0 : index
    %72 = vector.load %arg1[%71, %c0_24, %c0_25] : memref<8x2x512xf32, #tpu.memory_space<vmem>>, vector<1x2x512xf32>
    %73 = vector.shape_cast %72 : vector<1x2x512xf32> to vector<2x512xf32>
    %74 = arith.truncf %40 : vector<2x128xf32> to vector<2x128xbf16>
    %cst_26 = arith.constant dense<0.000000e+00> : vector<2x512xf32>
    %75 = tpu.matmul %74, %3, %cst_26 {dimension_numbers = #tpu.dot_dimension_numbers<[1], [0], [0], [1], [0, 0, 1, 1], [], []>} : vector<2x128xbf16>, vector<128x512xbf16>, vector<2x512xf32> -> vector<2x512xf32>
    %76 = arith.addf %73, %75 : vector<2x512xf32>
    %77 = vector.extract_strided_slice %76 {offsets = [0, 0], sizes = [2, 128], strides = [1, 1]} : vector<2x512xf32> to vector<2x128xf32>
    %78 = arith.negf %77 : vector<2x128xf32>
    %79 = math.exp %78 : vector<2x128xf32>
    %cst_27 = arith.constant 1.000000e+00 : f32
    %80 = vector.broadcast %cst_27 : f32 to vector<2x128xf32>
    %81 = arith.addf %80, %79 : vector<2x128xf32>
    %82 = arith.divf %80, %81 : vector<2x128xf32>
    %83 = vector.extract_strided_slice %76 {offsets = [0, 128], sizes = [2, 128], strides = [1, 1]} : vector<2x512xf32> to vector<2x128xf32>
    %84 = arith.negf %83 : vector<2x128xf32>
    %85 = math.exp %84 : vector<2x128xf32>
    %cst_28 = arith.constant 1.000000e+00 : f32
    %86 = vector.broadcast %cst_28 : f32 to vector<2x128xf32>
    %87 = arith.addf %86, %85 : vector<2x128xf32>
    %88 = arith.divf %86, %87 : vector<2x128xf32>
    %89 = vector.extract_strided_slice %76 {offsets = [0, 256], sizes = [2, 128], strides = [1, 1]} : vector<2x512xf32> to vector<2x128xf32>
    %90 = math.tanh %89 : vector<2x128xf32>
    %91 = vector.extract_strided_slice %76 {offsets = [0, 384], sizes = [2, 128], strides = [1, 1]} : vector<2x512xf32> to vector<2x128xf32>
    %92 = arith.negf %91 : vector<2x128xf32>
    %93 = math.exp %92 : vector<2x128xf32>
    %cst_29 = arith.constant 1.000000e+00 : f32
    %94 = vector.broadcast %cst_29 : f32 to vector<2x128xf32>
    %95 = arith.addf %94, %93 : vector<2x128xf32>
    %96 = arith.divf %94, %95 : vector<2x128xf32>
    %97 = arith.mulf %88, %38 : vector<2x128xf32>
    %98 = arith.mulf %82, %90 : vector<2x128xf32>
    %99 = arith.addf %97, %98 : vector<2x128xf32>
    %100 = math.tanh %99 : vector<2x128xf32>
    %101 = arith.mulf %96, %100 : vector<2x128xf32>
    %102 = tpu.concatenate %101, %70 in 1 : vector<2x128xf32>, vector<2x128xf32> -> vector<2x256xf32>
    %103 = arith.truncf %102 : vector<2x256xf32> to vector<2x256xbf16>
    %cst_30 = arith.constant dense<0.000000e+00> : vector<2x512xf32>
    %104 = tpu.matmul %103, %4, %cst_30 {dimension_numbers = #tpu.dot_dimension_numbers<[1], [0], [0], [1], [0, 0, 1, 1], [], []>} : vector<2x256xbf16>, vector<256x512xbf16>, vector<2x512xf32> -> vector<2x512xf32>
    %105 = vector.broadcast %5 : vector<1x512xf32> to vector<2x512xf32>
    %106 = arith.addf %104, %105 : vector<2x512xf32>
    %107 = vector.extract_strided_slice %106 {offsets = [0, 0], sizes = [2, 128], strides = [1, 1]} : vector<2x512xf32> to vector<2x128xf32>
    %108 = arith.negf %107 : vector<2x128xf32>
    %109 = math.exp %108 : vector<2x128xf32>
    %cst_31 = arith.constant 1.000000e+00 : f32
    %110 = vector.broadcast %cst_31 : f32 to vector<2x128xf32>
    %111 = arith.addf %110, %109 : vector<2x128xf32>
    %112 = arith.divf %110, %111 : vector<2x128xf32>
    %113 = vector.extract_strided_slice %106 {offsets = [0, 128], sizes = [2, 128], strides = [1, 1]} : vector<2x512xf32> to vector<2x128xf32>
    %114 = arith.negf %113 : vector<2x128xf32>
    %115 = math.exp %114 : vector<2x128xf32>
    %cst_32 = arith.constant 1.000000e+00 : f32
    %116 = vector.broadcast %cst_32 : f32 to vector<2x128xf32>
    %117 = arith.addf %116, %115 : vector<2x128xf32>
    %118 = arith.divf %116, %117 : vector<2x128xf32>
    %119 = vector.extract_strided_slice %106 {offsets = [0, 256], sizes = [2, 128], strides = [1, 1]} : vector<2x512xf32> to vector<2x128xf32>
    %120 = math.tanh %119 : vector<2x128xf32>
    %121 = vector.extract_strided_slice %106 {offsets = [0, 384], sizes = [2, 128], strides = [1, 1]} : vector<2x512xf32> to vector<2x128xf32>
    %122 = arith.negf %121 : vector<2x128xf32>
    %123 = math.exp %122 : vector<2x128xf32>
    %cst_33 = arith.constant 1.000000e+00 : f32
    %124 = vector.broadcast %cst_33 : f32 to vector<2x128xf32>
    %125 = arith.addf %124, %123 : vector<2x128xf32>
    %126 = arith.divf %124, %125 : vector<2x128xf32>
    %127 = arith.mulf %118, %68 : vector<2x128xf32>
    %128 = arith.mulf %112, %120 : vector<2x128xf32>
    %129 = arith.addf %127, %128 : vector<2x128xf32>
    %130 = math.tanh %129 : vector<2x128xf32>
    %131 = arith.mulf %126, %130 : vector<2x128xf32>
    %c2_i32 = arith.constant 2 : i32
    %132 = arith.index_cast %c2_i32 : i32 to index
    %c0_34 = arith.constant 0 : index
    %c0_35 = arith.constant 0 : index
    %133 = vector.load %arg1[%132, %c0_34, %c0_35] : memref<8x2x512xf32, #tpu.memory_space<vmem>>, vector<1x2x512xf32>
    %134 = vector.shape_cast %133 : vector<1x2x512xf32> to vector<2x512xf32>
    %135 = arith.truncf %101 : vector<2x128xf32> to vector<2x128xbf16>
    %cst_36 = arith.constant dense<0.000000e+00> : vector<2x512xf32>
    %136 = tpu.matmul %135, %3, %cst_36 {dimension_numbers = #tpu.dot_dimension_numbers<[1], [0], [0], [1], [0, 0, 1, 1], [], []>} : vector<2x128xbf16>, vector<128x512xbf16>, vector<2x512xf32> -> vector<2x512xf32>
    %137 = arith.addf %134, %136 : vector<2x512xf32>
    %138 = vector.extract_strided_slice %137 {offsets = [0, 0], sizes = [2, 128], strides = [1, 1]} : vector<2x512xf32> to vector<2x128xf32>
    %139 = arith.negf %138 : vector<2x128xf32>
    %140 = math.exp %139 : vector<2x128xf32>
    %cst_37 = arith.constant 1.000000e+00 : f32
    %141 = vector.broadcast %cst_37 : f32 to vector<2x128xf32>
    %142 = arith.addf %141, %140 : vector<2x128xf32>
    %143 = arith.divf %141, %142 : vector<2x128xf32>
    %144 = vector.extract_strided_slice %137 {offsets = [0, 128], sizes = [2, 128], strides = [1, 1]} : vector<2x512xf32> to vector<2x128xf32>
    %145 = arith.negf %144 : vector<2x128xf32>
    %146 = math.exp %145 : vector<2x128xf32>
    %cst_38 = arith.constant 1.000000e+00 : f32
    %147 = vector.broadcast %cst_38 : f32 to vector<2x128xf32>
    %148 = arith.addf %147, %146 : vector<2x128xf32>
    %149 = arith.divf %147, %148 : vector<2x128xf32>
    %150 = vector.extract_strided_slice %137 {offsets = [0, 256], sizes = [2, 128], strides = [1, 1]} : vector<2x512xf32> to vector<2x128xf32>
    %151 = math.tanh %150 : vector<2x128xf32>
    %152 = vector.extract_strided_slice %137 {offsets = [0, 384], sizes = [2, 128], strides = [1, 1]} : vector<2x512xf32> to vector<2x128xf32>
    %153 = arith.negf %152 : vector<2x128xf32>
    %154 = math.exp %153 : vector<2x128xf32>
    %cst_39 = arith.constant 1.000000e+00 : f32
    %155 = vector.broadcast %cst_39 : f32 to vector<2x128xf32>
    %156 = arith.addf %155, %154 : vector<2x128xf32>
    %157 = arith.divf %155, %156 : vector<2x128xf32>
    %158 = arith.mulf %149, %99 : vector<2x128xf32>
    %159 = arith.mulf %143, %151 : vector<2x128xf32>
    %160 = arith.addf %158, %159 : vector<2x128xf32>
    %161 = math.tanh %160 : vector<2x128xf32>
    %162 = arith.mulf %157, %161 : vector<2x128xf32>
    %163 = tpu.concatenate %162, %131 in 1 : vector<2x128xf32>, vector<2x128xf32> -> vector<2x256xf32>
    %164 = arith.truncf %163 : vector<2x256xf32> to vector<2x256xbf16>
    %cst_40 = arith.constant dense<0.000000e+00> : vector<2x512xf32>
    %165 = tpu.matmul %164, %4, %cst_40 {dimension_numbers = #tpu.dot_dimension_numbers<[1], [0], [0], [1], [0, 0, 1, 1], [], []>} : vector<2x256xbf16>, vector<256x512xbf16>, vector<2x512xf32> -> vector<2x512xf32>
    %166 = vector.broadcast %5 : vector<1x512xf32> to vector<2x512xf32>
    %167 = arith.addf %165, %166 : vector<2x512xf32>
    %168 = vector.extract_strided_slice %167 {offsets = [0, 0], sizes = [2, 128], strides = [1, 1]} : vector<2x512xf32> to vector<2x128xf32>
    %169 = arith.negf %168 : vector<2x128xf32>
    %170 = math.exp %169 : vector<2x128xf32>
    %cst_41 = arith.constant 1.000000e+00 : f32
    %171 = vector.broadcast %cst_41 : f32 to vector<2x128xf32>
    %172 = arith.addf %171, %170 : vector<2x128xf32>
    %173 = arith.divf %171, %172 : vector<2x128xf32>
    %174 = vector.extract_strided_slice %167 {offsets = [0, 128], sizes = [2, 128], strides = [1, 1]} : vector<2x512xf32> to vector<2x128xf32>
    %175 = arith.negf %174 : vector<2x128xf32>
    %176 = math.exp %175 : vector<2x128xf32>
    %cst_42 = arith.constant 1.000000e+00 : f32
    %177 = vector.broadcast %cst_42 : f32 to vector<2x128xf32>
    %178 = arith.addf %177, %176 : vector<2x128xf32>
    %179 = arith.divf %177, %178 : vector<2x128xf32>
    %180 = vector.extract_strided_slice %167 {offsets = [0, 256], sizes = [2, 128], strides = [1, 1]} : vector<2x512xf32> to vector<2x128xf32>
    %181 = math.tanh %180 : vector<2x128xf32>
    %182 = vector.extract_strided_slice %167 {offsets = [0, 384], sizes = [2, 128], strides = [1, 1]} : vector<2x512xf32> to vector<2x128xf32>
    %183 = arith.negf %182 : vector<2x128xf32>
    %184 = math.exp %183 : vector<2x128xf32>
    %cst_43 = arith.constant 1.000000e+00 : f32
    %185 = vector.broadcast %cst_43 : f32 to vector<2x128xf32>
    %186 = arith.addf %185, %184 : vector<2x128xf32>
    %187 = arith.divf %185, %186 : vector<2x128xf32>
    %188 = arith.mulf %179, %129 : vector<2x128xf32>
    %189 = arith.mulf %173, %181 : vector<2x128xf32>
    %190 = arith.addf %188, %189 : vector<2x128xf32>
    %191 = math.tanh %190 : vector<2x128xf32>
    %192 = arith.mulf %187, %191 : vector<2x128xf32>
    %c3_i32 = arith.constant 3 : i32
    %193 = arith.index_cast %c3_i32 : i32 to index
    %c0_44 = arith.constant 0 : index
    %c0_45 = arith.constant 0 : index
    %194 = vector.load %arg1[%193, %c0_44, %c0_45] : memref<8x2x512xf32, #tpu.memory_space<vmem>>, vector<1x2x512xf32>
    %195 = vector.shape_cast %194 : vector<1x2x512xf32> to vector<2x512xf32>
    %196 = arith.truncf %162 : vector<2x128xf32> to vector<2x128xbf16>
    %cst_46 = arith.constant dense<0.000000e+00> : vector<2x512xf32>
    %197 = tpu.matmul %196, %3, %cst_46 {dimension_numbers = #tpu.dot_dimension_numbers<[1], [0], [0], [1], [0, 0, 1, 1], [], []>} : vector<2x128xbf16>, vector<128x512xbf16>, vector<2x512xf32> -> vector<2x512xf32>
    %198 = arith.addf %195, %197 : vector<2x512xf32>
    %199 = vector.extract_strided_slice %198 {offsets = [0, 0], sizes = [2, 128], strides = [1, 1]} : vector<2x512xf32> to vector<2x128xf32>
    %200 = arith.negf %199 : vector<2x128xf32>
    %201 = math.exp %200 : vector<2x128xf32>
    %cst_47 = arith.constant 1.000000e+00 : f32
    %202 = vector.broadcast %cst_47 : f32 to vector<2x128xf32>
    %203 = arith.addf %202, %201 : vector<2x128xf32>
    %204 = arith.divf %202, %203 : vector<2x128xf32>
    %205 = vector.extract_strided_slice %198 {offsets = [0, 128], sizes = [2, 128], strides = [1, 1]} : vector<2x512xf32> to vector<2x128xf32>
    %206 = arith.negf %205 : vector<2x128xf32>
    %207 = math.exp %206 : vector<2x128xf32>
    %cst_48 = arith.constant 1.000000e+00 : f32
    %208 = vector.broadcast %cst_48 : f32 to vector<2x128xf32>
    %209 = arith.addf %208, %207 : vector<2x128xf32>
    %210 = arith.divf %208, %209 : vector<2x128xf32>
    %211 = vector.extract_strided_slice %198 {offsets = [0, 256], sizes = [2, 128], strides = [1, 1]} : vector<2x512xf32> to vector<2x128xf32>
    %212 = math.tanh %211 : vector<2x128xf32>
    %213 = vector.extract_strided_slice %198 {offsets = [0, 384], sizes = [2, 128], strides = [1, 1]} : vector<2x512xf32> to vector<2x128xf32>
    %214 = arith.negf %213 : vector<2x128xf32>
    %215 = math.exp %214 : vector<2x128xf32>
    %cst_49 = arith.constant 1.000000e+00 : f32
    %216 = vector.broadcast %cst_49 : f32 to vector<2x128xf32>
    %217 = arith.addf %216, %215 : vector<2x128xf32>
    %218 = arith.divf %216, %217 : vector<2x128xf32>
    %219 = arith.mulf %210, %160 : vector<2x128xf32>
    %220 = arith.mulf %204, %212 : vector<2x128xf32>
    %221 = arith.addf %219, %220 : vector<2x128xf32>
    %222 = math.tanh %221 : vector<2x128xf32>
    %223 = arith.mulf %218, %222 : vector<2x128xf32>
    %224 = tpu.concatenate %223, %192 in 1 : vector<2x128xf32>, vector<2x128xf32> -> vector<2x256xf32>
    %225 = arith.truncf %224 : vector<2x256xf32> to vector<2x256xbf16>
    %cst_50 = arith.constant dense<0.000000e+00> : vector<2x512xf32>
    %226 = tpu.matmul %225, %4, %cst_50 {dimension_numbers = #tpu.dot_dimension_numbers<[1], [0], [0], [1], [0, 0, 1, 1], [], []>} : vector<2x256xbf16>, vector<256x512xbf16>, vector<2x512xf32> -> vector<2x512xf32>
    %227 = vector.broadcast %5 : vector<1x512xf32> to vector<2x512xf32>
    %228 = arith.addf %226, %227 : vector<2x512xf32>
    %229 = vector.extract_strided_slice %228 {offsets = [0, 0], sizes = [2, 128], strides = [1, 1]} : vector<2x512xf32> to vector<2x128xf32>
    %230 = arith.negf %229 : vector<2x128xf32>
    %231 = math.exp %230 : vector<2x128xf32>
    %cst_51 = arith.constant 1.000000e+00 : f32
    %232 = vector.broadcast %cst_51 : f32 to vector<2x128xf32>
    %233 = arith.addf %232, %231 : vector<2x128xf32>
    %234 = arith.divf %232, %233 : vector<2x128xf32>
    %235 = vector.extract_strided_slice %228 {offsets = [0, 128], sizes = [2, 128], strides = [1, 1]} : vector<2x512xf32> to vector<2x128xf32>
    %236 = arith.negf %235 : vector<2x128xf32>
    %237 = math.exp %236 : vector<2x128xf32>
    %cst_52 = arith.constant 1.000000e+00 : f32
    %238 = vector.broadcast %cst_52 : f32 to vector<2x128xf32>
    %239 = arith.addf %238, %237 : vector<2x128xf32>
    %240 = arith.divf %238, %239 : vector<2x128xf32>
    %241 = vector.extract_strided_slice %228 {offsets = [0, 256], sizes = [2, 128], strides = [1, 1]} : vector<2x512xf32> to vector<2x128xf32>
    %242 = math.tanh %241 : vector<2x128xf32>
    %243 = vector.extract_strided_slice %228 {offsets = [0, 384], sizes = [2, 128], strides = [1, 1]} : vector<2x512xf32> to vector<2x128xf32>
    %244 = arith.negf %243 : vector<2x128xf32>
    %245 = math.exp %244 : vector<2x128xf32>
    %cst_53 = arith.constant 1.000000e+00 : f32
    %246 = vector.broadcast %cst_53 : f32 to vector<2x128xf32>
    %247 = arith.addf %246, %245 : vector<2x128xf32>
    %248 = arith.divf %246, %247 : vector<2x128xf32>
    %249 = arith.mulf %240, %190 : vector<2x128xf32>
    %250 = arith.mulf %234, %242 : vector<2x128xf32>
    %251 = arith.addf %249, %250 : vector<2x128xf32>
    %252 = math.tanh %251 : vector<2x128xf32>
    %253 = arith.mulf %248, %252 : vector<2x128xf32>
    %c4_i32 = arith.constant 4 : i32
    %254 = arith.index_cast %c4_i32 : i32 to index
    %c0_54 = arith.constant 0 : index
    %c0_55 = arith.constant 0 : index
    %255 = vector.load %arg1[%254, %c0_54, %c0_55] : memref<8x2x512xf32, #tpu.memory_space<vmem>>, vector<1x2x512xf32>
    %256 = vector.shape_cast %255 : vector<1x2x512xf32> to vector<2x512xf32>
    %257 = arith.truncf %223 : vector<2x128xf32> to vector<2x128xbf16>
    %cst_56 = arith.constant dense<0.000000e+00> : vector<2x512xf32>
    %258 = tpu.matmul %257, %3, %cst_56 {dimension_numbers = #tpu.dot_dimension_numbers<[1], [0], [0], [1], [0, 0, 1, 1], [], []>} : vector<2x128xbf16>, vector<128x512xbf16>, vector<2x512xf32> -> vector<2x512xf32>
    %259 = arith.addf %256, %258 : vector<2x512xf32>
    %260 = vector.extract_strided_slice %259 {offsets = [0, 0], sizes = [2, 128], strides = [1, 1]} : vector<2x512xf32> to vector<2x128xf32>
    %261 = arith.negf %260 : vector<2x128xf32>
    %262 = math.exp %261 : vector<2x128xf32>
    %cst_57 = arith.constant 1.000000e+00 : f32
    %263 = vector.broadcast %cst_57 : f32 to vector<2x128xf32>
    %264 = arith.addf %263, %262 : vector<2x128xf32>
    %265 = arith.divf %263, %264 : vector<2x128xf32>
    %266 = vector.extract_strided_slice %259 {offsets = [0, 128], sizes = [2, 128], strides = [1, 1]} : vector<2x512xf32> to vector<2x128xf32>
    %267 = arith.negf %266 : vector<2x128xf32>
    %268 = math.exp %267 : vector<2x128xf32>
    %cst_58 = arith.constant 1.000000e+00 : f32
    %269 = vector.broadcast %cst_58 : f32 to vector<2x128xf32>
    %270 = arith.addf %269, %268 : vector<2x128xf32>
    %271 = arith.divf %269, %270 : vector<2x128xf32>
    %272 = vector.extract_strided_slice %259 {offsets = [0, 256], sizes = [2, 128], strides = [1, 1]} : vector<2x512xf32> to vector<2x128xf32>
    %273 = math.tanh %272 : vector<2x128xf32>
    %274 = vector.extract_strided_slice %259 {offsets = [0, 384], sizes = [2, 128], strides = [1, 1]} : vector<2x512xf32> to vector<2x128xf32>
    %275 = arith.negf %274 : vector<2x128xf32>
    %276 = math.exp %275 : vector<2x128xf32>
    %cst_59 = arith.constant 1.000000e+00 : f32
    %277 = vector.broadcast %cst_59 : f32 to vector<2x128xf32>
    %278 = arith.addf %277, %276 : vector<2x128xf32>
    %279 = arith.divf %277, %278 : vector<2x128xf32>
    %280 = arith.mulf %271, %221 : vector<2x128xf32>
    %281 = arith.mulf %265, %273 : vector<2x128xf32>
    %282 = arith.addf %280, %281 : vector<2x128xf32>
    %283 = math.tanh %282 : vector<2x128xf32>
    %284 = arith.mulf %279, %283 : vector<2x128xf32>
    %285 = tpu.concatenate %284, %253 in 1 : vector<2x128xf32>, vector<2x128xf32> -> vector<2x256xf32>
    %286 = arith.truncf %285 : vector<2x256xf32> to vector<2x256xbf16>
    %cst_60 = arith.constant dense<0.000000e+00> : vector<2x512xf32>
    %287 = tpu.matmul %286, %4, %cst_60 {dimension_numbers = #tpu.dot_dimension_numbers<[1], [0], [0], [1], [0, 0, 1, 1], [], []>} : vector<2x256xbf16>, vector<256x512xbf16>, vector<2x512xf32> -> vector<2x512xf32>
    %288 = vector.broadcast %5 : vector<1x512xf32> to vector<2x512xf32>
    %289 = arith.addf %287, %288 : vector<2x512xf32>
    %290 = vector.extract_strided_slice %289 {offsets = [0, 0], sizes = [2, 128], strides = [1, 1]} : vector<2x512xf32> to vector<2x128xf32>
    %291 = arith.negf %290 : vector<2x128xf32>
    %292 = math.exp %291 : vector<2x128xf32>
    %cst_61 = arith.constant 1.000000e+00 : f32
    %293 = vector.broadcast %cst_61 : f32 to vector<2x128xf32>
    %294 = arith.addf %293, %292 : vector<2x128xf32>
    %295 = arith.divf %293, %294 : vector<2x128xf32>
    %296 = vector.extract_strided_slice %289 {offsets = [0, 128], sizes = [2, 128], strides = [1, 1]} : vector<2x512xf32> to vector<2x128xf32>
    %297 = arith.negf %296 : vector<2x128xf32>
    %298 = math.exp %297 : vector<2x128xf32>
    %cst_62 = arith.constant 1.000000e+00 : f32
    %299 = vector.broadcast %cst_62 : f32 to vector<2x128xf32>
    %300 = arith.addf %299, %298 : vector<2x128xf32>
    %301 = arith.divf %299, %300 : vector<2x128xf32>
    %302 = vector.extract_strided_slice %289 {offsets = [0, 256], sizes = [2, 128], strides = [1, 1]} : vector<2x512xf32> to vector<2x128xf32>
    %303 = math.tanh %302 : vector<2x128xf32>
    %304 = vector.extract_strided_slice %289 {offsets = [0, 384], sizes = [2, 128], strides = [1, 1]} : vector<2x512xf32> to vector<2x128xf32>
    %305 = arith.negf %304 : vector<2x128xf32>
    %306 = math.exp %305 : vector<2x128xf32>
    %cst_63 = arith.constant 1.000000e+00 : f32
    %307 = vector.broadcast %cst_63 : f32 to vector<2x128xf32>
    %308 = arith.addf %307, %306 : vector<2x128xf32>
    %309 = arith.divf %307, %308 : vector<2x128xf32>
    %310 = arith.mulf %301, %251 : vector<2x128xf32>
    %311 = arith.mulf %295, %303 : vector<2x128xf32>
    %312 = arith.addf %310, %311 : vector<2x128xf32>
    %313 = math.tanh %312 : vector<2x128xf32>
    %314 = arith.mulf %309, %313 : vector<2x128xf32>
    %c5_i32 = arith.constant 5 : i32
    %315 = arith.index_cast %c5_i32 : i32 to index
    %c0_64 = arith.constant 0 : index
    %c0_65 = arith.constant 0 : index
    %316 = vector.load %arg1[%315, %c0_64, %c0_65] : memref<8x2x512xf32, #tpu.memory_space<vmem>>, vector<1x2x512xf32>
    %317 = vector.shape_cast %316 : vector<1x2x512xf32> to vector<2x512xf32>
    %318 = arith.truncf %284 : vector<2x128xf32> to vector<2x128xbf16>
    %cst_66 = arith.constant dense<0.000000e+00> : vector<2x512xf32>
    %319 = tpu.matmul %318, %3, %cst_66 {dimension_numbers = #tpu.dot_dimension_numbers<[1], [0], [0], [1], [0, 0, 1, 1], [], []>} : vector<2x128xbf16>, vector<128x512xbf16>, vector<2x512xf32> -> vector<2x512xf32>
    %320 = arith.addf %317, %319 : vector<2x512xf32>
    %321 = vector.extract_strided_slice %320 {offsets = [0, 0], sizes = [2, 128], strides = [1, 1]} : vector<2x512xf32> to vector<2x128xf32>
    %322 = arith.negf %321 : vector<2x128xf32>
    %323 = math.exp %322 : vector<2x128xf32>
    %cst_67 = arith.constant 1.000000e+00 : f32
    %324 = vector.broadcast %cst_67 : f32 to vector<2x128xf32>
    %325 = arith.addf %324, %323 : vector<2x128xf32>
    %326 = arith.divf %324, %325 : vector<2x128xf32>
    %327 = vector.extract_strided_slice %320 {offsets = [0, 128], sizes = [2, 128], strides = [1, 1]} : vector<2x512xf32> to vector<2x128xf32>
    %328 = arith.negf %327 : vector<2x128xf32>
    %329 = math.exp %328 : vector<2x128xf32>
    %cst_68 = arith.constant 1.000000e+00 : f32
    %330 = vector.broadcast %cst_68 : f32 to vector<2x128xf32>
    %331 = arith.addf %330, %329 : vector<2x128xf32>
    %332 = arith.divf %330, %331 : vector<2x128xf32>
    %333 = vector.extract_strided_slice %320 {offsets = [0, 256], sizes = [2, 128], strides = [1, 1]} : vector<2x512xf32> to vector<2x128xf32>
    %334 = math.tanh %333 : vector<2x128xf32>
    %335 = vector.extract_strided_slice %320 {offsets = [0, 384], sizes = [2, 128], strides = [1, 1]} : vector<2x512xf32> to vector<2x128xf32>
    %336 = arith.negf %335 : vector<2x128xf32>
    %337 = math.exp %336 : vector<2x128xf32>
    %cst_69 = arith.constant 1.000000e+00 : f32
    %338 = vector.broadcast %cst_69 : f32 to vector<2x128xf32>
    %339 = arith.addf %338, %337 : vector<2x128xf32>
    %340 = arith.divf %338, %339 : vector<2x128xf32>
    %341 = arith.mulf %332, %282 : vector<2x128xf32>
    %342 = arith.mulf %326, %334 : vector<2x128xf32>
    %343 = arith.addf %341, %342 : vector<2x128xf32>
    %344 = math.tanh %343 : vector<2x128xf32>
    %345 = arith.mulf %340, %344 : vector<2x128xf32>
    %346 = tpu.concatenate %345, %314 in 1 : vector<2x128xf32>, vector<2x128xf32> -> vector<2x256xf32>
    %347 = arith.truncf %346 : vector<2x256xf32> to vector<2x256xbf16>
    %cst_70 = arith.constant dense<0.000000e+00> : vector<2x512xf32>
    %348 = tpu.matmul %347, %4, %cst_70 {dimension_numbers = #tpu.dot_dimension_numbers<[1], [0], [0], [1], [0, 0, 1, 1], [], []>} : vector<2x256xbf16>, vector<256x512xbf16>, vector<2x512xf32> -> vector<2x512xf32>
    %349 = vector.broadcast %5 : vector<1x512xf32> to vector<2x512xf32>
    %350 = arith.addf %348, %349 : vector<2x512xf32>
    %351 = vector.extract_strided_slice %350 {offsets = [0, 0], sizes = [2, 128], strides = [1, 1]} : vector<2x512xf32> to vector<2x128xf32>
    %352 = arith.negf %351 : vector<2x128xf32>
    %353 = math.exp %352 : vector<2x128xf32>
    %cst_71 = arith.constant 1.000000e+00 : f32
    %354 = vector.broadcast %cst_71 : f32 to vector<2x128xf32>
    %355 = arith.addf %354, %353 : vector<2x128xf32>
    %356 = arith.divf %354, %355 : vector<2x128xf32>
    %357 = vector.extract_strided_slice %350 {offsets = [0, 128], sizes = [2, 128], strides = [1, 1]} : vector<2x512xf32> to vector<2x128xf32>
    %358 = arith.negf %357 : vector<2x128xf32>
    %359 = math.exp %358 : vector<2x128xf32>
    %cst_72 = arith.constant 1.000000e+00 : f32
    %360 = vector.broadcast %cst_72 : f32 to vector<2x128xf32>
    %361 = arith.addf %360, %359 : vector<2x128xf32>
    %362 = arith.divf %360, %361 : vector<2x128xf32>
    %363 = vector.extract_strided_slice %350 {offsets = [0, 256], sizes = [2, 128], strides = [1, 1]} : vector<2x512xf32> to vector<2x128xf32>
    %364 = math.tanh %363 : vector<2x128xf32>
    %365 = vector.extract_strided_slice %350 {offsets = [0, 384], sizes = [2, 128], strides = [1, 1]} : vector<2x512xf32> to vector<2x128xf32>
    %366 = arith.negf %365 : vector<2x128xf32>
    %367 = math.exp %366 : vector<2x128xf32>
    %cst_73 = arith.constant 1.000000e+00 : f32
    %368 = vector.broadcast %cst_73 : f32 to vector<2x128xf32>
    %369 = arith.addf %368, %367 : vector<2x128xf32>
    %370 = arith.divf %368, %369 : vector<2x128xf32>
    %371 = arith.mulf %362, %312 : vector<2x128xf32>
    %372 = arith.mulf %356, %364 : vector<2x128xf32>
    %373 = arith.addf %371, %372 : vector<2x128xf32>
    %374 = math.tanh %373 : vector<2x128xf32>
    %375 = arith.mulf %370, %374 : vector<2x128xf32>
    %c6_i32 = arith.constant 6 : i32
    %376 = arith.index_cast %c6_i32 : i32 to index
    %c0_74 = arith.constant 0 : index
    %c0_75 = arith.constant 0 : index
    %377 = vector.load %arg1[%376, %c0_74, %c0_75] : memref<8x2x512xf32, #tpu.memory_space<vmem>>, vector<1x2x512xf32>
    %378 = vector.shape_cast %377 : vector<1x2x512xf32> to vector<2x512xf32>
    %379 = arith.truncf %345 : vector<2x128xf32> to vector<2x128xbf16>
    %cst_76 = arith.constant dense<0.000000e+00> : vector<2x512xf32>
    %380 = tpu.matmul %379, %3, %cst_76 {dimension_numbers = #tpu.dot_dimension_numbers<[1], [0], [0], [1], [0, 0, 1, 1], [], []>} : vector<2x128xbf16>, vector<128x512xbf16>, vector<2x512xf32> -> vector<2x512xf32>
    %381 = arith.addf %378, %380 : vector<2x512xf32>
    %382 = vector.extract_strided_slice %381 {offsets = [0, 0], sizes = [2, 128], strides = [1, 1]} : vector<2x512xf32> to vector<2x128xf32>
    %383 = arith.negf %382 : vector<2x128xf32>
    %384 = math.exp %383 : vector<2x128xf32>
    %cst_77 = arith.constant 1.000000e+00 : f32
    %385 = vector.broadcast %cst_77 : f32 to vector<2x128xf32>
    %386 = arith.addf %385, %384 : vector<2x128xf32>
    %387 = arith.divf %385, %386 : vector<2x128xf32>
    %388 = vector.extract_strided_slice %381 {offsets = [0, 128], sizes = [2, 128], strides = [1, 1]} : vector<2x512xf32> to vector<2x128xf32>
    %389 = arith.negf %388 : vector<2x128xf32>
    %390 = math.exp %389 : vector<2x128xf32>
    %cst_78 = arith.constant 1.000000e+00 : f32
    %391 = vector.broadcast %cst_78 : f32 to vector<2x128xf32>
    %392 = arith.addf %391, %390 : vector<2x128xf32>
    %393 = arith.divf %391, %392 : vector<2x128xf32>
    %394 = vector.extract_strided_slice %381 {offsets = [0, 256], sizes = [2, 128], strides = [1, 1]} : vector<2x512xf32> to vector<2x128xf32>
    %395 = math.tanh %394 : vector<2x128xf32>
    %396 = vector.extract_strided_slice %381 {offsets = [0, 384], sizes = [2, 128], strides = [1, 1]} : vector<2x512xf32> to vector<2x128xf32>
    %397 = arith.negf %396 : vector<2x128xf32>
    %398 = math.exp %397 : vector<2x128xf32>
    %cst_79 = arith.constant 1.000000e+00 : f32
    %399 = vector.broadcast %cst_79 : f32 to vector<2x128xf32>
    %400 = arith.addf %399, %398 : vector<2x128xf32>
    %401 = arith.divf %399, %400 : vector<2x128xf32>
    %402 = arith.mulf %393, %343 : vector<2x128xf32>
    %403 = arith.mulf %387, %395 : vector<2x128xf32>
    %404 = arith.addf %402, %403 : vector<2x128xf32>
    %405 = math.tanh %404 : vector<2x128xf32>
    %406 = arith.mulf %401, %405 : vector<2x128xf32>
    %407 = tpu.concatenate %406, %375 in 1 : vector<2x128xf32>, vector<2x128xf32> -> vector<2x256xf32>
    %408 = arith.truncf %407 : vector<2x256xf32> to vector<2x256xbf16>
    %cst_80 = arith.constant dense<0.000000e+00> : vector<2x512xf32>
    %409 = tpu.matmul %408, %4, %cst_80 {dimension_numbers = #tpu.dot_dimension_numbers<[1], [0], [0], [1], [0, 0, 1, 1], [], []>} : vector<2x256xbf16>, vector<256x512xbf16>, vector<2x512xf32> -> vector<2x512xf32>
    %410 = vector.broadcast %5 : vector<1x512xf32> to vector<2x512xf32>
    %411 = arith.addf %409, %410 : vector<2x512xf32>
    %412 = vector.extract_strided_slice %411 {offsets = [0, 0], sizes = [2, 128], strides = [1, 1]} : vector<2x512xf32> to vector<2x128xf32>
    %413 = arith.negf %412 : vector<2x128xf32>
    %414 = math.exp %413 : vector<2x128xf32>
    %cst_81 = arith.constant 1.000000e+00 : f32
    %415 = vector.broadcast %cst_81 : f32 to vector<2x128xf32>
    %416 = arith.addf %415, %414 : vector<2x128xf32>
    %417 = arith.divf %415, %416 : vector<2x128xf32>
    %418 = vector.extract_strided_slice %411 {offsets = [0, 128], sizes = [2, 128], strides = [1, 1]} : vector<2x512xf32> to vector<2x128xf32>
    %419 = arith.negf %418 : vector<2x128xf32>
    %420 = math.exp %419 : vector<2x128xf32>
    %cst_82 = arith.constant 1.000000e+00 : f32
    %421 = vector.broadcast %cst_82 : f32 to vector<2x128xf32>
    %422 = arith.addf %421, %420 : vector<2x128xf32>
    %423 = arith.divf %421, %422 : vector<2x128xf32>
    %424 = vector.extract_strided_slice %411 {offsets = [0, 256], sizes = [2, 128], strides = [1, 1]} : vector<2x512xf32> to vector<2x128xf32>
    %425 = math.tanh %424 : vector<2x128xf32>
    %426 = vector.extract_strided_slice %411 {offsets = [0, 384], sizes = [2, 128], strides = [1, 1]} : vector<2x512xf32> to vector<2x128xf32>
    %427 = arith.negf %426 : vector<2x128xf32>
    %428 = math.exp %427 : vector<2x128xf32>
    %cst_83 = arith.constant 1.000000e+00 : f32
    %429 = vector.broadcast %cst_83 : f32 to vector<2x128xf32>
    %430 = arith.addf %429, %428 : vector<2x128xf32>
    %431 = arith.divf %429, %430 : vector<2x128xf32>
    %432 = arith.mulf %423, %373 : vector<2x128xf32>
    %433 = arith.mulf %417, %425 : vector<2x128xf32>
    %434 = arith.addf %432, %433 : vector<2x128xf32>
    %435 = math.tanh %434 : vector<2x128xf32>
    %436 = arith.mulf %431, %435 : vector<2x128xf32>
    %c7_i32 = arith.constant 7 : i32
    %437 = arith.index_cast %c7_i32 : i32 to index
    %c0_84 = arith.constant 0 : index
    %c0_85 = arith.constant 0 : index
    %438 = vector.load %arg1[%437, %c0_84, %c0_85] : memref<8x2x512xf32, #tpu.memory_space<vmem>>, vector<1x2x512xf32>
    %439 = vector.shape_cast %438 : vector<1x2x512xf32> to vector<2x512xf32>
    %440 = arith.truncf %406 : vector<2x128xf32> to vector<2x128xbf16>
    %cst_86 = arith.constant dense<0.000000e+00> : vector<2x512xf32>
    %441 = tpu.matmul %440, %3, %cst_86 {dimension_numbers = #tpu.dot_dimension_numbers<[1], [0], [0], [1], [0, 0, 1, 1], [], []>} : vector<2x128xbf16>, vector<128x512xbf16>, vector<2x512xf32> -> vector<2x512xf32>
    %442 = arith.addf %439, %441 : vector<2x512xf32>
    %443 = vector.extract_strided_slice %442 {offsets = [0, 0], sizes = [2, 128], strides = [1, 1]} : vector<2x512xf32> to vector<2x128xf32>
    %444 = arith.negf %443 : vector<2x128xf32>
    %445 = math.exp %444 : vector<2x128xf32>
    %cst_87 = arith.constant 1.000000e+00 : f32
    %446 = vector.broadcast %cst_87 : f32 to vector<2x128xf32>
    %447 = arith.addf %446, %445 : vector<2x128xf32>
    %448 = arith.divf %446, %447 : vector<2x128xf32>
    %449 = vector.extract_strided_slice %442 {offsets = [0, 128], sizes = [2, 128], strides = [1, 1]} : vector<2x512xf32> to vector<2x128xf32>
    %450 = arith.negf %449 : vector<2x128xf32>
    %451 = math.exp %450 : vector<2x128xf32>
    %cst_88 = arith.constant 1.000000e+00 : f32
    %452 = vector.broadcast %cst_88 : f32 to vector<2x128xf32>
    %453 = arith.addf %452, %451 : vector<2x128xf32>
    %454 = arith.divf %452, %453 : vector<2x128xf32>
    %455 = vector.extract_strided_slice %442 {offsets = [0, 256], sizes = [2, 128], strides = [1, 1]} : vector<2x512xf32> to vector<2x128xf32>
    %456 = math.tanh %455 : vector<2x128xf32>
    %457 = vector.extract_strided_slice %442 {offsets = [0, 384], sizes = [2, 128], strides = [1, 1]} : vector<2x512xf32> to vector<2x128xf32>
    %458 = arith.negf %457 : vector<2x128xf32>
    %459 = math.exp %458 : vector<2x128xf32>
    %cst_89 = arith.constant 1.000000e+00 : f32
    %460 = vector.broadcast %cst_89 : f32 to vector<2x128xf32>
    %461 = arith.addf %460, %459 : vector<2x128xf32>
    %462 = arith.divf %460, %461 : vector<2x128xf32>
    %463 = arith.mulf %454, %404 : vector<2x128xf32>
    %464 = arith.mulf %448, %456 : vector<2x128xf32>
    %465 = arith.addf %463, %464 : vector<2x128xf32>
    %466 = math.tanh %465 : vector<2x128xf32>
    %467 = arith.mulf %462, %466 : vector<2x128xf32>
    %468 = tpu.concatenate %467, %436 in 1 : vector<2x128xf32>, vector<2x128xf32> -> vector<2x256xf32>
    %469 = arith.truncf %468 : vector<2x256xf32> to vector<2x256xbf16>
    %cst_90 = arith.constant dense<0.000000e+00> : vector<2x512xf32>
    %470 = tpu.matmul %469, %4, %cst_90 {dimension_numbers = #tpu.dot_dimension_numbers<[1], [0], [0], [1], [0, 0, 1, 1], [], []>} : vector<2x256xbf16>, vector<256x512xbf16>, vector<2x512xf32> -> vector<2x512xf32>
    %471 = vector.broadcast %5 : vector<1x512xf32> to vector<2x512xf32>
    %472 = arith.addf %470, %471 : vector<2x512xf32>
    %473 = vector.extract_strided_slice %472 {offsets = [0, 0], sizes = [2, 128], strides = [1, 1]} : vector<2x512xf32> to vector<2x128xf32>
    %474 = arith.negf %473 : vector<2x128xf32>
    %475 = math.exp %474 : vector<2x128xf32>
    %cst_91 = arith.constant 1.000000e+00 : f32
    %476 = vector.broadcast %cst_91 : f32 to vector<2x128xf32>
    %477 = arith.addf %476, %475 : vector<2x128xf32>
    %478 = arith.divf %476, %477 : vector<2x128xf32>
    %479 = vector.extract_strided_slice %472 {offsets = [0, 128], sizes = [2, 128], strides = [1, 1]} : vector<2x512xf32> to vector<2x128xf32>
    %480 = arith.negf %479 : vector<2x128xf32>
    %481 = math.exp %480 : vector<2x128xf32>
    %cst_92 = arith.constant 1.000000e+00 : f32
    %482 = vector.broadcast %cst_92 : f32 to vector<2x128xf32>
    %483 = arith.addf %482, %481 : vector<2x128xf32>
    %484 = arith.divf %482, %483 : vector<2x128xf32>
    %485 = vector.extract_strided_slice %472 {offsets = [0, 256], sizes = [2, 128], strides = [1, 1]} : vector<2x512xf32> to vector<2x128xf32>
    %486 = math.tanh %485 : vector<2x128xf32>
    %487 = vector.extract_strided_slice %472 {offsets = [0, 384], sizes = [2, 128], strides = [1, 1]} : vector<2x512xf32> to vector<2x128xf32>
    %488 = arith.negf %487 : vector<2x128xf32>
    %489 = math.exp %488 : vector<2x128xf32>
    %cst_93 = arith.constant 1.000000e+00 : f32
    %490 = vector.broadcast %cst_93 : f32 to vector<2x128xf32>
    %491 = arith.addf %490, %489 : vector<2x128xf32>
    %492 = arith.divf %490, %491 : vector<2x128xf32>
    %493 = arith.mulf %484, %434 : vector<2x128xf32>
    %494 = arith.mulf %478, %486 : vector<2x128xf32>
    %495 = arith.addf %493, %494 : vector<2x128xf32>
    %496 = math.tanh %495 : vector<2x128xf32>
    %497 = arith.mulf %492, %496 : vector<2x128xf32>
    %c8_i32 = arith.constant 8 : i32
    %c0_94 = arith.constant 0 : index
    %c0_95 = arith.constant 0 : index
    %498 = vector.load %arg8[%c0_94, %c0_95] : memref<2x128xf32, #tpu.memory_space<vmem>>, vector<2x128xf32>
    tpu.vector_store %arg8[%c0_94, %c0_95], %467 {strides = array<i32>} : memref<2x128xf32, #tpu.memory_space<vmem>>, vector<2x128xf32>,
    %c0_96 = arith.constant 0 : index
    %c0_97 = arith.constant 0 : index
    %499 = vector.load %arg9[%c0_96, %c0_97] : memref<2x128xf32, #tpu.memory_space<vmem>>, vector<2x128xf32>
    tpu.vector_store %arg9[%c0_96, %c0_97], %465 {strides = array<i32>} : memref<2x128xf32, #tpu.memory_space<vmem>>, vector<2x128xf32>,
    %c0_98 = arith.constant 0 : index
    %c0_99 = arith.constant 0 : index
    %500 = vector.load %arg10[%c0_98, %c0_99] : memref<2x128xf32, #tpu.memory_space<vmem>>, vector<2x128xf32>
    tpu.vector_store %arg10[%c0_98, %c0_99], %497 {strides = array<i32>} : memref<2x128xf32, #tpu.memory_space<vmem>>, vector<2x128xf32>,
    %c0_100 = arith.constant 0 : index
    %c0_101 = arith.constant 0 : index
    %501 = vector.load %arg11[%c0_100, %c0_101] : memref<2x128xf32, #tpu.memory_space<vmem>>, vector<2x128xf32>
    tpu.vector_store %arg11[%c0_100, %c0_101], %495 {strides = array<i32>} : memref<2x128xf32, #tpu.memory_space<vmem>>, vector<2x128xf32>,
    %c0_i32_102 = arith.constant 0 : i32
    %502 = arith.cmpi eq, %arg0, %c0_i32_102 : i32
    %503 = arith.extui %502 : i1 to i32
    %c0_i32_103 = arith.constant 0 : i32
    %504 = arith.cmpi ne, %503, %c0_i32_103 : i32
    scf.if %504 {
      %505 = arith.truncf %497 : vector<2x128xf32> to vector<2x128xbf16>
      %c0_104 = arith.constant 0 : index
      %c0_105 = arith.constant 0 : index
      %506 = vector.load %arg5[%c0_104, %c0_105] : memref<128x10xbf16, #tpu.memory_space<vmem>>, vector<128x10xbf16>
      %cst_106 = arith.constant dense<0.000000e+00> : vector<2x10xf32>
      %507 = tpu.matmul %505, %506, %cst_106 {dimension_numbers = #tpu.dot_dimension_numbers<[1], [0], [0], [1], [0, 0, 1, 1], [], []>} : vector<2x128xbf16>, vector<128x10xbf16>, vector<2x10xf32> -> vector<2x10xf32>
      %c0_107 = arith.constant 0 : index
      %c0_108 = arith.constant 0 : index
      %508 = vector.load %arg6[%c0_107, %c0_108] : memref<1x10xf32, #tpu.memory_space<vmem>>, vector<1x10xf32>
      %509 = vector.broadcast %508 : vector<1x10xf32> to vector<2x10xf32>
      %510 = arith.addf %507, %509 : vector<2x10xf32>
      %c0_109 = arith.constant 0 : index
      %c0_110 = arith.constant 0 : index
      %511 = vector.load %arg7[%c0_109, %c0_110] : memref<2x10xf32, #tpu.memory_space<vmem>>, vector<2x10xf32>
      tpu.vector_store %arg7[%c0_109, %c0_110], %510 {strides = array<i32>} : memref<2x10xf32, #tpu.memory_space<vmem>>, vector<2x10xf32>,
    } else {
    }
    return
  }
  func.func @transform_0(%arg0: i32) -> (i32, i32, i32) {
    %c0_i32 = arith.constant 0 : i32
    %c0_i32_0 = arith.constant 0 : i32
    %c0_i32_1 = arith.constant 0 : i32
    return %arg0, %c0_i32, %c0_i32_0 : i32, i32, i32
  }
  func.func @transform_1(%arg0: i32) -> (i32, i32) {
    %c0_i32 = arith.constant 0 : i32
    %c0_i32_0 = arith.constant 0 : i32
    %c0_i32_1 = arith.constant 0 : i32
    return %c0_i32, %c0_i32_0 : i32, i32
  }
  func.func @transform_2(%arg0: i32) -> (i32, i32) {
    %c0_i32 = arith.constant 0 : i32
    %c0_i32_0 = arith.constant 0 : i32
    %c0_i32_1 = arith.constant 0 : i32
    return %c0_i32, %c0_i32_0 : i32, i32
  }
  func.func @transform_3(%arg0: i32) -> (i32, i32) {
    %c0_i32 = arith.constant 0 : i32
    %c0_i32_0 = arith.constant 0 : i32
    %c0_i32_1 = arith.constant 0 : i32
    return %c0_i32, %c0_i32_0 : i32, i32
  }
  func.func @transform_4(%arg0: i32) -> (i32, i32) {
    %c0_i32 = arith.constant 0 : i32
    %c0_i32_0 = arith.constant 0 : i32
    %c0_i32_1 = arith.constant 0 : i32
    return %c0_i32, %c0_i32_0 : i32, i32
  }
  func.func @transform_5(%arg0: i32) -> (i32, i32) {
    %c0_i32 = arith.constant 0 : i32
    %c0_i32_0 = arith.constant 0 : i32
    %c0_i32_1 = arith.constant 0 : i32
    return %c0_i32, %c0_i32_0 : i32, i32
  }
  func.func @transform_6(%arg0: i32) -> (i32, i32) {
    %c0_i32 = arith.constant 0 : i32
    %c0_i32_0 = arith.constant 0 : i32
    %c0_i32_1 = arith.constant 0 : i32
    return %c0_i32, %c0_i32_0 : i32, i32
  }
}

</mosaic_0001>

<bundles_post_ra>
// kernel: lstm_model_forward.1
= control target key start
LH: loop header
LB: loop body
LE: loop exit
PB: predicated region body
PF: predicated region fallthrough
CT: control target
= control target key end

     0   :  { %v6029_v2 = vmov 0   ;;  %v6027_v3 = vmov 0.0   ;;  %s6020_s0 = inlined_call_operand.vmem [shape: f32[8,2,512], index: 0, kind: input, shape index: {}]   ;;  %s6021_s1 = inlined_call_operand.vmem [shape: bf16[128,512], index: 1, kind: input, shape index: {}]   ;;  %s6022_s2 = inlined_call_operand.vmem [shape: bf16[256,512], index: 2, kind: input, shape index: {}]   ;;  %s6023_s3 = inlined_call_operand.vmem [shape: f32[1,512], index: 3, kind: input, shape index: {}]   ;;  %s6024_s4 = inlined_call_operand.vmem [shape: bf16[128,10], index: 4, kind: input, shape index: {}]   ;;  %s6025_s5 = inlined_call_operand.vmem [shape: f32[1,10], index: 5, kind: input, shape index: {}]   ;;  %s6026_s6 = inlined_call_operand.hbm [shape: f32[2,10], index: 6, kind: output, shape index: {}]  }
   0x1   :  { %v3599_v0 = vld [vmem:[%s6021_s1 + $0x4] ss:$16 sps:$4 sm:$0xff]   ;;  %v3604_v1 = vld [vmem:[%s6021_s1 + $0xc] ss:$16 sps:$4 sm:$0xff]   ;;  %328 = vmatprep.mubr.bf16.mxu0 %v6029_v2  ;;  %369 = vmatprep.mubr.bf16.mxu1 %v6029_v2  ;;  %29 = vst [vmem:[#allocation2] sm:$0x3] %v6027_v3 }
   0x2   :  { %6334 = vst [vmem:[#allocation9_spill] sm:$0xff] %v3599_v0  ;;  %6335 = vst [vmem:[#allocation10_spill] sm:$0xff] %v3604_v1  ;;  %296 = vmatprep.subr.bf16.mxu0 %v3599_v0  ;;  %v3616_v4 = vld [vmem:[%s6021_s1] ss:$16 sps:$4 sm:$0xff]   ;;  %v3621_v5 = vld [vmem:[%s6021_s1 + $0x8] ss:$16 sps:$4 sm:$0xff]   ;;  %337 = vmatprep.subr.bf16.mxu1 %v3604_v1 }
   0x3   :  { %30 = vst [vmem:[#allocation3] sm:$0x3] %v6027_v3  ;;  %31 = vst [vmem:[#allocation4] sm:$0x3] %v6027_v3  ;;  %v3627_v6 = vld [vmem:[%s6021_s1 + $0x24] ss:$16 sps:$4 sm:$0xff]   ;;  %297 = vmatpush1.bf16.msra.mxu0 %v3616_v4  ;;  %338 = vmatpush1.bf16.msra.mxu1 %v3621_v5 }
   0x4   :  { %32 = vst [vmem:[#allocation5] sm:$0x3] %v6027_v3  ;;  %v3634_v7 = vld [vmem:[%s6021_s1 + $0x2c] ss:$16 sps:$4 sm:$0xff]   ;;  %v3639_v8 = vld [vmem:[%s6021_s1 + $0x20] ss:$16 sps:$4 sm:$0xff]   ;;  %298 = vmatprep.subr.bf16.mxu0 %v3627_v6 }
   0x5   :  { %v3645_v9 = vld [vmem:[%s6021_s1 + $0x28] ss:$16 sps:$4 sm:$0xff]   ;;  %339 = vmatprep.subr.bf16.mxu1 %v3634_v7  ;;  %v3651_v10 = vld [vmem:[%s6021_s1 + $0x44] ss:$16 sps:$4 sm:$0xff]   ;;  %v3656_v11 = vld [vmem:[%s6021_s1 + $0x4c] ss:$16 sps:$4 sm:$0xff]  }
   0x6   :  { %v3661_v12 = vld [vmem:[%s6021_s1 + $0x40] ss:$16 sps:$4 sm:$0xff]   ;;  %v3666_v13 = vld [vmem:[%s6021_s1 + $0x48] ss:$16 sps:$4 sm:$0xff]   ;;  %v3673_v14 = vld [vmem:[%s6021_s1 + $0x64] ss:$16 sps:$4 sm:$0xff]  }
   0x7   :  { %299 = vmatpush1.bf16.msra.mxu0 %v3639_v8  ;;  %340 = vmatpush1.bf16.msra.mxu1 %v3645_v9  ;;  %v3680_v15 = vld [vmem:[%s6021_s1 + $0x6c] ss:$16 sps:$4 sm:$0xff]   ;;  %v3685_v16 = vld [vmem:[%s6021_s1 + $0x60] ss:$16 sps:$4 sm:$0xff]   ;;  %v3692_v17 = vld [vmem:[%s6021_s1 + $0x68] ss:$16 sps:$4 sm:$0xff]  }
   0x8   :  { %300 = vmatprep.subr.bf16.mxu0 %v3651_v10  ;;  %341 = vmatprep.subr.bf16.mxu1 %v3656_v11  ;;  %v3697_v18 = vld [vmem:[%s6021_s1 + $0x84] ss:$16 sps:$4 sm:$0xff]   ;;  %v3704_v19 = vld [vmem:[%s6021_s1 + $0x8c] ss:$16 sps:$4 sm:$0xff]   ;;  %v3709_v20 = vld [vmem:[%s6021_s1 + $0x80] ss:$16 sps:$4 sm:$0xff]  }
   0x9   :  { %v3714_v21 = vld [vmem:[%s6021_s1 + $0x88] ss:$16 sps:$4 sm:$0xff]   ;;  %v3721_v22 = vld [vmem:[%s6021_s1 + $0xa4] ss:$16 sps:$4 sm:$0xff]   ;;  %v3728_v23 = vld [vmem:[%s6021_s1 + $0xac] ss:$16 sps:$4 sm:$0xff]  }
   0xa   :  { %v3735_v24 = vld [vmem:[%s6021_s1 + $0xa0] ss:$16 sps:$4 sm:$0xff]   ;;  %v3740_v25 = vld [vmem:[%s6021_s1 + $0xa8] ss:$16 sps:$4 sm:$0xff]   ;;  %v3747_v26 = vld [vmem:[%s6021_s1 + $0xc4] ss:$16 sps:$4 sm:$0xff]  }
   0xb   :  { %301 = vmatpush1.bf16.msra.mxu0 %v3661_v12  ;;  %342 = vmatpush1.bf16.msra.mxu1 %v3666_v13  ;;  %v3752_v27 = vld [vmem:[%s6021_s1 + $0xcc] ss:$16 sps:$4 sm:$0xff]   ;;  %v3757_v28 = vld [vmem:[%s6021_s1 + $0xc0] ss:$16 sps:$4 sm:$0xff]   ;;  %v3762_v29 = vld [vmem:[%s6021_s1 + $0xc8] ss:$16 sps:$4 sm:$0xff]  }
   0xc   :  { %302 = vmatprep.subr.bf16.mxu0 %v3673_v14  ;;  %343 = vmatprep.subr.bf16.mxu1 %v3680_v15  ;;  %v3769_v30 = vld [vmem:[%s6021_s1 + $0xe4] ss:$16 sps:$4 sm:$0xff]   ;;  %v3776_v31 = vld [vmem:[%s6021_s1 + $0xec] ss:$16 sps:$4 sm:$0xff]   ;;  %v3781_v32 = vld [vmem:[%s6021_s1 + $0xe0] ss:$16 sps:$4 sm:$0xff]  }
   0xd   :  { %v3786_v33 = vld [vmem:[%s6021_s1 + $0xe8] ss:$16 sps:$4 sm:$0xff]   ;;  %v130_v34 = vld [vmem:[#allocation2] sm:$0x3]  ;;  %v3791_v35 = vld [vmem:[%s6022_s2 + $0x4] ss:$16 sps:$4 sm:$0xff]  }
   0xe   :  { %v3796_v36 = vld [vmem:[%s6022_s2 + $0xc] ss:$16 sps:$4 sm:$0xff]   ;;  %v3805_v37 = vld [vmem:[%s6022_s2] ss:$16 sps:$4 sm:$0xff]   ;;  %v3810_v38 = vld [vmem:[%s6022_s2 + $0x8] ss:$16 sps:$4 sm:$0xff]   ;;  %v135_v39 = vpack.c.bf16 %v130_v34, %v130_v34 }
   0xf   :  { %303 = vmatpush1.bf16.msra.mxu0 %v3685_v16  ;;  %344 = vmatpush1.bf16.msra.mxu1 %v3692_v17  ;;  %v3815_v40 = vld [vmem:[%s6022_s2 + $0x24] ss:$16 sps:$4 sm:$0xff]   ;;  %v3820_v41 = vld [vmem:[%s6022_s2 + $0x2c] ss:$16 sps:$4 sm:$0xff]   ;;  %v3829_v42 = vld [vmem:[%s6022_s2 + $0x20] ss:$16 sps:$4 sm:$0xff]  }
  0x10   :  { %304 = vmatprep.subr.bf16.mxu0 %v3697_v18  ;;  %345 = vmatprep.subr.bf16.mxu1 %v3704_v19  ;;  %v3834_v43 = vld [vmem:[%s6022_s2 + $0x28] ss:$16 sps:$4 sm:$0xff]  }
  0x13   :  { %305 = vmatpush1.bf16.msra.mxu0 %v3709_v20  ;;  %346 = vmatpush1.bf16.msra.mxu1 %v3714_v21 }
  0x14   :  { %306 = vmatprep.subr.bf16.mxu0 %v3721_v22  ;;  %347 = vmatprep.subr.bf16.mxu1 %v3728_v23 }
  0x17   :  { %307 = vmatpush1.bf16.msra.mxu0 %v3735_v24  ;;  %348 = vmatpush1.bf16.msra.mxu1 %v3740_v25 }
  0x18   :  { %308 = vmatprep.subr.bf16.mxu0 %v3747_v26  ;;  %349 = vmatprep.subr.bf16.mxu1 %v3752_v27 }
  0x1b   :  { %309 = vmatpush1.bf16.msra.mxu0 %v3757_v28  ;;  %350 = vmatpush1.bf16.msra.mxu1 %v3762_v29 }
  0x1c   :  { %310 = vmatprep.subr.bf16.mxu0 %v3769_v30  ;;  %351 = vmatprep.subr.bf16.mxu1 %v3776_v31 }
  0x1f   :  { %311 = vmatpush1.bf16.msra.mxu0 %v3781_v32  ;;  %352 = vmatpush1.bf16.msra.mxu1 %v3786_v33 }
  0x20   :  { %775 = vmatprep.subr.bf16.mxu0 %v3791_v35  ;;  %816 = vmatprep.subr.bf16.mxu1 %v3796_v36 }
  0x22   :  { %329 = vmatmul.mubr.bf16.vlgmr.msra.gmra.mrb[0].mxu0 %v135_v39  ;;  %370 = vmatmul.mubr.bf16.vlgmr.msra.gmra.mrb[0].mxu1 %v135_v39 }
  0x23   :  { %776 = vmatpush1.bf16.msra.mxu0 %v3805_v37  ;;  %817 = vmatpush1.bf16.msra.mxu1 %v3810_v38 }
  0x24   :  { %777 = vmatprep.subr.bf16.mxu0 %v3815_v40  ;;  %818 = vmatprep.subr.bf16.mxu1 %v3820_v41 }
  0x27   :  { %778 = vmatpush1.bf16.msra.mxu0 %v3829_v42  ;;  %819 = vmatpush1.bf16.msra.mxu1 %v3834_v43 }
  0x28   :  { %11 = vsyncpa [#allocation7], 0  ;;  %v3845_v44 = vld [vmem:[%s6022_s2 + $0x44] ss:$16 sps:$4 sm:$0xff]   ;;  %v3850_v45 = vld [vmem:[%s6022_s2 + $0x4c] ss:$16 sps:$4 sm:$0xff]  }
  0x29   :  { %779 = vmatprep.subr.bf16.mxu0 %v3845_v44  ;;  %820 = vmatprep.subr.bf16.mxu1 %v3850_v45  ;;  %v3857_v46 = vld [vmem:[%s6022_s2 + $0x40] ss:$16 sps:$4 sm:$0xff]   ;;  %v3862_v47 = vld [vmem:[%s6022_s2 + $0x48] ss:$16 sps:$4 sm:$0xff]   ;;  %v3869_v48 = vld [vmem:[%s6022_s2 + $0x64] ss:$16 sps:$4 sm:$0xff]  }
  0x2a   :  { %v3874_v49 = vld [vmem:[%s6022_s2 + $0x6c] ss:$16 sps:$4 sm:$0xff]   ;;  %v3879_v50 = vld [vmem:[%s6022_s2 + $0x60] ss:$16 sps:$4 sm:$0xff]   ;;  %v3884_v51 = vld [vmem:[%s6022_s2 + $0x68] ss:$16 sps:$4 sm:$0xff]  }
  0x2b   :  { %780 = vmatpush1.bf16.msra.mxu0 %v3857_v46  ;;  %821 = vmatpush1.bf16.msra.mxu1 %v3862_v47  ;;  %6336 = vst [vmem:[#allocation11_spill] sm:$0xff] %v3884_v51  ;;  %v3893_v52 = vld [vmem:[%s6022_s2 + $0x84] ss:$16 sps:$4 sm:$0xff]   ;;  %v3898_v53 = vld [vmem:[%s6022_s2 + $0x8c] ss:$16 sps:$4 sm:$0xff]   ;;  %vm3559_vm0 = vmmov 0  }
  0x2c   :  { %781 = vmatprep.subr.bf16.mxu0 %v3869_v48  ;;  %822 = vmatprep.subr.bf16.mxu1 %v3874_v49  ;;  %6337 = vst [vmem:[#allocation12_spill] sm:$0xff] %v3893_v52  ;;  %6338 = vst [vmem:[#allocation13_spill] sm:$0xff] %v3898_v53  ;;  %v3903_v54 = vld [vmem:[%s6022_s2 + $0x80] ss:$16 sps:$4 sm:$0xff]   ;;  %v3908_v55 = vld [vmem:[%s6022_s2 + $0x88] ss:$16 sps:$4 sm:$0xff]  }
  0x2d   :  { %6339 = vst [vmem:[#allocation14_spill] sm:$0xff] %v3903_v54  ;;  %6340 = vst [vmem:[#allocation15_spill] sm:$0xff] %v3908_v55  ;;  %v3917_v56 = vld [vmem:[%s6022_s2 + $0xa4] ss:$16 sps:$4 sm:$0xff]   ;;  %v3922_v57 = vld [vmem:[%s6022_s2 + $0xac] ss:$16 sps:$4 sm:$0xff]  }
  0x2e   :  { %6341 = vst [vmem:[#allocation16_spill] sm:$0xff] %v3917_v56  ;;  %6342 = vst [vmem:[#allocation17_spill] sm:$0xff] %v3922_v57  ;;  %v3927_v58 = vld [vmem:[%s6022_s2 + $0xa0] ss:$16 sps:$4 sm:$0xff]   ;;  %v3932_v59 = vld [vmem:[%s6022_s2 + $0xa8] ss:$16 sps:$4 sm:$0xff]  }
  0x2f   :  { %782 = vmatpush1.bf16.msra.mxu0 %v3879_v50  ;;  %823 = vmatpush1.bf16.msra.mxu1 %v3884_v51  ;;  %6343 = vst [vmem:[#allocation18_spill] sm:$0xff] %v3927_v58  ;;  %6344 = vst [vmem:[#allocation19_spill] sm:$0xff] %v3932_v59  ;;  %v3941_v60 = vld [vmem:[%s6022_s2 + $0xc4] ss:$16 sps:$4 sm:$0xff]   ;;  %v3946_v61 = vld [vmem:[%s6022_s2 + $0xcc] ss:$16 sps:$4 sm:$0xff]  }
  0x30   :  { %783 = vmatprep.subr.bf16.mxu0 %v3893_v52  ;;  %824 = vmatprep.subr.bf16.mxu1 %v3898_v53  ;;  %6345 = vst [vmem:[#allocation20_spill] sm:$0xff] %v3941_v60  ;;  %6346 = vst [vmem:[#allocation21_spill] sm:$0xff] %v3946_v61  ;;  %v3951_v62 = vld [vmem:[%s6022_s2 + $0xc0] ss:$16 sps:$4 sm:$0xff]   ;;  %v3956_v63 = vld [vmem:[%s6022_s2 + $0xc8] ss:$16 sps:$4 sm:$0xff]  }
  0x31   :  { %6347 = vst [vmem:[#allocation22_spill] sm:$0xff] %v3951_v62  ;;  %6348 = vst [vmem:[#allocation23_spill] sm:$0xff] %v3956_v63  ;;  %v3965_v34 = vld [vmem:[%s6022_s2 + $0xe4] ss:$16 sps:$4 sm:$0xff]   ;;  %v3970_v39 = vld [vmem:[%s6022_s2 + $0xec] ss:$16 sps:$4 sm:$0xff]  }
  0x32   :  { %6349 = vst [vmem:[#allocation24_spill] sm:$0xff] %v3965_v34  ;;  %6350 = vst [vmem:[#allocation25_spill] sm:$0xff] %v3970_v39  ;;  %v3975_v3 = vld [vmem:[%s6022_s2 + $0xe0] ss:$16 sps:$4 sm:$0xff]   ;;  %v3980_v2 = vld [vmem:[%s6022_s2 + $0xe8] ss:$16 sps:$4 sm:$0xff]  }
  0x33   :  { %784 = vmatpush1.bf16.msra.mxu0 %v3903_v54  ;;  %825 = vmatpush1.bf16.msra.mxu1 %v3908_v55  ;;  %6351 = vst [vmem:[#allocation26_spill] sm:$0xff] %v3975_v3  ;;  %6352 = vst [vmem:[#allocation27_spill] sm:$0xff] %v3980_v2  ;;  %s3560_s7 = smov [#allocation6]   ;;  %vm2722_vm1 = vcmask 74752  }
  0x34   :  { %785 = vmatprep.subr.bf16.mxu0 %v3917_v56  ;;  %826 = vmatprep.subr.bf16.mxu1 %v3922_v57  ;;  %s2730_s8 = sshll.u32 %s3560_s7, 4  ;;  %s2731_s8 = int_to_ptr.vmem [resolvable:$true] %s2730_s8 }
  0x35   :  { %s3532_s9 = scalar_lea.vmem %s2731_s8, 32  ;;  %p3537_p1 = scmp.lt.s32.totalorder %s2731_s8, %s2731_s8 }
  0x36   :  { %p3533_p0 = scmp.ne.s32.totalorder %s2731_s8, %s3532_s9  ;;  %p3538_p2 = scmp.lt.s32.totalorder %s3532_s9, %s3532_s9 }
  0x37   :  { %786 = vmatpush1.bf16.msra.mxu0 %v3927_v58  ;;  %827 = vmatpush1.bf16.msra.mxu1 %v3932_v59 }
  0x38   :  { %787 = vmatprep.subr.bf16.mxu0 %v3941_v60  ;;  %828 = vmatprep.subr.bf16.mxu1 %v3946_v61  ;;  %v4047_v61 = vld [vmem:[%s6022_s2 + $0x140] ss:$16 sps:$4 sm:$0xff]   ;;  %p3539_p3 = por %p3538_p2, %p3537_p1 }
  0x39   :  { %6363 = vst [vmem:[#allocation38_spill] sm:$0xff] %v4047_v61 }
  0x3a   :  { %p3540_p4 = pnand %p3539_p3, %p3533_p0 }
  0x3b   :  { %788 = vmatpush1.bf16.msra.mxu0 %v3951_v62  ;;  %829 = vmatpush1.bf16.msra.mxu1 %v3956_v63  ;;  %v3989_v63 = vld [vmem:[%s6022_s2 + $0x104] ss:$16 sps:$4 sm:$0xff]   ;;  %v3994_v62 = vld [vmem:[%s6022_s2 + $0x10c] ss:$16 sps:$4 sm:$0xff]  }
  0x3c   :  { %789 = vmatprep.subr.bf16.mxu0 %v3965_v34  ;;  %830 = vmatprep.subr.bf16.mxu1 %v3970_v39  ;;  %6353 = vst [vmem:[#allocation28_spill] sm:$0xff] %v3989_v63  ;;  %6354 = vst [vmem:[#allocation29_spill] sm:$0xff] %v3994_v62  ;;  %v3999_v34 = vld [vmem:[%s6022_s2 + $0x100] ss:$16 sps:$4 sm:$0xff]   ;;  %v4018_v39 = vld [vmem:[%s6022_s2 + $0x12c] ss:$16 sps:$4 sm:$0xff]  }
  0x3d   :  { %6355 = vst [vmem:[#allocation30_spill] sm:$0xff] %v3999_v34  ;;  %6358 = vst [vmem:[#allocation33_spill] sm:$0xff] %v4018_v39 }
  0x3f   :  { %790 = vmatpush1.bf16.msra.mxu0 %v3975_v3  ;;  %831 = vmatpush1.bf16.msra.mxu1 %v3980_v2  ;;  %v4004_v3 = vld [vmem:[%s6022_s2 + $0x108] ss:$16 sps:$4 sm:$0xff]   ;;  %v4013_v2 = vld [vmem:[%s6022_s2 + $0x124] ss:$16 sps:$4 sm:$0xff]  }
  0x40   :  { %6356 = vst [vmem:[#allocation31_spill] sm:$0xff] %v4004_v3  ;;  %791 = vmatprep.subr.bf16.mxu0 %v3989_v63  ;;  %832 = vmatprep.subr.bf16.mxu1 %v3994_v62  ;;  %6357 = vst [vmem:[#allocation32_spill] sm:$0xff] %v4013_v2  ;;  %v4023_v63 = vld [vmem:[%s6022_s2 + $0x120] ss:$16 sps:$4 sm:$0xff]   ;;  %v4040_v62 = vld [vmem:[%s6022_s2 + $0x14c] ss:$16 sps:$4 sm:$0xff]  }
  0x41   :  { %6359 = vst [vmem:[#allocation34_spill] sm:$0xff] %v4023_v63  ;;  %6362 = vst [vmem:[#allocation37_spill] sm:$0xff] %v4040_v62 }
  0x43   :  { %792 = vmatpush1.bf16.msra.mxu0 %v3999_v34  ;;  %833 = vmatpush1.bf16.msra.mxu1 %v4004_v3  ;;  %v4028_v34 = vld [vmem:[%s6022_s2 + $0x128] ss:$16 sps:$4 sm:$0xff]   ;;  %v4033_v3 = vld [vmem:[%s6022_s2 + $0x144] ss:$16 sps:$4 sm:$0xff]  }
  0x44   :  { %6360 = vst [vmem:[#allocation35_spill] sm:$0xff] %v4028_v34  ;;  %6361 = vst [vmem:[#allocation36_spill] sm:$0xff] %v4033_v3  ;;  %793 = vmatprep.subr.bf16.mxu0 %v4013_v2  ;;  %834 = vmatprep.subr.bf16.mxu1 %v4018_v39  ;;  %v4052_v2 = vld [vmem:[%s6022_s2 + $0x148] ss:$16 sps:$4 sm:$0xff]   ;;  %v132_v39 = vld [vmem:[#allocation4] sm:$0x3] }
  0x45   :  { %6364 = vst [vmem:[#allocation39_spill] sm:$0xff] %v4052_v2  ;;  %v433_v60 = vpack.c.bf16 %v132_v39, %v132_v39  ;;  %v4107_v39 = vld [vmem:[%s6022_s2 + $0x1a4] ss:$16 sps:$4 sm:$0xff]  }
  0x46   :  { %6373 = vst [vmem:[#allocation48_spill] sm:$0xff] %v4107_v39 }
  0x47   :  { %794 = vmatpush1.bf16.msra.mxu0 %v4023_v63  ;;  %835 = vmatpush1.bf16.msra.mxu1 %v4028_v34  ;;  %v4059_v63 = vld [vmem:[%s6022_s2 + $0x164] ss:$16 sps:$4 sm:$0xff]   ;;  %v4064_v34 = vld [vmem:[%s6022_s2 + $0x16c] ss:$16 sps:$4 sm:$0xff]  }
  0x48   :  { %795 = vmatprep.subr.bf16.mxu0 %v4033_v3  ;;  %836 = vmatprep.subr.bf16.mxu1 %v4040_v62  ;;  %6365 = vst [vmem:[#allocation40_spill] sm:$0xff] %v4059_v63  ;;  %6366 = vst [vmem:[#allocation41_spill] sm:$0xff] %v4064_v34  ;;  %v4071_v3 = vld [vmem:[%s6022_s2 + $0x160] ss:$16 sps:$4 sm:$0xff]   ;;  %v4076_v62 = vld [vmem:[%s6022_s2 + $0x168] ss:$16 sps:$4 sm:$0xff]  }
  0x49   :  { %6367 = vst [vmem:[#allocation42_spill] sm:$0xff] %v4071_v3  ;;  %6368 = vst [vmem:[#allocation43_spill] sm:$0xff] %v4076_v62  ;;  %807 = vmatprep.mubr.bf16.mxu0 %v433_v60  ;;  %848 = vmatprep.mubr.bf16.mxu1 %v433_v60  ;;  %v4131_v60 = vld [vmem:[%s6022_s2 + $0x1c4] ss:$16 sps:$4 sm:$0xff]  }
  0x4a   :  { %6377 = vst [vmem:[#allocation52_spill] sm:$0xff] %v4131_v60 }
  0x4b   :  { %796 = vmatpush1.bf16.msra.mxu0 %v4047_v61  ;;  %837 = vmatpush1.bf16.msra.mxu1 %v4052_v2  ;;  %v4083_v61 = vld [vmem:[%s6022_s2 + $0x184] ss:$16 sps:$4 sm:$0xff]   ;;  %v4088_v2 = vld [vmem:[%s6022_s2 + $0x18c] ss:$16 sps:$4 sm:$0xff]  }
  0x4c   :  { %797 = vmatprep.subr.bf16.mxu0 %v4059_v63  ;;  %838 = vmatprep.subr.bf16.mxu1 %v4064_v34  ;;  %6369 = vst [vmem:[#allocation44_spill] sm:$0xff] %v4083_v61  ;;  %6370 = vst [vmem:[#allocation45_spill] sm:$0xff] %v4088_v2  ;;  %v4095_v34 = vld [vmem:[%s6022_s2 + $0x180] ss:$16 sps:$4 sm:$0xff]   ;;  %v4100_v63 = vld [vmem:[%s6022_s2 + $0x188] ss:$16 sps:$4 sm:$0xff]  }
  0x4d   :  { %6371 = vst [vmem:[#allocation46_spill] sm:$0xff] %v4095_v34  ;;  %6372 = vst [vmem:[#allocation47_spill] sm:$0xff] %v4100_v63 }
  0x4f   :  { %798 = vmatpush1.bf16.msra.mxu0 %v4071_v3  ;;  %839 = vmatpush1.bf16.msra.mxu1 %v4076_v62  ;;  %v4112_v62 = vld [vmem:[%s6022_s2 + $0x1ac] ss:$16 sps:$4 sm:$0xff]  }
  0x50   :  { %799 = vmatprep.subr.bf16.mxu0 %v4083_v61  ;;  %840 = vmatprep.subr.bf16.mxu1 %v4088_v2  ;;  %6374 = vst [vmem:[#allocation49_spill] sm:$0xff] %v4112_v62  ;;  %v4119_v2 = vld [vmem:[%s6022_s2 + $0x1a0] ss:$16 sps:$4 sm:$0xff]   ;;  %v4124_v61 = vld [vmem:[%s6022_s2 + $0x1a8] ss:$16 sps:$4 sm:$0xff]  }
  0x51   :  { %6375 = vst [vmem:[#allocation50_spill] sm:$0xff] %v4119_v2  ;;  %6376 = vst [vmem:[#allocation51_spill] sm:$0xff] %v4124_v61 }
  0x53   :  { %800 = vmatpush1.bf16.msra.mxu0 %v4095_v34  ;;  %841 = vmatpush1.bf16.msra.mxu1 %v4100_v63  ;;  %v4136_v63 = vld [vmem:[%s6022_s2 + $0x1cc] ss:$16 sps:$4 sm:$0xff]   ;;  %v387_v34 = vlaneseq }
  0x54   :  { %801 = vmatprep.subr.bf16.mxu0 %v4107_v39  ;;  %842 = vmatprep.subr.bf16.mxu1 %v4112_v62  ;;  %6378 = vst [vmem:[#allocation53_spill] sm:$0xff] %v4136_v63  ;;  %v4143_v39 = vld [vmem:[%s6022_s2 + $0x1c0] ss:$16 sps:$4 sm:$0xff]   ;;  %v4148_v62 = vld [vmem:[%s6022_s2 + $0x1c8] ss:$16 sps:$4 sm:$0xff]  }
  0x55   :  { %6379 = vst [vmem:[#allocation54_spill] sm:$0xff] %v4143_v39  ;;  %6380 = vst [vmem:[#allocation55_spill] sm:$0xff] %v4148_v62  ;;  %v4180_v59 = vshrl.u32 %v387_v34, 7  ;;  %v134_v34 = vld [vmem:[%s6020_s0] sm:$0xff] }
  0x57   :  { %802 = vmatpush1.bf16.msra.mxu0 %v4119_v2  ;;  %843 = vmatpush1.bf16.msra.mxu1 %v4124_v61  ;;  %v4155_v2 = vld [vmem:[%s6022_s2 + $0x1e4] ss:$16 sps:$4 sm:$0xff]   ;;  %v4160_v61 = vld [vmem:[%s6022_s2 + $0x1ec] ss:$16 sps:$4 sm:$0xff]   ;;  %6385 = vst [vmem:[#allocation60_spill] sm:$0xff] %v4180_v59 }
  0x58   :  { %803 = vmatprep.subr.bf16.mxu0 %v4131_v60  ;;  %844 = vmatprep.subr.bf16.mxu1 %v4136_v63  ;;  %6381 = vst [vmem:[#allocation56_spill] sm:$0xff] %v4155_v2  ;;  %6382 = vst [vmem:[#allocation57_spill] sm:$0xff] %v4160_v61  ;;  %v4167_v60 = vld [vmem:[%s6022_s2 + $0x1e0] ss:$16 sps:$4 sm:$0xff]   ;;  %v4172_v63 = vld [vmem:[%s6022_s2 + $0x1e8] ss:$16 sps:$4 sm:$0xff]  }
  0x59   :  { %6383 = vst [vmem:[#allocation58_spill] sm:$0xff] %v4167_v60  ;;  %6384 = vst [vmem:[#allocation59_spill] sm:$0xff] %v4172_v63 }
  0x5b   :  { %804 = vmatpush1.bf16.msra.mxu0 %v4143_v39  ;;  %845 = vmatpush1.bf16.msra.mxu1 %v4148_v62  ;;  %v3558_v62 = vmov 1983009808  }
  0x5c   :  { %805 = vmatprep.subr.bf16.mxu0 %v4155_v2  ;;  %846 = vmatprep.subr.bf16.mxu1 %v4160_v61  ;;  %v385_v39 = vunpack.c.l.s4 %v3558_v62 }
  0x5e   :  { %v386_v3 = vunpack.c.0.s8 %v385_v39 }
  0x5f   :  { %806 = vmatpush1.bf16.msra.mxu0 %v4167_v60  ;;  %847 = vmatpush1.bf16.msra.mxu1 %v4172_v63 }
  0x60   :  { %883 = vmatprep.subr.bf16.mxu0 %v3599_v0  ;;  %924 = vmatprep.subr.bf16.mxu1 %v3604_v1  ;;  %v4183_v2 = vsub.s32 %v386_v3, %v4180_v59 }
  0xf5   :  { %v330_v58 = vpop.f32.mrb[0].mxu0  ;;  %v371_v57 = vpop.f32.mrb[0].mxu1 }
  0xf6   :  { %v332_v61 = vpop.f32.mrb[1].mxu0  ;;  %v373_v56 = vpop.f32.mrb[1].mxu1 }
  0xf7   :  { %v382_v60 = vcombine.low %v330_v58, %v332_v61  ;;  %v383_v55 = vcombine.low %v371_v57, %v373_v56  ;;  %v334_v63 = vpop.f32.mrb[2].mxu0  ;;  %v375_v54 = vpop.f32.mrb[2].mxu1 }
  0xf8   :  { %v335_v0 = vpop.f32.mrb[3].mxu0  ;;  %v376_v53 = vpop.f32.mrb[3].mxu1 }
  0xf9   :  { %v390_v1 = vrot.slane %v382_v60, %v4183_v2  ;;  %v397_v62 = vrot.slane %v383_v55, %v4183_v2 }
  0xfb   :  { %v398_v39 = vcombine.low %v390_v1, %v397_v62  ;;  %v131_v1 = vld [vmem:[#allocation3] sm:$0x3] }
  0xfd   :  { %v400_v52 = vadd.f32 %v398_v39, %v134_v34 }
  0xff   :  { %v2770_v3 = vmul.f32 -1.442695, %v400_v52  ;;  %v408_v59 = vrot.slane %v400_v52, 2  ;;  %v419_v56 = vrot.slane %v400_v52, 6  ;;  %v416_v0 = vrot.slane %v400_v52, 4 }
 0x101   :  { %3084 = vpow2.f32 %v2770_v3  ;;  %v2771_v51 = vmul.f32 -1.442695, %v408_v59  ;;  %v2772_v57 = vmul.f32 -1.442695, %v419_v56 }
 0x103   :  { %3086 = vpow2.f32 %v2771_v51 }
 0x104   :  { %3088 = vpow2.f32 %v2772_v57 }
 0x10b   :  { %v3085_v54 = vpop.eup %3084 }
 0x10c   :  { %v404_v53 = vadd.f32 1.0, %v3085_v54  ;;  %v6386_v54 = vmov 0  }
 0x10d   :  { %v3087_v58 = vpop.eup %3086 }
 0x10e   :  { %3090 = vrcp.f32 %v404_v53  ;;  %v413_v55 = vadd.f32 1.0, %v3087_v58  ;;  %v3089_v61 = vpop.eup %3088  ;;  %v6412_v53 = vld [vmem:[#allocation36_spill] sm:$0xff]  ;;  %v6413_v58 = vld [vmem:[#allocation37_spill] sm:$0xff] }
 0x10f   :  { %3092 = vtanh.f32 %v416_v0  ;;  %v424_v34 = vadd.f32 1.0, %v3089_v61  ;;  %v6411_v0 = vld [vmem:[#allocation35_spill] sm:$0xff] }
 0x110   :  { %3094 = vrcp.f32 %v413_v55  ;;  %v6414_v55 = vld [vmem:[#allocation38_spill] sm:$0xff]  ;;  %v6415_v61 = vld [vmem:[#allocation39_spill] sm:$0xff] }
 0x111   :  { %3096 = vrcp.f32 %v424_v34  ;;  %v6420_v34 = vld [vmem:[#allocation44_spill] sm:$0xff] }
 0x118   :  { %v3091_v63 = vpop.eup %3090 }
 0x119   :  { %v3093_v60 = vpop.eup %3092 }
 0x11a   :  { %v3095_v62 = vpop.eup %3094  ;;  %v428_v59 = vmul.f32 %v3093_v60, %v3091_v63  ;;  %v6416_v63 = vld [vmem:[#allocation40_spill] sm:$0xff]  ;;  %v6418_v60 = vld [vmem:[#allocation42_spill] sm:$0xff] }
 0x11b   :  { %v427_v39 = vmul.f32 %v3095_v62, %v131_v1  ;;  %v3097_v52 = vpop.eup %3096  ;;  %v6417_v1 = vld [vmem:[#allocation41_spill] sm:$0xff]  ;;  %v6419_v62 = vld [vmem:[#allocation43_spill] sm:$0xff] }
 0x11d   :  { %v4190_v51 = vadd.f32 %v428_v59, %v427_v39  ;;  %v6421_v39 = vld [vmem:[#allocation45_spill] sm:$0xff]  ;;  %v6422_v59 = vld [vmem:[#allocation46_spill] sm:$0xff] }
 0x11f   :  { %3098 = vtanh.f32 %v4190_v51 }
 0x129   :  { %v3099_v3 = vpop.eup %3098 }
 0x12a   :  { %v431_v56 = vmul.f32 %v3099_v3, %v3097_v52  ;;  %v6423_v52 = vld [vmem:[#allocation47_spill] sm:$0xff]  ;;  %v6424_v3 = vld [vmem:[#allocation48_spill] sm:$0xff] }
 0x12c   :  { %v432_v57 = vpack.c.bf16 %v431_v56, %v431_v56  ;;  %v6425_v56 = vld [vmem:[#allocation49_spill] sm:$0xff] }
 0x12e   :  { %808 = vmatmul.mubr.bf16.vlgmr.msra.gmra.mrb[4].mxu0 %v432_v57  ;;  %849 = vmatmul.mubr.bf16.vlgmr.msra.gmra.mrb[4].mxu1 %v432_v57 }
 0x12f   :  { %884 = vmatpush1.bf16.msra.mxu0 %v3616_v4  ;;  %925 = vmatpush1.bf16.msra.mxu1 %v3621_v5  ;;  %v6387_v4 = vld [vmem:[#allocation11_spill] sm:$0xff]  ;;  %v6388_v5 = vld [vmem:[#allocation12_spill] sm:$0xff] }
 0x130   :  { %885 = vmatprep.subr.bf16.mxu0 %v3627_v6  ;;  %926 = vmatprep.subr.bf16.mxu1 %v3634_v7  ;;  %v6389_v6 = vld [vmem:[#allocation13_spill] sm:$0xff]  ;;  %v6390_v7 = vld [vmem:[#allocation14_spill] sm:$0xff] }
 0x131   :  { %915 = vmatprep.mubr.bf16.mxu0 %v6386_v54  ;;  %956 = vmatprep.mubr.bf16.mxu1 %v6386_v54 }
 0x133   :  { %886 = vmatpush1.bf16.msra.mxu0 %v3639_v8  ;;  %927 = vmatpush1.bf16.msra.mxu1 %v3645_v9  ;;  %v6391_v8 = vld [vmem:[#allocation15_spill] sm:$0xff]  ;;  %v6392_v9 = vld [vmem:[#allocation16_spill] sm:$0xff] }
 0x134   :  { %887 = vmatprep.subr.bf16.mxu0 %v3651_v10  ;;  %928 = vmatprep.subr.bf16.mxu1 %v3656_v11  ;;  %v6393_v10 = vld [vmem:[#allocation17_spill] sm:$0xff]  ;;  %v6394_v11 = vld [vmem:[#allocation18_spill] sm:$0xff] }
 0x137   :  { %888 = vmatpush1.bf16.msra.mxu0 %v3661_v12  ;;  %929 = vmatpush1.bf16.msra.mxu1 %v3666_v13  ;;  %v6395_v12 = vld [vmem:[#allocation19_spill] sm:$0xff]  ;;  %v6396_v13 = vld [vmem:[#allocation20_spill] sm:$0xff] }
 0x138   :  { %889 = vmatprep.subr.bf16.mxu0 %v3673_v14  ;;  %930 = vmatprep.subr.bf16.mxu1 %v3680_v15  ;;  %v6397_v14 = vld [vmem:[#allocation21_spill] sm:$0xff]  ;;  %v6398_v15 = vld [vmem:[#allocation22_spill] sm:$0xff] }
 0x13b   :  { %890 = vmatpush1.bf16.msra.mxu0 %v3685_v16  ;;  %931 = vmatpush1.bf16.msra.mxu1 %v3692_v17  ;;  %v6399_v16 = vld [vmem:[#allocation23_spill] sm:$0xff]  ;;  %v6400_v17 = vld [vmem:[#allocation24_spill] sm:$0xff] }
 0x13c   :  { %891 = vmatprep.subr.bf16.mxu0 %v3697_v18  ;;  %932 = vmatprep.subr.bf16.mxu1 %v3704_v19  ;;  %v6401_v18 = vld [vmem:[#allocation25_spill] sm:$0xff]  ;;  %v6402_v19 = vld [vmem:[#allocation26_spill] sm:$0xff] }
 0x13f   :  { %892 = vmatpush1.bf16.msra.mxu0 %v3709_v20  ;;  %933 = vmatpush1.bf16.msra.mxu1 %v3714_v21  ;;  %v6403_v20 = vld [vmem:[#allocation27_spill] sm:$0xff]  ;;  %v6404_v21 = vld [vmem:[#allocation28_spill] sm:$0xff] }
 0x140   :  { %893 = vmatprep.subr.bf16.mxu0 %v3721_v22  ;;  %934 = vmatprep.subr.bf16.mxu1 %v3728_v23  ;;  %v6405_v22 = vld [vmem:[#allocation29_spill] sm:$0xff]  ;;  %v6406_v23 = vld [vmem:[#allocation30_spill] sm:$0xff] }
 0x143   :  { %894 = vmatpush1.bf16.msra.mxu0 %v3735_v24  ;;  %935 = vmatpush1.bf16.msra.mxu1 %v3740_v25  ;;  %v6407_v24 = vld [vmem:[#allocation31_spill] sm:$0xff]  ;;  %v6408_v25 = vld [vmem:[#allocation32_spill] sm:$0xff] }
 0x144   :  { %895 = vmatprep.subr.bf16.mxu0 %v3747_v26  ;;  %936 = vmatprep.subr.bf16.mxu1 %v3752_v27  ;;  %v6409_v26 = vld [vmem:[#allocation33_spill] sm:$0xff]  ;;  %v6410_v27 = vld [vmem:[#allocation34_spill] sm:$0xff] }
 0x147   :  { %896 = vmatpush1.bf16.msra.mxu0 %v3757_v28  ;;  %937 = vmatpush1.bf16.msra.mxu1 %v3762_v29 }
 0x148   :  { %897 = vmatprep.subr.bf16.mxu0 %v3769_v30  ;;  %938 = vmatprep.subr.bf16.mxu1 %v3776_v31 }
 0x14b   :  { %898 = vmatpush1.bf16.msra.mxu0 %v3781_v32  ;;  %939 = vmatpush1.bf16.msra.mxu1 %v3786_v33 }
 0x14c   :  { %1021 = vmatprep.subr.bf16.mxu0 %v3791_v35  ;;  %1062 = vmatprep.subr.bf16.mxu1 %v3796_v36 }
 0x14e   :  { %916 = vmatmul.mubr.bf16.vlgmr.msra.gmra.mrb[8].mxu0 %v432_v57  ;;  %957 = vmatmul.mubr.bf16.vlgmr.msra.gmra.mrb[8].mxu1 %v432_v57  ;;  %v6426_v57 = vld [vmem:[#allocation50_spill] sm:$0xff] }
 0x14f   :  { %1022 = vmatpush1.bf16.msra.mxu0 %v3805_v37  ;;  %1063 = vmatpush1.bf16.msra.mxu1 %v3810_v38 }
 0x150   :  { %1023 = vmatprep.subr.bf16.mxu0 %v3815_v40  ;;  %1064 = vmatprep.subr.bf16.mxu1 %v3820_v41 }
 0x153   :  { %1024 = vmatpush1.bf16.msra.mxu0 %v3829_v42  ;;  %1065 = vmatpush1.bf16.msra.mxu1 %v3834_v43 }
 0x154   :  { %1025 = vmatprep.subr.bf16.mxu0 %v3845_v44  ;;  %1066 = vmatprep.subr.bf16.mxu1 %v3850_v45 }
 0x157   :  { %1026 = vmatpush1.bf16.msra.mxu0 %v3857_v46  ;;  %1067 = vmatpush1.bf16.msra.mxu1 %v3862_v47 }
 0x158   :  { %1027 = vmatprep.subr.bf16.mxu0 %v3869_v48  ;;  %1068 = vmatprep.subr.bf16.mxu1 %v3874_v49 }
 0x15b   :  { %1028 = vmatpush1.bf16.msra.mxu0 %v3879_v50  ;;  %1069 = vmatpush1.bf16.msra.mxu1 %v6387_v4 }
 0x15c   :  { %1029 = vmatprep.subr.bf16.mxu0 %v6388_v5  ;;  %1070 = vmatprep.subr.bf16.mxu1 %v6389_v6 }
 0x15f   :  { %1030 = vmatpush1.bf16.msra.mxu0 %v6390_v7  ;;  %1071 = vmatpush1.bf16.msra.mxu1 %v6391_v8 }
 0x160   :  { %1031 = vmatprep.subr.bf16.mxu0 %v6392_v9  ;;  %1072 = vmatprep.subr.bf16.mxu1 %v6393_v10 }
 0x163   :  { %1032 = vmatpush1.bf16.msra.mxu0 %v6394_v11  ;;  %1073 = vmatpush1.bf16.msra.mxu1 %v6395_v12 }
 0x164   :  { %1033 = vmatprep.subr.bf16.mxu0 %v6396_v13  ;;  %1074 = vmatprep.subr.bf16.mxu1 %v6397_v14 }
 0x167   :  { %1034 = vmatpush1.bf16.msra.mxu0 %v6398_v15  ;;  %1075 = vmatpush1.bf16.msra.mxu1 %v6399_v16 }
 0x168   :  { %1035 = vmatprep.subr.bf16.mxu0 %v6400_v17  ;;  %1076 = vmatprep.subr.bf16.mxu1 %v6401_v18 }
 0x16b   :  { %1036 = vmatpush1.bf16.msra.mxu0 %v6402_v19  ;;  %1077 = vmatpush1.bf16.msra.mxu1 %v6403_v20 }
 0x16c   :  { %1037 = vmatprep.subr.bf16.mxu0 %v6404_v21  ;;  %1078 = vmatprep.subr.bf16.mxu1 %v6405_v22 }
 0x16f   :  { %1038 = vmatpush1.bf16.msra.mxu0 %v6406_v23  ;;  %1079 = vmatpush1.bf16.msra.mxu1 %v6407_v24 }
 0x170   :  { %1039 = vmatprep.subr.bf16.mxu0 %v6408_v25  ;;  %1080 = vmatprep.subr.bf16.mxu1 %v6409_v26 }
 0x173   :  { %1040 = vmatpush1.bf16.msra.mxu0 %v6410_v27  ;;  %1081 = vmatpush1.bf16.msra.mxu1 %v6411_v0 }
 0x174   :  { %1041 = vmatprep.subr.bf16.mxu0 %v6412_v53  ;;  %1082 = vmatprep.subr.bf16.mxu1 %v6413_v58 }
 0x177   :  { %1042 = vmatpush1.bf16.msra.mxu0 %v6414_v55  ;;  %1083 = vmatpush1.bf16.msra.mxu1 %v6415_v61 }
 0x178   :  { %1043 = vmatprep.subr.bf16.mxu0 %v6416_v63  ;;  %1084 = vmatprep.subr.bf16.mxu1 %v6417_v1  ;;  %v6427_v63 = vld [vmem:[#allocation51_spill] sm:$0xff]  ;;  %v6428_v1 = vld [vmem:[#allocation52_spill] sm:$0xff] }
 0x17b   :  { %1044 = vmatpush1.bf16.msra.mxu0 %v6418_v60  ;;  %1085 = vmatpush1.bf16.msra.mxu1 %v6419_v62  ;;  %v6429_v60 = vld [vmem:[#allocation53_spill] sm:$0xff]  ;;  %v6430_v62 = vld [vmem:[#allocation54_spill] sm:$0xff] }
 0x17c   :  { %1045 = vmatprep.subr.bf16.mxu0 %v6420_v34  ;;  %1086 = vmatprep.subr.bf16.mxu1 %v6421_v39  ;;  %v6431_v34 = vld [vmem:[#allocation55_spill] sm:$0xff]  ;;  %v6432_v39 = vld [vmem:[#allocation56_spill] sm:$0xff] }
 0x17f   :  { %1046 = vmatpush1.bf16.msra.mxu0 %v6422_v59  ;;  %1087 = vmatpush1.bf16.msra.mxu1 %v6423_v52  ;;  %v6433_v59 = vld [vmem:[#allocation57_spill] sm:$0xff]  ;;  %v6434_v52 = vld [vmem:[#allocation58_spill] sm:$0xff] }
 0x180   :  { %1047 = vmatprep.subr.bf16.mxu0 %v6424_v3  ;;  %1088 = vmatprep.subr.bf16.mxu1 %v6425_v56  ;;  %v6435_v3 = vld [vmem:[#allocation59_spill] sm:$0xff]  ;;  %v6436_v56 = vld [vmem:[#allocation9_spill] sm:$0xff] }
 0x183   :  { %1048 = vmatpush1.bf16.msra.mxu0 %v6426_v57  ;;  %1089 = vmatpush1.bf16.msra.mxu1 %v6427_v63  ;;  %v6437_v57 = vld [vmem:[#allocation10_spill] sm:$0xff]  ;;  %v6438_v63 = vld [vmem:[#allocation60_spill] sm:$0xff] }
 0x184   :  { %1049 = vmatprep.subr.bf16.mxu0 %v6428_v1  ;;  %1090 = vmatprep.subr.bf16.mxu1 %v6429_v60  ;;  %v437_v1 = vsub.s32 0, %v6438_v63 }
 0x187   :  { %1050 = vmatpush1.bf16.msra.mxu0 %v6430_v62  ;;  %1091 = vmatpush1.bf16.msra.mxu1 %v6431_v34  ;;  %v129_v62 = vld [vmem:[%s6023_s3] sm:$0xf]  ;;  %v441_v34 = vsub.s32 1, %v6438_v63 }
 0x188   :  { %1051 = vmatprep.subr.bf16.mxu0 %v6432_v39  ;;  %1092 = vmatprep.subr.bf16.mxu1 %v6433_v59  ;;  %v4296_v60 = vrot.slane %v129_v62, %v437_v1 }
 0x189   :  { %v4298_v39 = vrot.slane %v129_v62, %v441_v34  ;;  %v445_v34 = vsub.s32 2, %v6438_v63 }
 0x18a   :  { %6439 = vst [vmem:[#allocation11_spill] sm:$0xff] %v4296_v60 }
 0x18b   :  { %1052 = vmatpush1.bf16.msra.mxu0 %v6434_v52  ;;  %1093 = vmatpush1.bf16.msra.mxu1 %v6435_v3  ;;  %v449_v3 = vsub.s32 3, %v6438_v63  ;;  %v4307_v23 = vrot.slane %v129_v62, %v445_v34 }
 0x18c   :  { %1129 = vmatprep.subr.bf16.mxu0 %v6436_v56  ;;  %1170 = vmatprep.subr.bf16.mxu1 %v6437_v57 }
 0x18d   :  { %v4303_v1 = vrot.slane %v129_v62, %v449_v3  ;;  %6441 = vst [vmem:[#allocation13_spill] sm:$0xff] %v4307_v23 }
 0x18f   :  { %6440 = vst [vmem:[#allocation12_spill] sm:$0xff] %v4303_v1 }
 0x201   :  { %v809_v59 = vpop.f32.mrb[4].mxu0  ;;  %v850_v52 = vpop.f32.mrb[4].mxu1 }
 0x202   :  { %v810_v56 = vadd.f32 %v809_v59, %v4296_v60  ;;  %v811_v61 = vpop.f32.mrb[5].mxu0  ;;  %v852_v57 = vpop.f32.mrb[5].mxu1  ;;  %v851_v60 = vadd.f32 %v850_v52, %v4307_v23 }
 0x203   :  { %v812_v55 = vadd.f32 %v811_v61, %v4298_v39  ;;  %v813_v58 = vpop.f32.mrb[6].mxu0  ;;  %v854_v53 = vpop.f32.mrb[6].mxu1  ;;  %v853_v24 = vadd.f32 %v852_v57, %v4303_v1 }
 0x204   :  { %v2837_v0 = vmul.f32 -1.442695, %v810_v56  ;;  %v814_v27 = vpop.f32.mrb[7].mxu0  ;;  %v855_v26 = vpop.f32.mrb[7].mxu1 }
 0x205   :  { %v2838_v25 = vmul.f32 -1.442695, %v812_v55  ;;  %v2839_v59 = vmul.f32 -1.442695, %v853_v24  ;;  %v133_v55 = vld [vmem:[#allocation5] sm:$0x3] }
 0x206   :  { %3100 = vpow2.f32 %v2837_v0 }
 0x207   :  { %3102 = vpow2.f32 %v2838_v25 }
 0x208   :  { %3104 = vpow2.f32 %v2839_v59 }
 0x209   :  { %3106 = vtanh.f32 %v851_v60 }
 0x210   :  { %v3101_v61 = vpop.eup %3100 }
 0x211   :  { %v3103_v58 = vpop.eup %3102  ;;  %v860_v53 = vadd.f32 1.0, %v3101_v61 }
 0x212   :  { %v866_v26 = vadd.f32 1.0, %v3103_v58  ;;  %v3105_v27 = vpop.eup %3104 }
 0x213   :  { %3108 = vrcp.f32 %v860_v53  ;;  %v3107_v0 = vpop.eup %3106  ;;  %v873_v56 = vadd.f32 1.0, %v3105_v27 }
 0x214   :  { %3110 = vrcp.f32 %v866_v26 }
 0x215   :  { %3112 = vrcp.f32 %v873_v56 }
 0x21d   :  { %v3109_v63 = vpop.eup %3108 }
 0x21e   :  { %v3111_v25 = vpop.eup %3110  ;;  %v877_v3 = vmul.f32 %v3109_v63, %v3107_v0  ;;  %v2840_v0 = vld [vmem:[%s6020_s0 + $0x8] sm:$0xff] }
 0x21f   :  { %v876_v62 = vmul.f32 %v3111_v25, %v133_v55  ;;  %v3113_v56 = vpop.eup %3112 }
 0x221   :  { %v917_v57 = vpop.f32.mrb[8].mxu0  ;;  %v958_v24 = vpop.f32.mrb[8].mxu1  ;;  %v4310_v34 = vadd.f32 %v877_v3, %v876_v62 }
 0x222   :  { %v919_v52 = vpop.f32.mrb[9].mxu0  ;;  %v960_v61 = vpop.f32.mrb[9].mxu1 }
 0x223   :  { %v969_v59 = vcombine.low %v917_v57, %v919_v52  ;;  %v970_v60 = vcombine.low %v958_v24, %v960_v61  ;;  %v921_v58 = vpop.f32.mrb[10].mxu0  ;;  %v962_v53 = vpop.f32.mrb[10].mxu1  ;;  %3114 = vtanh.f32 %v4310_v34 }
 0x224   :  { %v922_v26 = vpop.f32.mrb[11].mxu0  ;;  %v963_v23 = vpop.f32.mrb[11].mxu1 }
 0x225   :  { %v977_v1 = vrot.slane %v969_v59, %v4183_v2  ;;  %v984_v27 = vrot.slane %v970_v60, %v4183_v2 }
 0x227   :  { %v985_v55 = vcombine.low %v977_v1, %v984_v27 }
 0x229   :  { %v987_v63 = vadd.f32 %v2840_v0, %v985_v55 }
 0x22b   :  { %v2841_v25 = vmul.f32 -1.442695, %v987_v63  ;;  %v995_v3 = vrot.slane %v987_v63, 2  ;;  %v1006_v23 = vrot.slane %v987_v63, 6  ;;  %v1003_v60 = vrot.slane %v987_v63, 4 }
 0x22d   :  { %v3115_v62 = vpop.eup %3114  ;;  %3116 = vpow2.f32 %v2841_v25  ;;  %v2842_v57 = vmul.f32 -1.442695, %v995_v3  ;;  %v2843_v61 = vmul.f32 -1.442695, %v1006_v23  ;;  %v4325_v23 = vld [vmem:[%s6021_s1] ss:$16 sps:$4 sm:$0xff]  }
 0x22e   :  { %v880_v24 = vmul.f32 %v3115_v62, %v3113_v56 }
 0x22f   :  { %3118 = vpow2.f32 %v2842_v57 }
 0x230   :  { %v1020_v52 = vpack.c.bf16 %v880_v24, %v880_v24  ;;  %3120 = vpow2.f32 %v2843_v61  ;;  %v4337_v61 = vld [vmem:[%s6021_s1 + $0x24] ss:$16 sps:$4 sm:$0xff]  }
 0x232   :  { %1053 = vmatprep.mubr.bf16.mxu0 %v1020_v52  ;;  %1094 = vmatprep.mubr.bf16.mxu1 %v1020_v52 }
 0x237   :  { %v3117_v59 = vpop.eup %3116 }
 0x238   :  { %v991_v58 = vadd.f32 1.0, %v3117_v59  ;;  %v4343_v59 = vld [vmem:[%s6021_s1 + $0x2c] ss:$16 sps:$4 sm:$0xff]  }
 0x239   :  { %v3119_v53 = vpop.eup %3118 }
 0x23a   :  { %3122 = vrcp.f32 %v991_v58  ;;  %v1000_v1 = vadd.f32 1.0, %v3119_v53  ;;  %v3121_v26 = vpop.eup %3120  ;;  %v4357_v58 = vld [vmem:[%s6021_s1 + $0x28] ss:$16 sps:$4 sm:$0xff]   ;;  %v4363_v53 = vld [vmem:[%s6021_s1 + $0x44] ss:$16 sps:$4 sm:$0xff]  }
 0x23b   :  { %3124 = vtanh.f32 %v1003_v60  ;;  %v1011_v25 = vadd.f32 1.0, %v3121_v26  ;;  %v4351_v60 = vld [vmem:[%s6021_s1 + $0x20] ss:$16 sps:$4 sm:$0xff]  }
 0x23c   :  { %3126 = vrcp.f32 %v1000_v1  ;;  %v4369_v1 = vld [vmem:[%s6021_s1 + $0x4c] ss:$16 sps:$4 sm:$0xff]   ;;  %v4375_v26 = vld [vmem:[%s6021_s1 + $0x40] ss:$16 sps:$4 sm:$0xff]  }
 0x23d   :  { %3128 = vrcp.f32 %v1011_v25  ;;  %v4399_v25 = vld [vmem:[%s6021_s1 + $0x60] ss:$16 sps:$4 sm:$0xff]  }
 0x244   :  { %v3123_v27 = vpop.eup %3122 }
 0x245   :  { %v3125_v0 = vpop.eup %3124 }
 0x246   :  { %v3127_v55 = vpop.eup %3126  ;;  %v1015_v56 = vmul.f32 %v3125_v0, %v3123_v27  ;;  %v4381_v27 = vld [vmem:[%s6021_s1 + $0x48] ss:$16 sps:$4 sm:$0xff]   ;;  %v4387_v0 = vld [vmem:[%s6021_s1 + $0x64] ss:$16 sps:$4 sm:$0xff]  }
 0x247   :  { %v1014_v3 = vmul.f32 %v3127_v55, %v4190_v51  ;;  %v3129_v63 = vpop.eup %3128  ;;  %v4331_v51 = vld [vmem:[%s6021_s1 + $0x8] ss:$16 sps:$4 sm:$0xff]   ;;  %v4393_v55 = vld [vmem:[%s6021_s1 + $0x6c] ss:$16 sps:$4 sm:$0xff]  }
 0x249   :  { %v4319_v62 = vadd.f32 %v1015_v56, %v1014_v3  ;;  %v4405_v3 = vld [vmem:[%s6021_s1 + $0x68] ss:$16 sps:$4 sm:$0xff]   ;;  %v4411_v56 = vld [vmem:[%s6021_s1 + $0x84] ss:$16 sps:$4 sm:$0xff]  }
 0x24a   :  { %6442 = vst [vmem:[#allocation14_spill] sm:$0xff] %v4411_v56 }
 0x24b   :  { %3130 = vtanh.f32 %v4319_v62 }
 0x255   :  { %v3131_v57 = vpop.eup %3130 }
 0x256   :  { %v1018_v24 = vmul.f32 %v3131_v57, %v3129_v63  ;;  %v4417_v63 = vld [vmem:[%s6021_s1 + $0x8c] ss:$16 sps:$4 sm:$0xff]   ;;  %v4423_v57 = vld [vmem:[%s6021_s1 + $0x80] ss:$16 sps:$4 sm:$0xff]  }
 0x257   :  { %6443 = vst [vmem:[#allocation15_spill] sm:$0xff] %v4417_v63  ;;  %6444 = vst [vmem:[#allocation16_spill] sm:$0xff] %v4423_v57 }
 0x258   :  { %v1019_v52 = vpack.c.bf16 %v1018_v24, %v1018_v24  ;;  %v4429_v24 = vld [vmem:[%s6021_s1 + $0x88] ss:$16 sps:$4 sm:$0xff]  }
 0x259   :  { %6445 = vst [vmem:[#allocation17_spill] sm:$0xff] %v4429_v24 }
 0x25a   :  { %1054 = vmatmul.mubr.bf16.vlgmr.msra.gmra.mrb[12].mxu0 %v1019_v52  ;;  %1095 = vmatmul.mubr.bf16.vlgmr.msra.gmra.mrb[12].mxu1 %v1019_v52 }
 0x25b   :  { %1130 = vmatpush1.bf16.msra.mxu0 %v4325_v23  ;;  %1171 = vmatpush1.bf16.msra.mxu1 %v4331_v51 }
 0x25c   :  { %1131 = vmatprep.subr.bf16.mxu0 %v4337_v61  ;;  %1172 = vmatprep.subr.bf16.mxu1 %v4343_v59 }
 0x25d   :  { %1161 = vmatprep.mubr.bf16.mxu0 %v6386_v54  ;;  %1202 = vmatprep.mubr.bf16.mxu1 %v6386_v54 }
 0x25f   :  { %1132 = vmatpush1.bf16.msra.mxu0 %v4351_v60  ;;  %1173 = vmatpush1.bf16.msra.mxu1 %v4357_v58 }
 0x260   :  { %1133 = vmatprep.subr.bf16.mxu0 %v4363_v53  ;;  %1174 = vmatprep.subr.bf16.mxu1 %v4369_v1 }
 0x263   :  { %1134 = vmatpush1.bf16.msra.mxu0 %v4375_v26  ;;  %1175 = vmatpush1.bf16.msra.mxu1 %v4381_v27 }
 0x264   :  { %1135 = vmatprep.subr.bf16.mxu0 %v4387_v0  ;;  %1176 = vmatprep.subr.bf16.mxu1 %v4393_v55 }
 0x267   :  { %1136 = vmatpush1.bf16.msra.mxu0 %v4399_v25  ;;  %1177 = vmatpush1.bf16.msra.mxu1 %v4405_v3 }
 0x268   :  { %1137 = vmatprep.subr.bf16.mxu0 %v4411_v56  ;;  %1178 = vmatprep.subr.bf16.mxu1 %v4417_v63  ;;  %v4435_v56 = vld [vmem:[%s6021_s1 + $0xa4] ss:$16 sps:$4 sm:$0xff]   ;;  %v4441_v63 = vld [vmem:[%s6021_s1 + $0xac] ss:$16 sps:$4 sm:$0xff]  }
 0x269   :  { %6446 = vst [vmem:[#allocation18_spill] sm:$0xff] %v4435_v56  ;;  %6447 = vst [vmem:[#allocation19_spill] sm:$0xff] %v4441_v63 }
 0x26b   :  { %1138 = vmatpush1.bf16.msra.mxu0 %v4423_v57  ;;  %1179 = vmatpush1.bf16.msra.mxu1 %v4429_v24  ;;  %v4447_v57 = vld [vmem:[%s6021_s1 + $0xa0] ss:$16 sps:$4 sm:$0xff]   ;;  %v4453_v24 = vld [vmem:[%s6021_s1 + $0xa8] ss:$16 sps:$4 sm:$0xff]  }
 0x26c   :  { %1139 = vmatprep.subr.bf16.mxu0 %v4435_v56  ;;  %1180 = vmatprep.subr.bf16.mxu1 %v4441_v63  ;;  %v4459_v56 = vld [vmem:[%s6021_s1 + $0xc4] ss:$16 sps:$4 sm:$0xff]   ;;  %v4465_v63 = vld [vmem:[%s6021_s1 + $0xcc] ss:$16 sps:$4 sm:$0xff]  }
 0x26f   :  { %1140 = vmatpush1.bf16.msra.mxu0 %v4447_v57  ;;  %1181 = vmatpush1.bf16.msra.mxu1 %v4453_v24 }
 0x270   :  { %1141 = vmatprep.subr.bf16.mxu0 %v4459_v56  ;;  %1182 = vmatprep.subr.bf16.mxu1 %v4465_v63 }
 0x273   :  { %1142 = vmatpush1.bf16.msra.mxu0 %v3757_v28  ;;  %1183 = vmatpush1.bf16.msra.mxu1 %v3762_v29  ;;  %v6448_v28 = vld [vmem:[#allocation30_spill] sm:$0xff]  ;;  %v6449_v29 = vld [vmem:[#allocation31_spill] sm:$0xff] }
 0x274   :  { %1143 = vmatprep.subr.bf16.mxu0 %v3769_v30  ;;  %1184 = vmatprep.subr.bf16.mxu1 %v3776_v31  ;;  %v6450_v30 = vld [vmem:[#allocation32_spill] sm:$0xff]  ;;  %v6451_v31 = vld [vmem:[#allocation33_spill] sm:$0xff] }
 0x277   :  { %1144 = vmatpush1.bf16.msra.mxu0 %v3781_v32  ;;  %1185 = vmatpush1.bf16.msra.mxu1 %v3786_v33  ;;  %v6452_v32 = vld [vmem:[#allocation34_spill] sm:$0xff]  ;;  %v6453_v33 = vld [vmem:[#allocation35_spill] sm:$0xff] }
 0x278   :  { %1267 = vmatprep.subr.bf16.mxu0 %v3791_v35  ;;  %1308 = vmatprep.subr.bf16.mxu1 %v3796_v36  ;;  %v6454_v35 = vld [vmem:[#allocation36_spill] sm:$0xff]  ;;  %v6455_v36 = vld [vmem:[#allocation37_spill] sm:$0xff] }
 0x27a   :  { %1162 = vmatmul.mubr.bf16.vlgmr.msra.gmra.mrb[16].mxu0 %v1019_v52  ;;  %1203 = vmatmul.mubr.bf16.vlgmr.msra.gmra.mrb[16].mxu1 %v1019_v52 }
 0x27b   :  { %1268 = vmatpush1.bf16.msra.mxu0 %v3805_v37  ;;  %1309 = vmatpush1.bf16.msra.mxu1 %v3810_v38  ;;  %v6456_v37 = vld [vmem:[#allocation38_spill] sm:$0xff]  ;;  %v6457_v38 = vld [vmem:[#allocation39_spill] sm:$0xff] }
 0x27c   :  { %1269 = vmatprep.subr.bf16.mxu0 %v3815_v40  ;;  %1310 = vmatprep.subr.bf16.mxu1 %v3820_v41  ;;  %v6458_v40 = vld [vmem:[#allocation40_spill] sm:$0xff]  ;;  %v6459_v41 = vld [vmem:[#allocation41_spill] sm:$0xff] }
 0x27f   :  { %1270 = vmatpush1.bf16.msra.mxu0 %v3829_v42  ;;  %1311 = vmatpush1.bf16.msra.mxu1 %v3834_v43  ;;  %v6460_v42 = vld [vmem:[#allocation42_spill] sm:$0xff]  ;;  %v6461_v43 = vld [vmem:[#allocation43_spill] sm:$0xff] }
 0x280   :  { %1271 = vmatprep.subr.bf16.mxu0 %v3845_v44  ;;  %1312 = vmatprep.subr.bf16.mxu1 %v3850_v45  ;;  %v6462_v44 = vld [vmem:[#allocation44_spill] sm:$0xff]  ;;  %v6463_v45 = vld [vmem:[#allocation45_spill] sm:$0xff] }
 0x283   :  { %1272 = vmatpush1.bf16.msra.mxu0 %v3857_v46  ;;  %1313 = vmatpush1.bf16.msra.mxu1 %v3862_v47  ;;  %v6464_v46 = vld [vmem:[#allocation46_spill] sm:$0xff]  ;;  %v6465_v47 = vld [vmem:[#allocation47_spill] sm:$0xff] }
 0x284   :  { %1273 = vmatprep.subr.bf16.mxu0 %v3869_v48  ;;  %1314 = vmatprep.subr.bf16.mxu1 %v3874_v49  ;;  %v6466_v48 = vld [vmem:[#allocation48_spill] sm:$0xff]  ;;  %v6467_v49 = vld [vmem:[#allocation49_spill] sm:$0xff] }
 0x287   :  { %1274 = vmatpush1.bf16.msra.mxu0 %v3879_v50  ;;  %1315 = vmatpush1.bf16.msra.mxu1 %v6387_v4  ;;  %v6468_v50 = vld [vmem:[#allocation50_spill] sm:$0xff]  ;;  %v6469_v4 = vld [vmem:[#allocation51_spill] sm:$0xff] }
 0x288   :  { %1275 = vmatprep.subr.bf16.mxu0 %v6388_v5  ;;  %1316 = vmatprep.subr.bf16.mxu1 %v6389_v6  ;;  %v6470_v5 = vld [vmem:[#allocation52_spill] sm:$0xff]  ;;  %v6471_v6 = vld [vmem:[#allocation53_spill] sm:$0xff] }
 0x28b   :  { %1276 = vmatpush1.bf16.msra.mxu0 %v6390_v7  ;;  %1317 = vmatpush1.bf16.msra.mxu1 %v6391_v8  ;;  %v6472_v7 = vld [vmem:[#allocation54_spill] sm:$0xff]  ;;  %v6473_v8 = vld [vmem:[#allocation55_spill] sm:$0xff] }
 0x28c   :  { %1277 = vmatprep.subr.bf16.mxu0 %v6392_v9  ;;  %1318 = vmatprep.subr.bf16.mxu1 %v6393_v10  ;;  %v6474_v9 = vld [vmem:[#allocation56_spill] sm:$0xff]  ;;  %v6475_v10 = vld [vmem:[#allocation57_spill] sm:$0xff] }
 0x28f   :  { %1278 = vmatpush1.bf16.msra.mxu0 %v6394_v11  ;;  %1319 = vmatpush1.bf16.msra.mxu1 %v6395_v12  ;;  %v6476_v11 = vld [vmem:[#allocation58_spill] sm:$0xff]  ;;  %v6477_v12 = vld [vmem:[#allocation59_spill] sm:$0xff] }
 0x290   :  { %1279 = vmatprep.subr.bf16.mxu0 %v6396_v13  ;;  %1320 = vmatprep.subr.bf16.mxu1 %v6397_v14  ;;  %v4541_v13 = vld [vmem:[%s6021_s1 + $0x4] ss:$16 sps:$4 sm:$0xff]   ;;  %v4547_v14 = vld [vmem:[%s6021_s1 + $0xc] ss:$16 sps:$4 sm:$0xff]  }
 0x291   :  { %6478 = vst [vmem:[#allocation20_spill] sm:$0xff] %v4541_v13  ;;  %6479 = vst [vmem:[#allocation21_spill] sm:$0xff] %v4547_v14 }
 0x293   :  { %1280 = vmatpush1.bf16.msra.mxu0 %v6398_v15  ;;  %1321 = vmatpush1.bf16.msra.mxu1 %v6399_v16 }
 0x294   :  { %1281 = vmatprep.subr.bf16.mxu0 %v6400_v17  ;;  %1322 = vmatprep.subr.bf16.mxu1 %v6401_v18  ;;  %v6480_v17 = vld [vmem:[#allocation11_spill] sm:$0xff] }
 0x297   :  { %1282 = vmatpush1.bf16.msra.mxu0 %v6402_v19  ;;  %1323 = vmatpush1.bf16.msra.mxu1 %v6403_v20 }
 0x298   :  { %1283 = vmatprep.subr.bf16.mxu0 %v6404_v21  ;;  %1324 = vmatprep.subr.bf16.mxu1 %v6405_v22 }
 0x29b   :  { %1284 = vmatpush1.bf16.msra.mxu0 %v6448_v28  ;;  %1325 = vmatpush1.bf16.msra.mxu1 %v6449_v29 }
 0x29c   :  { %1285 = vmatprep.subr.bf16.mxu0 %v6450_v30  ;;  %1326 = vmatprep.subr.bf16.mxu1 %v6451_v31 }
 0x29f   :  { %1286 = vmatpush1.bf16.msra.mxu0 %v6452_v32  ;;  %1327 = vmatpush1.bf16.msra.mxu1 %v6453_v33  ;;  %v6481_v32 = vld [vmem:[#allocation12_spill] sm:$0xff] }
 0x2a0   :  { %1287 = vmatprep.subr.bf16.mxu0 %v6454_v35  ;;  %1328 = vmatprep.subr.bf16.mxu1 %v6455_v36  ;;  %v6482_v36 = vld [vmem:[#allocation13_spill] sm:$0xff] }
 0x2a3   :  { %1288 = vmatpush1.bf16.msra.mxu0 %v6456_v37  ;;  %1329 = vmatpush1.bf16.msra.mxu1 %v6457_v38 }
 0x2a4   :  { %1289 = vmatprep.subr.bf16.mxu0 %v6458_v40  ;;  %1330 = vmatprep.subr.bf16.mxu1 %v6459_v41 }
 0x2a7   :  { %1290 = vmatpush1.bf16.msra.mxu0 %v6460_v42  ;;  %1331 = vmatpush1.bf16.msra.mxu1 %v6461_v43 }
 0x2a8   :  { %1291 = vmatprep.subr.bf16.mxu0 %v6462_v44  ;;  %1332 = vmatprep.subr.bf16.mxu1 %v6463_v45 }
 0x2ab   :  { %1292 = vmatpush1.bf16.msra.mxu0 %v6464_v46  ;;  %1333 = vmatpush1.bf16.msra.mxu1 %v6465_v47 }
 0x2ac   :  { %1293 = vmatprep.subr.bf16.mxu0 %v6466_v48  ;;  %1334 = vmatprep.subr.bf16.mxu1 %v6467_v49 }
 0x2af   :  { %1294 = vmatpush1.bf16.msra.mxu0 %v6468_v50  ;;  %1335 = vmatpush1.bf16.msra.mxu1 %v6469_v4 }
 0x2b0   :  { %1295 = vmatprep.subr.bf16.mxu0 %v6470_v5  ;;  %1336 = vmatprep.subr.bf16.mxu1 %v6471_v6 }
 0x2b3   :  { %1296 = vmatpush1.bf16.msra.mxu0 %v6472_v7  ;;  %1337 = vmatpush1.bf16.msra.mxu1 %v6473_v8 }
 0x2b4   :  { %1297 = vmatprep.subr.bf16.mxu0 %v6474_v9  ;;  %1338 = vmatprep.subr.bf16.mxu1 %v6475_v10 }
 0x2b7   :  { %1298 = vmatpush1.bf16.msra.mxu0 %v6476_v11  ;;  %1339 = vmatpush1.bf16.msra.mxu1 %v6477_v12 }
 0x2b8   :  { %1375 = vmatprep.subr.bf16.mxu0 %v4541_v13  ;;  %1416 = vmatprep.subr.bf16.mxu1 %v4547_v14 }
 0x32d   :  { %v1055_v15 = vpop.f32.mrb[12].mxu0  ;;  %v1096_v16 = vpop.f32.mrb[12].mxu1 }
 0x32e   :  { %v1056_v18 = vadd.f32 %v1055_v15, %v6480_v17  ;;  %v1057_v19 = vpop.f32.mrb[13].mxu0  ;;  %v1098_v20 = vpop.f32.mrb[13].mxu1  ;;  %v1097_v37 = vadd.f32 %v1096_v16, %v6482_v36 }
 0x32f   :  { %v1058_v21 = vadd.f32 %v1057_v19, %v4298_v39  ;;  %v1059_v22 = vpop.f32.mrb[14].mxu0  ;;  %v1100_v52 = vpop.f32.mrb[14].mxu1  ;;  %v1099_v33 = vadd.f32 %v1098_v20, %v6481_v32 }
 0x330   :  { %v2844_v28 = vmul.f32 -1.442695, %v1056_v18  ;;  %v1060_v29 = vpop.f32.mrb[15].mxu0  ;;  %v1101_v30 = vpop.f32.mrb[15].mxu1 }
 0x331   :  { %v2845_v31 = vmul.f32 -1.442695, %v1058_v21  ;;  %v2846_v35 = vmul.f32 -1.442695, %v1099_v33 }
 0x332   :  { %3132 = vpow2.f32 %v2844_v28 }
 0x333   :  { %3134 = vpow2.f32 %v2845_v31 }
 0x334   :  { %3136 = vpow2.f32 %v2846_v35 }
 0x335   :  { %3138 = vtanh.f32 %v1097_v37 }
 0x33c   :  { %v3133_v38 = vpop.eup %3132 }
 0x33d   :  { %v3135_v40 = vpop.eup %3134  ;;  %v1106_v41 = vadd.f32 1.0, %v3133_v38 }
 0x33e   :  { %v1112_v42 = vadd.f32 1.0, %v3135_v40  ;;  %v3137_v43 = vpop.eup %3136 }
 0x33f   :  { %3140 = vrcp.f32 %v1106_v41  ;;  %v3139_v44 = vpop.eup %3138  ;;  %v1119_v48 = vadd.f32 1.0, %v3137_v43 }
 0x340   :  { %3142 = vrcp.f32 %v1112_v42 }
 0x341   :  { %3144 = vrcp.f32 %v1119_v48 }
 0x349   :  { %v3141_v45 = vpop.eup %3140 }
 0x34a   :  { %v3143_v46 = vpop.eup %3142  ;;  %v1123_v47 = vmul.f32 %v3141_v45, %v3139_v44 }
 0x34b   :  { %v1122_v49 = vmul.f32 %v3143_v46, %v4310_v34  ;;  %v2847_v34 = vld [vmem:[%s6020_s0 + $0x10] sm:$0xff]  ;;  %v3145_v52 = vpop.eup %3144 }
 0x34d   :  { %v1163_v50 = vpop.f32.mrb[16].mxu0  ;;  %v1204_v4 = vpop.f32.mrb[16].mxu1  ;;  %v4555_v5 = vadd.f32 %v1123_v47, %v1122_v49 }
 0x34e   :  { %v1165_v6 = vpop.f32.mrb[17].mxu0  ;;  %v1206_v7 = vpop.f32.mrb[17].mxu1 }
 0x34f   :  { %v1215_v8 = vcombine.low %v1163_v50, %v1165_v6  ;;  %v1216_v9 = vcombine.low %v1204_v4, %v1206_v7  ;;  %v1167_v10 = vpop.f32.mrb[18].mxu0  ;;  %v1208_v11 = vpop.f32.mrb[18].mxu1  ;;  %3146 = vtanh.f32 %v4555_v5 }
 0x350   :  { %v1168_v12 = vpop.f32.mrb[19].mxu0  ;;  %v1209_v15 = vpop.f32.mrb[19].mxu1  ;;  %v6485_v10 = vld [vmem:[#allocation16_spill] sm:$0xff]  ;;  %v6486_v11 = vld [vmem:[#allocation17_spill] sm:$0xff] }
 0x351   :  { %v1223_v16 = vrot.slane %v1215_v8, %v4183_v2  ;;  %v1230_v18 = vrot.slane %v1216_v9, %v4183_v2  ;;  %v6484_v9 = vld [vmem:[#allocation15_spill] sm:$0xff]  ;;  %v6487_v12 = vld [vmem:[#allocation18_spill] sm:$0xff] }
 0x352   :  { %v6488_v15 = vld [vmem:[#allocation19_spill] sm:$0xff] }
 0x353   :  { %v1231_v19 = vcombine.low %v1223_v16, %v1230_v18  ;;  %v4596_v16 = vld [vmem:[%s6021_s1 + $0xc0] ss:$16 sps:$4 sm:$0xff]   ;;  %v4602_v18 = vld [vmem:[%s6021_s1 + $0xc8] ss:$16 sps:$4 sm:$0xff]  }
 0x355   :  { %v1233_v20 = vadd.f32 %v2847_v34, %v1231_v19  ;;  %v4608_v34 = vld [vmem:[%s6021_s1 + $0xe4] ss:$16 sps:$4 sm:$0xff]   ;;  %v4614_v19 = vld [vmem:[%s6021_s1 + $0xec] ss:$16 sps:$4 sm:$0xff]  }
 0x357   :  { %v2848_v21 = vmul.f32 -1.442695, %v1233_v20  ;;  %v1241_v22 = vrot.slane %v1233_v20, 2  ;;  %v1252_v33 = vrot.slane %v1233_v20, 6  ;;  %v1249_v38 = vrot.slane %v1233_v20, 4 }
 0x358   :  { %v4620_v20 = vld [vmem:[%s6021_s1 + $0xe0] ss:$16 sps:$4 sm:$0xff]  }
 0x359   :  { %v3147_v28 = vpop.eup %3146  ;;  %3148 = vpow2.f32 %v2848_v21  ;;  %v2849_v29 = vmul.f32 -1.442695, %v1241_v22  ;;  %v2850_v35 = vmul.f32 -1.442695, %v1252_v33  ;;  %v4626_v21 = vld [vmem:[%s6021_s1 + $0xe8] ss:$16 sps:$4 sm:$0xff]  }
 0x35a   :  { %v1126_v30 = vmul.f32 %v3147_v28, %v3145_v52  ;;  %v4632_v22 = vld [vmem:[%s6022_s2 + $0x4] ss:$16 sps:$4 sm:$0xff]   ;;  %v4638_v52 = vld [vmem:[%s6022_s2 + $0xc] ss:$16 sps:$4 sm:$0xff]   ;;  %v4644_v28 = vld [vmem:[%s6022_s2] ss:$16 sps:$4 sm:$0xff]  }
 0x35b   :  { %3150 = vpow2.f32 %v2849_v29  ;;  %v4650_v29 = vld [vmem:[%s6022_s2 + $0x8] ss:$16 sps:$4 sm:$0xff]   ;;  %v4668_v33 = vld [vmem:[%s6022_s2 + $0x20] ss:$16 sps:$4 sm:$0xff]  }
 0x35c   :  { %v1266_v31 = vpack.c.bf16 %v1126_v30, %v1126_v30  ;;  %3152 = vpow2.f32 %v2850_v35  ;;  %v4656_v30 = vld [vmem:[%s6022_s2 + $0x24] ss:$16 sps:$4 sm:$0xff]   ;;  %v4674_v35 = vld [vmem:[%s6022_s2 + $0x28] ss:$16 sps:$4 sm:$0xff]  }
 0x35e   :  { %1299 = vmatprep.mubr.bf16.mxu0 %v1266_v31  ;;  %1340 = vmatprep.mubr.bf16.mxu1 %v1266_v31  ;;  %v4662_v31 = vld [vmem:[%s6022_s2 + $0x2c] ss:$16 sps:$4 sm:$0xff]  }
 0x363   :  { %v3149_v37 = vpop.eup %3148 }
 0x364   :  { %v1237_v40 = vadd.f32 1.0, %v3149_v37  ;;  %v4680_v37 = vld [vmem:[%s6022_s2 + $0x44] ss:$16 sps:$4 sm:$0xff]  }
 0x365   :  { %v3151_v41 = vpop.eup %3150 }
 0x366   :  { %3154 = vrcp.f32 %v1237_v40  ;;  %v1246_v42 = vadd.f32 1.0, %v3151_v41  ;;  %v3153_v43 = vpop.eup %3152  ;;  %v4692_v40 = vld [vmem:[%s6022_s2 + $0x40] ss:$16 sps:$4 sm:$0xff]   ;;  %v4698_v41 = vld [vmem:[%s6022_s2 + $0x48] ss:$16 sps:$4 sm:$0xff]  }
 0x367   :  { %3156 = vtanh.f32 %v1249_v38  ;;  %v1257_v47 = vadd.f32 1.0, %v3153_v43  ;;  %v4686_v38 = vld [vmem:[%s6022_s2 + $0x4c] ss:$16 sps:$4 sm:$0xff]   ;;  %6490 = vst [vmem:[#allocation23_spill] sm:$0xff] %v4692_v40  ;;  %6491 = vst [vmem:[#allocation24_spill] sm:$0xff] %v4698_v41 }
 0x368   :  { %3158 = vrcp.f32 %v1246_v42  ;;  %6489 = vst [vmem:[#allocation22_spill] sm:$0xff] %v4686_v38  ;;  %v4704_v42 = vld [vmem:[%s6022_s2 + $0x64] ss:$16 sps:$4 sm:$0xff]   ;;  %v4710_v43 = vld [vmem:[%s6022_s2 + $0x6c] ss:$16 sps:$4 sm:$0xff]  }
 0x369   :  { %3160 = vrcp.f32 %v1257_v47  ;;  %6492 = vst [vmem:[#allocation25_spill] sm:$0xff] %v4704_v42  ;;  %6493 = vst [vmem:[#allocation26_spill] sm:$0xff] %v4710_v43  ;;  %v4734_v47 = vld [vmem:[%s6022_s2 + $0x8c] ss:$16 sps:$4 sm:$0xff]  }
 0x36a   :  { %6497 = vst [vmem:[#allocation9_spill] sm:$0xff] %v4734_v47 }
 0x370   :  { %v3155_v44 = vpop.eup %3154 }
 0x371   :  { %v3157_v45 = vpop.eup %3156 }
 0x372   :  { %v3159_v46 = vpop.eup %3158  ;;  %v1261_v49 = vmul.f32 %v3157_v45, %v3155_v44  ;;  %v4716_v44 = vld [vmem:[%s6022_s2 + $0x60] ss:$16 sps:$4 sm:$0xff]   ;;  %v4722_v45 = vld [vmem:[%s6022_s2 + $0x68] ss:$16 sps:$4 sm:$0xff]  }
 0x373   :  { %v1260_v48 = vmul.f32 %v3159_v46, %v4319_v62  ;;  %v3161_v4 = vpop.eup %3160  ;;  %v6483_v62 = vld [vmem:[#allocation14_spill] sm:$0xff]  ;;  %6494 = vst [vmem:[#allocation27_spill] sm:$0xff] %v4716_v44  ;;  %6495 = vst [vmem:[#allocation28_spill] sm:$0xff] %v4722_v45 }
 0x374   :  { %v4728_v46 = vld [vmem:[%s6022_s2 + $0x84] ss:$16 sps:$4 sm:$0xff]  }
 0x375   :  { %v4564_v50 = vadd.f32 %v1261_v49, %v1260_v48  ;;  %6496 = vst [vmem:[#allocation29_spill] sm:$0xff] %v4728_v46  ;;  %v4740_v48 = vld [vmem:[%s6022_s2 + $0x80] ss:$16 sps:$4 sm:$0xff]   ;;  %v4746_v49 = vld [vmem:[%s6022_s2 + $0x88] ss:$16 sps:$4 sm:$0xff]  }
 0x376   :  { %6498 = vst [vmem:[#allocation10_spill] sm:$0xff] %v4740_v48  ;;  %6499 = vst [vmem:[#allocation60_spill] sm:$0xff] %v4746_v49 }
 0x377   :  { %3162 = vtanh.f32 %v4564_v50 }
 0x381   :  { %v3163_v6 = vpop.eup %3162 }
 0x382   :  { %v1264_v7 = vmul.f32 %v3163_v6, %v3161_v4  ;;  %v4752_v4 = vld [vmem:[%s6022_s2 + $0xa4] ss:$16 sps:$4 sm:$0xff]   ;;  %v4758_v6 = vld [vmem:[%s6022_s2 + $0xac] ss:$16 sps:$4 sm:$0xff]  }
 0x383   :  { %6500 = vst [vmem:[#allocation30_spill] sm:$0xff] %v4752_v4  ;;  %6501 = vst [vmem:[#allocation31_spill] sm:$0xff] %v4758_v6 }
 0x384   :  { %v1265_v8 = vpack.c.bf16 %v1264_v7, %v1264_v7  ;;  %v4764_v7 = vld [vmem:[%s6022_s2 + $0xa0] ss:$16 sps:$4 sm:$0xff]  }
 0x385   :  { %6502 = vst [vmem:[#allocation32_spill] sm:$0xff] %v4764_v7 }
 0x386   :  { %1300 = vmatmul.mubr.bf16.vlgmr.msra.gmra.mrb[20].mxu0 %v1265_v8  ;;  %1341 = vmatmul.mubr.bf16.vlgmr.msra.gmra.mrb[20].mxu1 %v1265_v8 }
 0x387   :  { %1376 = vmatpush1.bf16.msra.mxu0 %v4325_v23  ;;  %1417 = vmatpush1.bf16.msra.mxu1 %v4331_v51 }
 0x388   :  { %1377 = vmatprep.subr.bf16.mxu0 %v4337_v61  ;;  %1418 = vmatprep.subr.bf16.mxu1 %v4343_v59 }
 0x389   :  { %1407 = vmatprep.mubr.bf16.mxu0 %v6386_v54  ;;  %1448 = vmatprep.mubr.bf16.mxu1 %v6386_v54 }
 0x38b   :  { %1378 = vmatpush1.bf16.msra.mxu0 %v4351_v60  ;;  %1419 = vmatpush1.bf16.msra.mxu1 %v4357_v58 }
 0x38c   :  { %1379 = vmatprep.subr.bf16.mxu0 %v4363_v53  ;;  %1420 = vmatprep.subr.bf16.mxu1 %v4369_v1 }
 0x38f   :  { %1380 = vmatpush1.bf16.msra.mxu0 %v4375_v26  ;;  %1421 = vmatpush1.bf16.msra.mxu1 %v4381_v27 }
 0x390   :  { %1381 = vmatprep.subr.bf16.mxu0 %v4387_v0  ;;  %1422 = vmatprep.subr.bf16.mxu1 %v4393_v55 }
 0x393   :  { %1382 = vmatpush1.bf16.msra.mxu0 %v4399_v25  ;;  %1423 = vmatpush1.bf16.msra.mxu1 %v4405_v3 }
 0x394   :  { %1383 = vmatprep.subr.bf16.mxu0 %v6483_v62  ;;  %1424 = vmatprep.subr.bf16.mxu1 %v6484_v9 }
 0x397   :  { %1384 = vmatpush1.bf16.msra.mxu0 %v6485_v10  ;;  %1425 = vmatpush1.bf16.msra.mxu1 %v6486_v11 }
 0x398   :  { %1385 = vmatprep.subr.bf16.mxu0 %v6487_v12  ;;  %1426 = vmatprep.subr.bf16.mxu1 %v6488_v15 }
 0x39b   :  { %1386 = vmatpush1.bf16.msra.mxu0 %v4447_v57  ;;  %1427 = vmatpush1.bf16.msra.mxu1 %v4453_v24 }
 0x39c   :  { %1387 = vmatprep.subr.bf16.mxu0 %v4459_v56  ;;  %1428 = vmatprep.subr.bf16.mxu1 %v4465_v63 }
 0x39f   :  { %1388 = vmatpush1.bf16.msra.mxu0 %v4596_v16  ;;  %1429 = vmatpush1.bf16.msra.mxu1 %v4602_v18 }
 0x3a0   :  { %1389 = vmatprep.subr.bf16.mxu0 %v4608_v34  ;;  %1430 = vmatprep.subr.bf16.mxu1 %v4614_v19 }
 0x3a3   :  { %1390 = vmatpush1.bf16.msra.mxu0 %v4620_v20  ;;  %1431 = vmatpush1.bf16.msra.mxu1 %v4626_v21 }
 0x3a4   :  { %1513 = vmatprep.subr.bf16.mxu0 %v4632_v22  ;;  %1554 = vmatprep.subr.bf16.mxu1 %v4638_v52 }
 0x3a6   :  { %1408 = vmatmul.mubr.bf16.vlgmr.msra.gmra.mrb[24].mxu0 %v1265_v8  ;;  %1449 = vmatmul.mubr.bf16.vlgmr.msra.gmra.mrb[24].mxu1 %v1265_v8  ;;  %v4770_v8 = vld [vmem:[%s6022_s2 + $0xa8] ss:$16 sps:$4 sm:$0xff]  }
 0x3a7   :  { %1514 = vmatpush1.bf16.msra.mxu0 %v4644_v28  ;;  %1555 = vmatpush1.bf16.msra.mxu1 %v4650_v29  ;;  %6503 = vst [vmem:[#allocation33_spill] sm:$0xff] %v4770_v8 }
 0x3a8   :  { %1515 = vmatprep.subr.bf16.mxu0 %v4656_v30  ;;  %1556 = vmatprep.subr.bf16.mxu1 %v4662_v31 }
 0x3ab   :  { %1516 = vmatpush1.bf16.msra.mxu0 %v4668_v33  ;;  %1557 = vmatpush1.bf16.msra.mxu1 %v4674_v35 }
 0x3ac   :  { %1517 = vmatprep.subr.bf16.mxu0 %v4680_v37  ;;  %1558 = vmatprep.subr.bf16.mxu1 %v4686_v38 }
 0x3af   :  { %1518 = vmatpush1.bf16.msra.mxu0 %v4692_v40  ;;  %1559 = vmatpush1.bf16.msra.mxu1 %v4698_v41 }
 0x3b0   :  { %1519 = vmatprep.subr.bf16.mxu0 %v4704_v42  ;;  %1560 = vmatprep.subr.bf16.mxu1 %v4710_v43 }
 0x3b3   :  { %1520 = vmatpush1.bf16.msra.mxu0 %v4716_v44  ;;  %1561 = vmatpush1.bf16.msra.mxu1 %v4722_v45 }
 0x3b4   :  { %1521 = vmatprep.subr.bf16.mxu0 %v4728_v46  ;;  %1562 = vmatprep.subr.bf16.mxu1 %v4734_v47 }
 0x3b7   :  { %1522 = vmatpush1.bf16.msra.mxu0 %v4740_v48  ;;  %1563 = vmatpush1.bf16.msra.mxu1 %v4746_v49 }
 0x3b8   :  { %1523 = vmatprep.subr.bf16.mxu0 %v4752_v4  ;;  %1564 = vmatprep.subr.bf16.mxu1 %v4758_v6  ;;  %v4776_v4 = vld [vmem:[%s6022_s2 + $0xc4] ss:$16 sps:$4 sm:$0xff]   ;;  %v4782_v6 = vld [vmem:[%s6022_s2 + $0xcc] ss:$16 sps:$4 sm:$0xff]  }
 0x3b9   :  { %6504 = vst [vmem:[#allocation34_spill] sm:$0xff] %v4776_v4  ;;  %6505 = vst [vmem:[#allocation35_spill] sm:$0xff] %v4782_v6 }
 0x3bb   :  { %1524 = vmatpush1.bf16.msra.mxu0 %v4764_v7  ;;  %1565 = vmatpush1.bf16.msra.mxu1 %v4770_v8  ;;  %v4788_v7 = vld [vmem:[%s6022_s2 + $0xc0] ss:$16 sps:$4 sm:$0xff]   ;;  %v4794_v8 = vld [vmem:[%s6022_s2 + $0xc8] ss:$16 sps:$4 sm:$0xff]  }
 0x3bc   :  { %1525 = vmatprep.subr.bf16.mxu0 %v4776_v4  ;;  %1566 = vmatprep.subr.bf16.mxu1 %v4782_v6  ;;  %6506 = vst [vmem:[#allocation36_spill] sm:$0xff] %v4788_v7  ;;  %6507 = vst [vmem:[#allocation37_spill] sm:$0xff] %v4794_v8  ;;  %v4800_v4 = vld [vmem:[%s6022_s2 + $0xe4] ss:$16 sps:$4 sm:$0xff]   ;;  %v4806_v6 = vld [vmem:[%s6022_s2 + $0xec] ss:$16 sps:$4 sm:$0xff]  }
 0x3bd   :  { %6508 = vst [vmem:[#allocation38_spill] sm:$0xff] %v4800_v4  ;;  %6509 = vst [vmem:[#allocation39_spill] sm:$0xff] %v4806_v6 }
 0x3bf   :  { %1526 = vmatpush1.bf16.msra.mxu0 %v4788_v7  ;;  %1567 = vmatpush1.bf16.msra.mxu1 %v4794_v8  ;;  %v4812_v7 = vld [vmem:[%s6022_s2 + $0xe0] ss:$16 sps:$4 sm:$0xff]   ;;  %v4818_v8 = vld [vmem:[%s6022_s2 + $0xe8] ss:$16 sps:$4 sm:$0xff]  }
 0x3c0   :  { %1527 = vmatprep.subr.bf16.mxu0 %v4800_v4  ;;  %1568 = vmatprep.subr.bf16.mxu1 %v4806_v6  ;;  %6510 = vst [vmem:[#allocation40_spill] sm:$0xff] %v4812_v7  ;;  %6511 = vst [vmem:[#allocation41_spill] sm:$0xff] %v4818_v8  ;;  %v4824_v4 = vld [vmem:[%s6022_s2 + $0x104] ss:$16 sps:$4 sm:$0xff]   ;;  %v4830_v6 = vld [vmem:[%s6022_s2 + $0x10c] ss:$16 sps:$4 sm:$0xff]  }
 0x3c1   :  { %6512 = vst [vmem:[#allocation42_spill] sm:$0xff] %v4824_v4  ;;  %6513 = vst [vmem:[#allocation43_spill] sm:$0xff] %v4830_v6 }
 0x3c3   :  { %1528 = vmatpush1.bf16.msra.mxu0 %v4812_v7  ;;  %1569 = vmatpush1.bf16.msra.mxu1 %v4818_v8  ;;  %v4836_v7 = vld [vmem:[%s6022_s2 + $0x100] ss:$16 sps:$4 sm:$0xff]   ;;  %v4842_v8 = vld [vmem:[%s6022_s2 + $0x108] ss:$16 sps:$4 sm:$0xff]  }
 0x3c4   :  { %1529 = vmatprep.subr.bf16.mxu0 %v4824_v4  ;;  %1570 = vmatprep.subr.bf16.mxu1 %v4830_v6  ;;  %6514 = vst [vmem:[#allocation44_spill] sm:$0xff] %v4836_v7  ;;  %6515 = vst [vmem:[#allocation45_spill] sm:$0xff] %v4842_v8  ;;  %v4848_v4 = vld [vmem:[%s6022_s2 + $0x124] ss:$16 sps:$4 sm:$0xff]   ;;  %v4854_v6 = vld [vmem:[%s6022_s2 + $0x12c] ss:$16 sps:$4 sm:$0xff]  }
 0x3c5   :  { %6516 = vst [vmem:[#allocation46_spill] sm:$0xff] %v4848_v4  ;;  %6517 = vst [vmem:[#allocation47_spill] sm:$0xff] %v4854_v6 }
 0x3c7   :  { %1530 = vmatpush1.bf16.msra.mxu0 %v4836_v7  ;;  %1571 = vmatpush1.bf16.msra.mxu1 %v4842_v8  ;;  %v4860_v7 = vld [vmem:[%s6022_s2 + $0x120] ss:$16 sps:$4 sm:$0xff]   ;;  %v4866_v8 = vld [vmem:[%s6022_s2 + $0x128] ss:$16 sps:$4 sm:$0xff]  }
 0x3c8   :  { %1531 = vmatprep.subr.bf16.mxu0 %v4848_v4  ;;  %1572 = vmatprep.subr.bf16.mxu1 %v4854_v6  ;;  %6518 = vst [vmem:[#allocation48_spill] sm:$0xff] %v4860_v7  ;;  %6519 = vst [vmem:[#allocation49_spill] sm:$0xff] %v4866_v8  ;;  %v4872_v4 = vld [vmem:[%s6022_s2 + $0x144] ss:$16 sps:$4 sm:$0xff]   ;;  %v4878_v6 = vld [vmem:[%s6022_s2 + $0x14c] ss:$16 sps:$4 sm:$0xff]  }
 0x3c9   :  { %6520 = vst [vmem:[#allocation50_spill] sm:$0xff] %v4872_v4  ;;  %6521 = vst [vmem:[#allocation51_spill] sm:$0xff] %v4878_v6 }
 0x3cb   :  { %1532 = vmatpush1.bf16.msra.mxu0 %v4860_v7  ;;  %1573 = vmatpush1.bf16.msra.mxu1 %v4866_v8  ;;  %v4884_v7 = vld [vmem:[%s6022_s2 + $0x140] ss:$16 sps:$4 sm:$0xff]   ;;  %v4890_v8 = vld [vmem:[%s6022_s2 + $0x148] ss:$16 sps:$4 sm:$0xff]  }
 0x3cc   :  { %1533 = vmatprep.subr.bf16.mxu0 %v4872_v4  ;;  %1574 = vmatprep.subr.bf16.mxu1 %v4878_v6  ;;  %6522 = vst [vmem:[#allocation52_spill] sm:$0xff] %v4884_v7  ;;  %6523 = vst [vmem:[#allocation53_spill] sm:$0xff] %v4890_v8  ;;  %v4896_v4 = vld [vmem:[%s6022_s2 + $0x164] ss:$16 sps:$4 sm:$0xff]   ;;  %v4902_v6 = vld [vmem:[%s6022_s2 + $0x16c] ss:$16 sps:$4 sm:$0xff]  }
 0x3cd   :  { %6524 = vst [vmem:[#allocation54_spill] sm:$0xff] %v4896_v4  ;;  %6525 = vst [vmem:[#allocation55_spill] sm:$0xff] %v4902_v6 }
 0x3cf   :  { %1534 = vmatpush1.bf16.msra.mxu0 %v4884_v7  ;;  %1575 = vmatpush1.bf16.msra.mxu1 %v4890_v8  ;;  %v4908_v7 = vld [vmem:[%s6022_s2 + $0x160] ss:$16 sps:$4 sm:$0xff]   ;;  %v4914_v8 = vld [vmem:[%s6022_s2 + $0x168] ss:$16 sps:$4 sm:$0xff]  }
 0x3d0   :  { %1535 = vmatprep.subr.bf16.mxu0 %v4896_v4  ;;  %1576 = vmatprep.subr.bf16.mxu1 %v4902_v6  ;;  %6526 = vst [vmem:[#allocation56_spill] sm:$0xff] %v4908_v7  ;;  %6527 = vst [vmem:[#allocation57_spill] sm:$0xff] %v4914_v8  ;;  %v4920_v4 = vld [vmem:[%s6022_s2 + $0x184] ss:$16 sps:$4 sm:$0xff]   ;;  %v4926_v6 = vld [vmem:[%s6022_s2 + $0x18c] ss:$16 sps:$4 sm:$0xff]  }
 0x3d1   :  { %6528 = vst [vmem:[#allocation58_spill] sm:$0xff] %v4920_v4  ;;  %6529 = vst [vmem:[#allocation59_spill] sm:$0xff] %v4926_v6 }
 0x3d3   :  { %1536 = vmatpush1.bf16.msra.mxu0 %v4908_v7  ;;  %1577 = vmatpush1.bf16.msra.mxu1 %v4914_v8  ;;  %v4932_v7 = vld [vmem:[%s6022_s2 + $0x180] ss:$16 sps:$4 sm:$0xff]   ;;  %v4938_v8 = vld [vmem:[%s6022_s2 + $0x188] ss:$16 sps:$4 sm:$0xff]  }
 0x3d4   :  { %1537 = vmatprep.subr.bf16.mxu0 %v4920_v4  ;;  %1578 = vmatprep.subr.bf16.mxu1 %v4926_v6  ;;  %6530 = vst [vmem:[#allocation12_spill] sm:$0xff] %v4932_v7  ;;  %6531 = vst [vmem:[#allocation13_spill] sm:$0xff] %v4938_v8  ;;  %v4944_v4 = vld [vmem:[%s6022_s2 + $0x1a4] ss:$16 sps:$4 sm:$0xff]   ;;  %v4950_v6 = vld [vmem:[%s6022_s2 + $0x1ac] ss:$16 sps:$4 sm:$0xff]  }
 0x3d5   :  { %6532 = vst [vmem:[#allocation14_spill] sm:$0xff] %v4944_v4  ;;  %6533 = vst [vmem:[#allocation15_spill] sm:$0xff] %v4950_v6 }
 0x3d7   :  { %1538 = vmatpush1.bf16.msra.mxu0 %v4932_v7  ;;  %1579 = vmatpush1.bf16.msra.mxu1 %v4938_v8  ;;  %v4956_v7 = vld [vmem:[%s6022_s2 + $0x1a0] ss:$16 sps:$4 sm:$0xff]   ;;  %v4962_v8 = vld [vmem:[%s6022_s2 + $0x1a8] ss:$16 sps:$4 sm:$0xff]  }
 0x3d8   :  { %1539 = vmatprep.subr.bf16.mxu0 %v4944_v4  ;;  %1580 = vmatprep.subr.bf16.mxu1 %v4950_v6  ;;  %6534 = vst [vmem:[#allocation16_spill] sm:$0xff] %v4956_v7  ;;  %6535 = vst [vmem:[#allocation17_spill] sm:$0xff] %v4962_v8  ;;  %v4968_v4 = vld [vmem:[%s6022_s2 + $0x1c4] ss:$16 sps:$4 sm:$0xff]   ;;  %v4974_v6 = vld [vmem:[%s6022_s2 + $0x1cc] ss:$16 sps:$4 sm:$0xff]  }
 0x3d9   :  { %6536 = vst [vmem:[#allocation18_spill] sm:$0xff] %v4968_v4  ;;  %6537 = vst [vmem:[#allocation19_spill] sm:$0xff] %v4974_v6 }
 0x3db   :  { %1540 = vmatpush1.bf16.msra.mxu0 %v4956_v7  ;;  %1581 = vmatpush1.bf16.msra.mxu1 %v4962_v8  ;;  %v4980_v7 = vld [vmem:[%s6022_s2 + $0x1c0] ss:$16 sps:$4 sm:$0xff]   ;;  %v4986_v8 = vld [vmem:[%s6022_s2 + $0x1c8] ss:$16 sps:$4 sm:$0xff]  }
 0x3dc   :  { %1541 = vmatprep.subr.bf16.mxu0 %v4968_v4  ;;  %1582 = vmatprep.subr.bf16.mxu1 %v4974_v6  ;;  %6538 = vst [vmem:[#allocation61_spill] sm:$0xff] %v4980_v7  ;;  %6539 = vst [vmem:[#allocation62_spill] sm:$0xff] %v4986_v8  ;;  %v4992_v4 = vld [vmem:[%s6022_s2 + $0x1e4] ss:$16 sps:$4 sm:$0xff]   ;;  %v4998_v6 = vld [vmem:[%s6022_s2 + $0x1ec] ss:$16 sps:$4 sm:$0xff]  }
 0x3dd   :  { %6540 = vst [vmem:[#allocation63_spill] sm:$0xff] %v4992_v4  ;;  %6541 = vst [vmem:[#allocation64_spill] sm:$0xff] %v4998_v6 }
 0x3df   :  { %1542 = vmatpush1.bf16.msra.mxu0 %v4980_v7  ;;  %1583 = vmatpush1.bf16.msra.mxu1 %v4986_v8  ;;  %v5004_v7 = vld [vmem:[%s6022_s2 + $0x1e0] ss:$16 sps:$4 sm:$0xff]   ;;  %v5010_v8 = vld [vmem:[%s6022_s2 + $0x1e8] ss:$16 sps:$4 sm:$0xff]  }
 0x3e0   :  { %1543 = vmatprep.subr.bf16.mxu0 %v4992_v4  ;;  %1584 = vmatprep.subr.bf16.mxu1 %v4998_v6  ;;  %6542 = vst [vmem:[#allocation65_spill] sm:$0xff] %v5004_v7  ;;  %6543 = vst [vmem:[#allocation66_spill] sm:$0xff] %v5010_v8 }
 0x3e3   :  { %1544 = vmatpush1.bf16.msra.mxu0 %v5004_v7  ;;  %1585 = vmatpush1.bf16.msra.mxu1 %v5010_v8 }
 0x3e4   :  { %1621 = vmatprep.subr.bf16.mxu0 %v4541_v13  ;;  %1662 = vmatprep.subr.bf16.mxu1 %v4547_v14 }
 0x459   :  { %v1301_v4 = vpop.f32.mrb[20].mxu0  ;;  %v1342_v6 = vpop.f32.mrb[20].mxu1 }
 0x45a   :  { %v1302_v49 = vadd.f32 %v1301_v4, %v6480_v17  ;;  %v1303_v48 = vpop.f32.mrb[21].mxu0  ;;  %v1344_v47 = vpop.f32.mrb[21].mxu1  ;;  %v1343_v14 = vadd.f32 %v1342_v6, %v6482_v36 }
 0x45b   :  { %v1304_v46 = vadd.f32 %v1303_v48, %v4298_v39  ;;  %v1305_v7 = vpop.f32.mrb[22].mxu0  ;;  %v1346_v45 = vpop.f32.mrb[22].mxu1  ;;  %v1345_v13 = vadd.f32 %v1344_v47, %v6481_v32 }
 0x45c   :  { %v2851_v44 = vmul.f32 -1.442695, %v1302_v49  ;;  %v1306_v43 = vpop.f32.mrb[23].mxu0  ;;  %v1347_v42 = vpop.f32.mrb[23].mxu1 }
 0x45d   :  { %v2852_v41 = vmul.f32 -1.442695, %v1304_v46  ;;  %v2853_v8 = vmul.f32 -1.442695, %v1345_v13 }
 0x45e   :  { %3164 = vpow2.f32 %v2851_v44 }
 0x45f   :  { %3166 = vpow2.f32 %v2852_v41 }
 0x460   :  { %3168 = vpow2.f32 %v2853_v8 }
 0x461   :  { %3170 = vtanh.f32 %v1343_v14 }
 0x468   :  { %v3165_v40 = vpop.eup %3164 }
 0x469   :  { %v3167_v38 = vpop.eup %3166  ;;  %v1352_v4 = vadd.f32 1.0, %v3165_v40 }
 0x46a   :  { %v1358_v17 = vadd.f32 1.0, %v3167_v38  ;;  %v3169_v45 = vpop.eup %3168 }
 0x46b   :  { %3172 = vrcp.f32 %v1352_v4  ;;  %v3171_v48 = vpop.eup %3170  ;;  %v1365_v44 = vadd.f32 1.0, %v3169_v45 }
 0x46c   :  { %3174 = vrcp.f32 %v1358_v17 }
 0x46d   :  { %3176 = vrcp.f32 %v1365_v44 }
 0x475   :  { %v3173_v43 = vpop.eup %3172 }
 0x476   :  { %v3175_v42 = vpop.eup %3174  ;;  %v1369_v46 = vmul.f32 %v3173_v43, %v3171_v48 }
 0x477   :  { %v1368_v41 = vmul.f32 %v3175_v42, %v4555_v5  ;;  %v2854_v5 = vld [vmem:[%s6020_s0 + $0x18] sm:$0xff] }
 0x479   :  { %v1409_v47 = vpop.f32.mrb[24].mxu0  ;;  %v1450_v13 = vpop.f32.mrb[24].mxu1  ;;  %v5020_v49 = vadd.f32 %v1369_v46, %v1368_v41 }
 0x47a   :  { %v1411_v6 = vpop.f32.mrb[25].mxu0  ;;  %v1452_v40 = vpop.f32.mrb[25].mxu1 }
 0x47b   :  { %v1461_v7 = vcombine.low %v1409_v47, %v1411_v6  ;;  %v1462_v14 = vcombine.low %v1450_v13, %v1452_v40  ;;  %v1413_v38 = vpop.f32.mrb[26].mxu0  ;;  %v1454_v8 = vpop.f32.mrb[26].mxu1  ;;  %3178 = vtanh.f32 %v5020_v49 }
 0x47c   :  { %v1414_v17 = vpop.f32.mrb[27].mxu0  ;;  %v1455_v4 = vpop.f32.mrb[27].mxu1 }
 0x47d   :  { %v1469_v48 = vrot.slane %v1461_v7, %v4183_v2  ;;  %v1476_v45 = vrot.slane %v1462_v14, %v4183_v2  ;;  %v3177_v41 = vpop.eup %3176 }
 0x47f   :  { %v1477_v43 = vcombine.low %v1469_v48, %v1476_v45 }
 0x481   :  { %v1479_v42 = vadd.f32 %v2854_v5, %v1477_v43 }
 0x483   :  { %v2855_v46 = vmul.f32 -1.442695, %v1479_v42  ;;  %v1487_v44 = vrot.slane %v1479_v42, 2  ;;  %v1498_v38 = vrot.slane %v1479_v42, 6  ;;  %v1495_v8 = vrot.slane %v1479_v42, 4 }
 0x485   :  { %v3179_v47 = vpop.eup %3178  ;;  %3180 = vpow2.f32 %v2855_v46  ;;  %v2856_v13 = vmul.f32 -1.442695, %v1487_v44  ;;  %v2857_v7 = vmul.f32 -1.442695, %v1498_v38 }
 0x486   :  { %v1372_v6 = vmul.f32 %v3179_v47, %v3177_v41 }
 0x487   :  { %3182 = vpow2.f32 %v2856_v13 }
 0x488   :  { %v1512_v40 = vpack.c.bf16 %v1372_v6, %v1372_v6  ;;  %3184 = vpow2.f32 %v2857_v7  ;;  %v6569_v7 = vld [vmem:[#allocation44_spill] sm:$0xff] }
 0x48a   :  { %1545 = vmatprep.mubr.bf16.mxu0 %v1512_v40  ;;  %1586 = vmatprep.mubr.bf16.mxu1 %v1512_v40 }
 0x48f   :  { %v3181_v14 = vpop.eup %3180 }
 0x490   :  { %v1483_v17 = vadd.f32 1.0, %v3181_v14  ;;  %v6570_v14 = vld [vmem:[#allocation45_spill] sm:$0xff] }
 0x491   :  { %v3183_v4 = vpop.eup %3182 }
 0x492   :  { %3186 = vrcp.f32 %v1483_v17  ;;  %v1492_v48 = vadd.f32 1.0, %v3183_v4  ;;  %v3185_v45 = vpop.eup %3184  ;;  %v6572_v17 = vld [vmem:[#allocation47_spill] sm:$0xff]  ;;  %v6573_v4 = vld [vmem:[#allocation48_spill] sm:$0xff] }
 0x493   :  { %3188 = vtanh.f32 %v1495_v8  ;;  %v1503_v44 = vadd.f32 1.0, %v3185_v45  ;;  %v6571_v8 = vld [vmem:[#allocation46_spill] sm:$0xff] }
 0x494   :  { %3190 = vrcp.f32 %v1492_v48  ;;  %v6574_v48 = vld [vmem:[#allocation49_spill] sm:$0xff]  ;;  %v6575_v45 = vld [vmem:[#allocation50_spill] sm:$0xff] }
 0x495   :  { %3192 = vrcp.f32 %v1503_v44  ;;  %v6579_v44 = vld [vmem:[#allocation54_spill] sm:$0xff] }
 0x49c   :  { %v3187_v5 = vpop.eup %3186 }
 0x49d   :  { %v3189_v43 = vpop.eup %3188 }
 0x49e   :  { %v3191_v46 = vpop.eup %3190  ;;  %v1507_v47 = vmul.f32 %v3189_v43, %v3187_v5  ;;  %v6576_v5 = vld [vmem:[#allocation51_spill] sm:$0xff]  ;;  %v6577_v43 = vld [vmem:[#allocation52_spill] sm:$0xff] }
 0x49f   :  { %v1506_v41 = vmul.f32 %v3191_v46, %v4564_v50  ;;  %v3193_v42 = vpop.eup %3192  ;;  %v6562_v50 = vld [vmem:[#allocation37_spill] sm:$0xff] }
 0x4a0   :  { %v6578_v46 = vld [vmem:[#allocation53_spill] sm:$0xff] }
 0x4a1   :  { %v5029_v13 = vadd.f32 %v1507_v47, %v1506_v41  ;;  %v6580_v41 = vld [vmem:[#allocation55_spill] sm:$0xff]  ;;  %v6581_v47 = vld [vmem:[#allocation56_spill] sm:$0xff] }
 0x4a3   :  { %3194 = vtanh.f32 %v5029_v13 }
 0x4ad   :  { %v3195_v6 = vpop.eup %3194 }
 0x4ae   :  { %v1510_v40 = vmul.f32 %v3195_v6, %v3193_v42  ;;  %v6582_v42 = vld [vmem:[#allocation57_spill] sm:$0xff]  ;;  %v6583_v6 = vld [vmem:[#allocation58_spill] sm:$0xff] }
 0x4b0   :  { %v1511_v38 = vpack.c.bf16 %v1510_v40, %v1510_v40  ;;  %v6584_v40 = vld [vmem:[#allocation59_spill] sm:$0xff] }
 0x4b2   :  { %1546 = vmatmul.mubr.bf16.vlgmr.msra.gmra.mrb[28].mxu0 %v1511_v38  ;;  %1587 = vmatmul.mubr.bf16.vlgmr.msra.gmra.mrb[28].mxu1 %v1511_v38 }
 0x4b3   :  { %1622 = vmatpush1.bf16.msra.mxu0 %v4325_v23  ;;  %1663 = vmatpush1.bf16.msra.mxu1 %v4331_v51  ;;  %v6544_v23 = vld [vmem:[#allocation22_spill] sm:$0xff]  ;;  %v6545_v51 = vld [vmem:[#allocation23_spill] sm:$0xff] }
 0x4b4   :  { %1623 = vmatprep.subr.bf16.mxu0 %v4337_v61  ;;  %1664 = vmatprep.subr.bf16.mxu1 %v4343_v59  ;;  %v6546_v61 = vld [vmem:[#allocation24_spill] sm:$0xff]  ;;  %v6547_v59 = vld [vmem:[#allocation25_spill] sm:$0xff] }
 0x4b5   :  { %1653 = vmatprep.mubr.bf16.mxu0 %v6386_v54  ;;  %1694 = vmatprep.mubr.bf16.mxu1 %v6386_v54 }
 0x4b7   :  { %1624 = vmatpush1.bf16.msra.mxu0 %v4351_v60  ;;  %1665 = vmatpush1.bf16.msra.mxu1 %v4357_v58  ;;  %v6548_v60 = vld [vmem:[#allocation26_spill] sm:$0xff]  ;;  %v6549_v58 = vld [vmem:[#allocation27_spill] sm:$0xff] }
 0x4b8   :  { %1625 = vmatprep.subr.bf16.mxu0 %v4363_v53  ;;  %1666 = vmatprep.subr.bf16.mxu1 %v4369_v1  ;;  %v6550_v53 = vld [vmem:[#allocation28_spill] sm:$0xff]  ;;  %v6551_v1 = vld [vmem:[#allocation29_spill] sm:$0xff] }
 0x4bb   :  { %1626 = vmatpush1.bf16.msra.mxu0 %v4375_v26  ;;  %1667 = vmatpush1.bf16.msra.mxu1 %v4381_v27  ;;  %v6552_v26 = vld [vmem:[#allocation9_spill] sm:$0xff]  ;;  %v6553_v27 = vld [vmem:[#allocation10_spill] sm:$0xff] }
 0x4bc   :  { %1627 = vmatprep.subr.bf16.mxu0 %v4387_v0  ;;  %1668 = vmatprep.subr.bf16.mxu1 %v4393_v55  ;;  %v6554_v0 = vld [vmem:[#allocation60_spill] sm:$0xff]  ;;  %v6555_v55 = vld [vmem:[#allocation30_spill] sm:$0xff] }
 0x4bf   :  { %1628 = vmatpush1.bf16.msra.mxu0 %v4399_v25  ;;  %1669 = vmatpush1.bf16.msra.mxu1 %v4405_v3  ;;  %v6556_v25 = vld [vmem:[#allocation31_spill] sm:$0xff]  ;;  %v6557_v3 = vld [vmem:[#allocation32_spill] sm:$0xff] }
 0x4c0   :  { %1629 = vmatprep.subr.bf16.mxu0 %v6483_v62  ;;  %1670 = vmatprep.subr.bf16.mxu1 %v6484_v9  ;;  %v6563_v62 = vld [vmem:[#allocation38_spill] sm:$0xff]  ;;  %v6564_v9 = vld [vmem:[#allocation39_spill] sm:$0xff] }
 0x4c3   :  { %1630 = vmatpush1.bf16.msra.mxu0 %v6485_v10  ;;  %1671 = vmatpush1.bf16.msra.mxu1 %v6486_v11  ;;  %v6565_v10 = vld [vmem:[#allocation40_spill] sm:$0xff]  ;;  %v6566_v11 = vld [vmem:[#allocation41_spill] sm:$0xff] }
 0x4c4   :  { %1631 = vmatprep.subr.bf16.mxu0 %v6487_v12  ;;  %1672 = vmatprep.subr.bf16.mxu1 %v6488_v15  ;;  %v6567_v12 = vld [vmem:[#allocation42_spill] sm:$0xff]  ;;  %v6568_v15 = vld [vmem:[#allocation43_spill] sm:$0xff] }
 0x4c7   :  { %1632 = vmatpush1.bf16.msra.mxu0 %v4447_v57  ;;  %1673 = vmatpush1.bf16.msra.mxu1 %v4453_v24  ;;  %v6560_v57 = vld [vmem:[#allocation35_spill] sm:$0xff]  ;;  %v6561_v24 = vld [vmem:[#allocation36_spill] sm:$0xff] }
 0x4c8   :  { %1633 = vmatprep.subr.bf16.mxu0 %v4459_v56  ;;  %1674 = vmatprep.subr.bf16.mxu1 %v4465_v63  ;;  %v6558_v56 = vld [vmem:[#allocation33_spill] sm:$0xff]  ;;  %v6559_v63 = vld [vmem:[#allocation34_spill] sm:$0xff] }
 0x4cb   :  { %1634 = vmatpush1.bf16.msra.mxu0 %v4596_v16  ;;  %1675 = vmatpush1.bf16.msra.mxu1 %v4602_v18 }
 0x4cc   :  { %1635 = vmatprep.subr.bf16.mxu0 %v4608_v34  ;;  %1676 = vmatprep.subr.bf16.mxu1 %v4614_v19 }
 0x4cf   :  { %1636 = vmatpush1.bf16.msra.mxu0 %v4620_v20  ;;  %1677 = vmatpush1.bf16.msra.mxu1 %v4626_v21 }
 0x4d0   :  { %1759 = vmatprep.subr.bf16.mxu0 %v4632_v22  ;;  %1800 = vmatprep.subr.bf16.mxu1 %v4638_v52 }
 0x4d2   :  { %1654 = vmatmul.mubr.bf16.vlgmr.msra.gmra.mrb[32].mxu0 %v1511_v38  ;;  %1695 = vmatmul.mubr.bf16.vlgmr.msra.gmra.mrb[32].mxu1 %v1511_v38  ;;  %v6585_v38 = vld [vmem:[#allocation12_spill] sm:$0xff] }
 0x4d3   :  { %1760 = vmatpush1.bf16.msra.mxu0 %v4644_v28  ;;  %1801 = vmatpush1.bf16.msra.mxu1 %v4650_v29 }
 0x4d4   :  { %1761 = vmatprep.subr.bf16.mxu0 %v4656_v30  ;;  %1802 = vmatprep.subr.bf16.mxu1 %v4662_v31 }
 0x4d7   :  { %1762 = vmatpush1.bf16.msra.mxu0 %v4668_v33  ;;  %1803 = vmatpush1.bf16.msra.mxu1 %v4674_v35 }
 0x4d8   :  { %1763 = vmatprep.subr.bf16.mxu0 %v4680_v37  ;;  %1804 = vmatprep.subr.bf16.mxu1 %v6544_v23 }
 0x4db   :  { %1764 = vmatpush1.bf16.msra.mxu0 %v6545_v51  ;;  %1805 = vmatpush1.bf16.msra.mxu1 %v6546_v61 }
 0x4dc   :  { %1765 = vmatprep.subr.bf16.mxu0 %v6547_v59  ;;  %1806 = vmatprep.subr.bf16.mxu1 %v6548_v60 }
 0x4df   :  { %1766 = vmatpush1.bf16.msra.mxu0 %v6549_v58  ;;  %1807 = vmatpush1.bf16.msra.mxu1 %v6550_v53 }
 0x4e0   :  { %1767 = vmatprep.subr.bf16.mxu0 %v6551_v1  ;;  %1808 = vmatprep.subr.bf16.mxu1 %v6552_v26 }
 0x4e3   :  { %1768 = vmatpush1.bf16.msra.mxu0 %v6553_v27  ;;  %1809 = vmatpush1.bf16.msra.mxu1 %v6554_v0 }
 0x4e4   :  { %1769 = vmatprep.subr.bf16.mxu0 %v6555_v55  ;;  %1810 = vmatprep.subr.bf16.mxu1 %v6556_v25 }
 0x4e7   :  { %1770 = vmatpush1.bf16.msra.mxu0 %v6557_v3  ;;  %1811 = vmatpush1.bf16.msra.mxu1 %v6558_v56 }
 0x4e8   :  { %1771 = vmatprep.subr.bf16.mxu0 %v6559_v63  ;;  %1812 = vmatprep.subr.bf16.mxu1 %v6560_v57 }
 0x4eb   :  { %1772 = vmatpush1.bf16.msra.mxu0 %v6561_v24  ;;  %1813 = vmatpush1.bf16.msra.mxu1 %v6562_v50 }
 0x4ec   :  { %1773 = vmatprep.subr.bf16.mxu0 %v6563_v62  ;;  %1814 = vmatprep.subr.bf16.mxu1 %v6564_v9 }
 0x4ef   :  { %1774 = vmatpush1.bf16.msra.mxu0 %v6565_v10  ;;  %1815 = vmatpush1.bf16.msra.mxu1 %v6566_v11 }
 0x4f0   :  { %1775 = vmatprep.subr.bf16.mxu0 %v6567_v12  ;;  %1816 = vmatprep.subr.bf16.mxu1 %v6568_v15 }
 0x4f3   :  { %1776 = vmatpush1.bf16.msra.mxu0 %v6569_v7  ;;  %1817 = vmatpush1.bf16.msra.mxu1 %v6570_v14 }
 0x4f4   :  { %1777 = vmatprep.subr.bf16.mxu0 %v6571_v8  ;;  %1818 = vmatprep.subr.bf16.mxu1 %v6572_v17 }
 0x4f7   :  { %1778 = vmatpush1.bf16.msra.mxu0 %v6573_v4  ;;  %1819 = vmatpush1.bf16.msra.mxu1 %v6574_v48  ;;  %v6601_v48 = vld [vmem:[#allocation11_spill] sm:$0xff] }
 0x4f8   :  { %1779 = vmatprep.subr.bf16.mxu0 %v6575_v45  ;;  %1820 = vmatprep.subr.bf16.mxu1 %v6576_v5  ;;  %v6586_v45 = vld [vmem:[#allocation13_spill] sm:$0xff]  ;;  %v6587_v5 = vld [vmem:[#allocation14_spill] sm:$0xff] }
 0x4fb   :  { %1780 = vmatpush1.bf16.msra.mxu0 %v6577_v43  ;;  %1821 = vmatpush1.bf16.msra.mxu1 %v6578_v46  ;;  %v6588_v43 = vld [vmem:[#allocation15_spill] sm:$0xff]  ;;  %v6589_v46 = vld [vmem:[#allocation16_spill] sm:$0xff] }
 0x4fc   :  { %1781 = vmatprep.subr.bf16.mxu0 %v6579_v44  ;;  %1822 = vmatprep.subr.bf16.mxu1 %v6580_v41  ;;  %v6590_v44 = vld [vmem:[#allocation17_spill] sm:$0xff]  ;;  %v6591_v41 = vld [vmem:[#allocation18_spill] sm:$0xff] }
 0x4ff   :  { %1782 = vmatpush1.bf16.msra.mxu0 %v6581_v47  ;;  %1823 = vmatpush1.bf16.msra.mxu1 %v6582_v42  ;;  %v6592_v47 = vld [vmem:[#allocation19_spill] sm:$0xff]  ;;  %v6593_v42 = vld [vmem:[#allocation61_spill] sm:$0xff] }
 0x500   :  { %1783 = vmatprep.subr.bf16.mxu0 %v6583_v6  ;;  %1824 = vmatprep.subr.bf16.mxu1 %v6584_v40  ;;  %v6594_v6 = vld [vmem:[#allocation62_spill] sm:$0xff]  ;;  %v6595_v40 = vld [vmem:[#allocation63_spill] sm:$0xff] }
 0x503   :  { %1784 = vmatpush1.bf16.msra.mxu0 %v6585_v38  ;;  %1825 = vmatpush1.bf16.msra.mxu1 %v6586_v45  ;;  %v6596_v38 = vld [vmem:[#allocation64_spill] sm:$0xff]  ;;  %v6597_v45 = vld [vmem:[#allocation65_spill] sm:$0xff] }
 0x504   :  { %1785 = vmatprep.subr.bf16.mxu0 %v6587_v5  ;;  %1826 = vmatprep.subr.bf16.mxu1 %v6588_v43  ;;  %v6598_v5 = vld [vmem:[#allocation66_spill] sm:$0xff]  ;;  %v6599_v43 = vld [vmem:[#allocation20_spill] sm:$0xff] }
 0x507   :  { %1786 = vmatpush1.bf16.msra.mxu0 %v6589_v46  ;;  %1827 = vmatpush1.bf16.msra.mxu1 %v6590_v44  ;;  %v6600_v46 = vld [vmem:[#allocation21_spill] sm:$0xff] }
 0x508   :  { %1787 = vmatprep.subr.bf16.mxu0 %v6591_v41  ;;  %1828 = vmatprep.subr.bf16.mxu1 %v6592_v47 }
 0x50b   :  { %1788 = vmatpush1.bf16.msra.mxu0 %v6593_v42  ;;  %1829 = vmatpush1.bf16.msra.mxu1 %v6594_v6 }
 0x50c   :  { %1789 = vmatprep.subr.bf16.mxu0 %v6595_v40  ;;  %1830 = vmatprep.subr.bf16.mxu1 %v6596_v38 }
 0x50f   :  { %1790 = vmatpush1.bf16.msra.mxu0 %v6597_v45  ;;  %1831 = vmatpush1.bf16.msra.mxu1 %v6598_v5 }
 0x510   :  { %1867 = vmatprep.subr.bf16.mxu0 %v6599_v43  ;;  %1908 = vmatprep.subr.bf16.mxu1 %v6600_v46 }
 0x585   :  { %v1547_v44 = vpop.f32.mrb[28].mxu0  ;;  %v1588_v41 = vpop.f32.mrb[28].mxu1 }
 0x586   :  { %v1548_v47 = vadd.f32 %v1547_v44, %v6601_v48  ;;  %v1549_v4 = vpop.f32.mrb[29].mxu0  ;;  %v1590_v42 = vpop.f32.mrb[29].mxu1  ;;  %v1589_v46 = vadd.f32 %v1588_v41, %v6482_v36 }
 0x587   :  { %v1550_v6 = vadd.f32 %v1549_v4, %v4298_v39  ;;  %v1551_v17 = vpop.f32.mrb[30].mxu0  ;;  %v1592_v40 = vpop.f32.mrb[30].mxu1  ;;  %v1591_v43 = vadd.f32 %v1590_v42, %v6481_v32 }
 0x588   :  { %v2858_v8 = vmul.f32 -1.442695, %v1548_v47  ;;  %v1552_v38 = vpop.f32.mrb[31].mxu0  ;;  %v1593_v14 = vpop.f32.mrb[31].mxu1 }
 0x589   :  { %v2859_v45 = vmul.f32 -1.442695, %v1550_v6  ;;  %v2860_v5 = vmul.f32 -1.442695, %v1591_v43 }
 0x58a   :  { %3196 = vpow2.f32 %v2858_v8 }
 0x58b   :  { %3198 = vpow2.f32 %v2859_v45 }
 0x58c   :  { %3200 = vpow2.f32 %v2860_v5 }
 0x58d   :  { %3202 = vtanh.f32 %v1589_v46 }
 0x594   :  { %v3197_v7 = vpop.eup %3196 }
 0x595   :  { %v3199_v15 = vpop.eup %3198  ;;  %v1598_v44 = vadd.f32 1.0, %v3197_v7 }
 0x596   :  { %v1604_v48 = vadd.f32 1.0, %v3199_v15  ;;  %v3201_v17 = vpop.eup %3200 }
 0x597   :  { %3204 = vrcp.f32 %v1598_v44  ;;  %v3203_v4 = vpop.eup %3202  ;;  %v1611_v8 = vadd.f32 1.0, %v3201_v17 }
 0x598   :  { %3206 = vrcp.f32 %v1604_v48 }
 0x599   :  { %3208 = vrcp.f32 %v1611_v8 }
 0x5a1   :  { %v3205_v47 = vpop.eup %3204 }
 0x5a2   :  { %v3207_v14 = vpop.eup %3206  ;;  %v1615_v6 = vmul.f32 %v3205_v47, %v3203_v4 }
 0x5a3   :  { %v1614_v45 = vmul.f32 %v3207_v14, %v5020_v49  ;;  %v2861_v49 = vld [vmem:[%s6020_s0 + $0x20] sm:$0xff] }
 0x5a5   :  { %v1655_v42 = vpop.f32.mrb[32].mxu0  ;;  %v1696_v40 = vpop.f32.mrb[32].mxu1  ;;  %v5135_v38 = vadd.f32 %v1615_v6, %v1614_v45 }
 0x5a6   :  { %v1657_v41 = vpop.f32.mrb[33].mxu0  ;;  %v1698_v7 = vpop.f32.mrb[33].mxu1 }
 0x5a7   :  { %v1707_v5 = vcombine.low %v1655_v42, %v1657_v41  ;;  %v1708_v43 = vcombine.low %v1696_v40, %v1698_v7  ;;  %v1659_v15 = vpop.f32.mrb[34].mxu0  ;;  %v1700_v46 = vpop.f32.mrb[34].mxu1  ;;  %3210 = vtanh.f32 %v5135_v38 }
 0x5a8   :  { %v1660_v48 = vpop.f32.mrb[35].mxu0  ;;  %v1701_v44 = vpop.f32.mrb[35].mxu1 }
 0x5a9   :  { %v1715_v4 = vrot.slane %v1707_v5, %v4183_v2  ;;  %v1722_v17 = vrot.slane %v1708_v43, %v4183_v2  ;;  %v3209_v45 = vpop.eup %3208 }
 0x5ab   :  { %v1723_v47 = vcombine.low %v1715_v4, %v1722_v17 }
 0x5ad   :  { %v1725_v14 = vadd.f32 %v2861_v49, %v1723_v47 }
 0x5af   :  { %v2862_v6 = vmul.f32 -1.442695, %v1725_v14  ;;  %v1733_v8 = vrot.slane %v1725_v14, 2  ;;  %v1744_v15 = vrot.slane %v1725_v14, 6  ;;  %v1741_v46 = vrot.slane %v1725_v14, 4 }
 0x5b1   :  { %v3211_v42 = vpop.eup %3210  ;;  %3212 = vpow2.f32 %v2862_v6  ;;  %v2863_v40 = vmul.f32 -1.442695, %v1733_v8  ;;  %v2864_v5 = vmul.f32 -1.442695, %v1744_v15 }
 0x5b2   :  { %v1618_v41 = vmul.f32 %v3211_v42, %v3209_v45 }
 0x5b3   :  { %3214 = vpow2.f32 %v2863_v40 }
 0x5b4   :  { %v1758_v7 = vpack.c.bf16 %v1618_v41, %v1618_v41  ;;  %3216 = vpow2.f32 %v2864_v5  ;;  %v5150_v5 = vld [vmem:[%s6021_s1] ss:$16 sps:$4 sm:$0xff]  }
 0x5b6   :  { %1791 = vmatprep.mubr.bf16.mxu0 %v1758_v7  ;;  %1832 = vmatprep.mubr.bf16.mxu1 %v1758_v7 }
 0x5bb   :  { %v3213_v43 = vpop.eup %3212 }
 0x5bc   :  { %v1729_v48 = vadd.f32 1.0, %v3213_v43  ;;  %v5162_v43 = vld [vmem:[%s6021_s1 + $0x24] ss:$16 sps:$4 sm:$0xff]  }
 0x5bd   :  { %v3215_v44 = vpop.eup %3214 }
 0x5be   :  { %3218 = vrcp.f32 %v1729_v48  ;;  %v1738_v4 = vadd.f32 1.0, %v3215_v44  ;;  %v3217_v17 = vpop.eup %3216  ;;  %v5176_v48 = vld [vmem:[%s6021_s1 + $0x20] ss:$16 sps:$4 sm:$0xff]   ;;  %v5182_v44 = vld [vmem:[%s6021_s1 + $0x28] ss:$16 sps:$4 sm:$0xff]  }
 0x5bf   :  { %3220 = vtanh.f32 %v1741_v46  ;;  %v1749_v8 = vadd.f32 1.0, %v3217_v17  ;;  %v5168_v46 = vld [vmem:[%s6021_s1 + $0x2c] ss:$16 sps:$4 sm:$0xff]  }
 0x5c0   :  { %3222 = vrcp.f32 %v1738_v4  ;;  %v5188_v4 = vld [vmem:[%s6021_s1 + $0x44] ss:$16 sps:$4 sm:$0xff]   ;;  %v5194_v17 = vld [vmem:[%s6021_s1 + $0x4c] ss:$16 sps:$4 sm:$0xff]  }
 0x5c1   :  { %3224 = vrcp.f32 %v1749_v8  ;;  %v5218_v8 = vld [vmem:[%s6021_s1 + $0x6c] ss:$16 sps:$4 sm:$0xff]  }
 0x5c8   :  { %v3219_v49 = vpop.eup %3218 }
 0x5c9   :  { %v3221_v47 = vpop.eup %3220 }
 0x5ca   :  { %v3223_v6 = vpop.eup %3222  ;;  %v1753_v42 = vmul.f32 %v3221_v47, %v3219_v49  ;;  %v5200_v49 = vld [vmem:[%s6021_s1 + $0x40] ss:$16 sps:$4 sm:$0xff]   ;;  %v5206_v47 = vld [vmem:[%s6021_s1 + $0x48] ss:$16 sps:$4 sm:$0xff]  }
 0x5cb   :  { %v1752_v45 = vmul.f32 %v3223_v6, %v5029_v13  ;;  %v3225_v14 = vpop.eup %3224  ;;  %v5156_v13 = vld [vmem:[%s6021_s1 + $0x8] ss:$16 sps:$4 sm:$0xff]   ;;  %v5212_v6 = vld [vmem:[%s6021_s1 + $0x64] ss:$16 sps:$4 sm:$0xff]  }
 0x5cd   :  { %v5144_v40 = vadd.f32 %v1753_v42, %v1752_v45  ;;  %v5224_v45 = vld [vmem:[%s6021_s1 + $0x60] ss:$16 sps:$4 sm:$0xff]   ;;  %v5230_v42 = vld [vmem:[%s6021_s1 + $0x68] ss:$16 sps:$4 sm:$0xff]  }
 0x5ce   :  { %6602 = vst [vmem:[#allocation22_spill] sm:$0xff] %v5230_v42 }
 0x5cf   :  { %3226 = vtanh.f32 %v5144_v40 }
 0x5d9   :  { %v3227_v41 = vpop.eup %3226 }
 0x5da   :  { %v1756_v7 = vmul.f32 %v3227_v41, %v3225_v14  ;;  %v5236_v14 = vld [vmem:[%s6021_s1 + $0x84] ss:$16 sps:$4 sm:$0xff]   ;;  %v5242_v41 = vld [vmem:[%s6021_s1 + $0x8c] ss:$16 sps:$4 sm:$0xff]  }
 0x5db   :  { %6603 = vst [vmem:[#allocation23_spill] sm:$0xff] %v5236_v14  ;;  %6604 = vst [vmem:[#allocation24_spill] sm:$0xff] %v5242_v41 }
 0x5dc   :  { %v1757_v15 = vpack.c.bf16 %v1756_v7, %v1756_v7  ;;  %v5248_v7 = vld [vmem:[%s6021_s1 + $0x80] ss:$16 sps:$4 sm:$0xff]  }
 0x5dd   :  { %6605 = vst [vmem:[#allocation25_spill] sm:$0xff] %v5248_v7 }
 0x5de   :  { %1792 = vmatmul.mubr.bf16.vlgmr.msra.gmra.mrb[36].mxu0 %v1757_v15  ;;  %1833 = vmatmul.mubr.bf16.vlgmr.msra.gmra.mrb[36].mxu1 %v1757_v15 }
 0x5df   :  { %1868 = vmatpush1.bf16.msra.mxu0 %v5150_v5  ;;  %1909 = vmatpush1.bf16.msra.mxu1 %v5156_v13 }
 0x5e0   :  { %1869 = vmatprep.subr.bf16.mxu0 %v5162_v43  ;;  %1910 = vmatprep.subr.bf16.mxu1 %v5168_v46 }
 0x5e1   :  { %1899 = vmatprep.mubr.bf16.mxu0 %v6386_v54  ;;  %1940 = vmatprep.mubr.bf16.mxu1 %v6386_v54 }
 0x5e3   :  { %1870 = vmatpush1.bf16.msra.mxu0 %v5176_v48  ;;  %1911 = vmatpush1.bf16.msra.mxu1 %v5182_v44 }
 0x5e4   :  { %1871 = vmatprep.subr.bf16.mxu0 %v5188_v4  ;;  %1912 = vmatprep.subr.bf16.mxu1 %v5194_v17 }
 0x5e7   :  { %1872 = vmatpush1.bf16.msra.mxu0 %v5200_v49  ;;  %1913 = vmatpush1.bf16.msra.mxu1 %v5206_v47 }
 0x5e8   :  { %1873 = vmatprep.subr.bf16.mxu0 %v5212_v6  ;;  %1914 = vmatprep.subr.bf16.mxu1 %v5218_v8 }
 0x5eb   :  { %1874 = vmatpush1.bf16.msra.mxu0 %v5224_v45  ;;  %1915 = vmatpush1.bf16.msra.mxu1 %v5230_v42  ;;  %v5254_v42 = vld [vmem:[%s6021_s1 + $0x88] ss:$16 sps:$4 sm:$0xff]  }
 0x5ec   :  { %1875 = vmatprep.subr.bf16.mxu0 %v5236_v14  ;;  %1916 = vmatprep.subr.bf16.mxu1 %v5242_v41  ;;  %6606 = vst [vmem:[#allocation26_spill] sm:$0xff] %v5254_v42  ;;  %v5260_v14 = vld [vmem:[%s6021_s1 + $0xa4] ss:$16 sps:$4 sm:$0xff]   ;;  %v5266_v41 = vld [vmem:[%s6021_s1 + $0xac] ss:$16 sps:$4 sm:$0xff]  }
 0x5ed   :  { %6607 = vst [vmem:[#allocation27_spill] sm:$0xff] %v5260_v14  ;;  %6608 = vst [vmem:[#allocation28_spill] sm:$0xff] %v5266_v41 }
 0x5ef   :  { %1876 = vmatpush1.bf16.msra.mxu0 %v5248_v7  ;;  %1917 = vmatpush1.bf16.msra.mxu1 %v5254_v42  ;;  %v5272_v7 = vld [vmem:[%s6021_s1 + $0xa0] ss:$16 sps:$4 sm:$0xff]   ;;  %v5278_v42 = vld [vmem:[%s6021_s1 + $0xa8] ss:$16 sps:$4 sm:$0xff]  }
 0x5f0   :  { %1877 = vmatprep.subr.bf16.mxu0 %v5260_v14  ;;  %1918 = vmatprep.subr.bf16.mxu1 %v5266_v41  ;;  %v5284_v14 = vld [vmem:[%s6021_s1 + $0xc4] ss:$16 sps:$4 sm:$0xff]   ;;  %v5290_v41 = vld [vmem:[%s6021_s1 + $0xcc] ss:$16 sps:$4 sm:$0xff]  }
 0x5f3   :  { %1878 = vmatpush1.bf16.msra.mxu0 %v5272_v7  ;;  %1919 = vmatpush1.bf16.msra.mxu1 %v5278_v42 }
 0x5f4   :  { %1879 = vmatprep.subr.bf16.mxu0 %v5284_v14  ;;  %1920 = vmatprep.subr.bf16.mxu1 %v5290_v41 }
 0x5f7   :  { %1880 = vmatpush1.bf16.msra.mxu0 %v4596_v16  ;;  %1921 = vmatpush1.bf16.msra.mxu1 %v4602_v18  ;;  %v6609_v16 = vld [vmem:[#allocation43_spill] sm:$0xff]  ;;  %v6610_v18 = vld [vmem:[#allocation44_spill] sm:$0xff] }
 0x5f8   :  { %1881 = vmatprep.subr.bf16.mxu0 %v4608_v34  ;;  %1922 = vmatprep.subr.bf16.mxu1 %v4614_v19  ;;  %v6611_v34 = vld [vmem:[#allocation45_spill] sm:$0xff]  ;;  %v6612_v19 = vld [vmem:[#allocation46_spill] sm:$0xff] }
 0x5fb   :  { %1882 = vmatpush1.bf16.msra.mxu0 %v4620_v20  ;;  %1923 = vmatpush1.bf16.msra.mxu1 %v4626_v21  ;;  %v6613_v20 = vld [vmem:[#allocation47_spill] sm:$0xff]  ;;  %v6614_v21 = vld [vmem:[#allocation48_spill] sm:$0xff] }
 0x5fc   :  { %2005 = vmatprep.subr.bf16.mxu0 %v4632_v22  ;;  %2046 = vmatprep.subr.bf16.mxu1 %v4638_v52  ;;  %v6615_v22 = vld [vmem:[#allocation49_spill] sm:$0xff]  ;;  %v6616_v52 = vld [vmem:[#allocation50_spill] sm:$0xff] }
 0x5fe   :  { %1900 = vmatmul.mubr.bf16.vlgmr.msra.gmra.mrb[40].mxu0 %v1757_v15  ;;  %1941 = vmatmul.mubr.bf16.vlgmr.msra.gmra.mrb[40].mxu1 %v1757_v15 }
 0x5ff   :  { %2006 = vmatpush1.bf16.msra.mxu0 %v4644_v28  ;;  %2047 = vmatpush1.bf16.msra.mxu1 %v4650_v29  ;;  %v6617_v28 = vld [vmem:[#allocation51_spill] sm:$0xff]  ;;  %v6618_v29 = vld [vmem:[#allocation52_spill] sm:$0xff] }
 0x600   :  { %2007 = vmatprep.subr.bf16.mxu0 %v4656_v30  ;;  %2048 = vmatprep.subr.bf16.mxu1 %v4662_v31  ;;  %v6619_v30 = vld [vmem:[#allocation53_spill] sm:$0xff]  ;;  %v6620_v31 = vld [vmem:[#allocation54_spill] sm:$0xff] }
 0x603   :  { %2008 = vmatpush1.bf16.msra.mxu0 %v4668_v33  ;;  %2049 = vmatpush1.bf16.msra.mxu1 %v4674_v35  ;;  %v6621_v33 = vld [vmem:[#allocation55_spill] sm:$0xff]  ;;  %v6622_v35 = vld [vmem:[#allocation56_spill] sm:$0xff] }
 0x604   :  { %2009 = vmatprep.subr.bf16.mxu0 %v4680_v37  ;;  %2050 = vmatprep.subr.bf16.mxu1 %v6544_v23  ;;  %v6623_v37 = vld [vmem:[#allocation57_spill] sm:$0xff]  ;;  %v6624_v23 = vld [vmem:[#allocation58_spill] sm:$0xff] }
 0x607   :  { %2010 = vmatpush1.bf16.msra.mxu0 %v6545_v51  ;;  %2051 = vmatpush1.bf16.msra.mxu1 %v6546_v61  ;;  %v6625_v51 = vld [vmem:[#allocation59_spill] sm:$0xff]  ;;  %v6626_v61 = vld [vmem:[#allocation12_spill] sm:$0xff] }
 0x608   :  { %2011 = vmatprep.subr.bf16.mxu0 %v6547_v59  ;;  %2052 = vmatprep.subr.bf16.mxu1 %v6548_v60  ;;  %v6627_v59 = vld [vmem:[#allocation13_spill] sm:$0xff]  ;;  %v6628_v60 = vld [vmem:[#allocation14_spill] sm:$0xff] }
 0x60b   :  { %2012 = vmatpush1.bf16.msra.mxu0 %v6549_v58  ;;  %2053 = vmatpush1.bf16.msra.mxu1 %v6550_v53  ;;  %v6629_v58 = vld [vmem:[#allocation15_spill] sm:$0xff]  ;;  %v6630_v53 = vld [vmem:[#allocation16_spill] sm:$0xff] }
 0x60c   :  { %2013 = vmatprep.subr.bf16.mxu0 %v6551_v1  ;;  %2054 = vmatprep.subr.bf16.mxu1 %v6552_v26  ;;  %v6631_v1 = vld [vmem:[#allocation17_spill] sm:$0xff]  ;;  %v6632_v26 = vld [vmem:[#allocation18_spill] sm:$0xff] }
 0x60f   :  { %2014 = vmatpush1.bf16.msra.mxu0 %v6553_v27  ;;  %2055 = vmatpush1.bf16.msra.mxu1 %v6554_v0  ;;  %v6633_v27 = vld [vmem:[#allocation19_spill] sm:$0xff]  ;;  %v6634_v0 = vld [vmem:[#allocation61_spill] sm:$0xff] }
 0x610   :  { %2015 = vmatprep.subr.bf16.mxu0 %v6555_v55  ;;  %2056 = vmatprep.subr.bf16.mxu1 %v6556_v25  ;;  %v6635_v55 = vld [vmem:[#allocation62_spill] sm:$0xff]  ;;  %v6636_v25 = vld [vmem:[#allocation63_spill] sm:$0xff] }
 0x613   :  { %2016 = vmatpush1.bf16.msra.mxu0 %v6557_v3  ;;  %2057 = vmatpush1.bf16.msra.mxu1 %v6558_v56  ;;  %v6637_v3 = vld [vmem:[#allocation64_spill] sm:$0xff]  ;;  %v6638_v56 = vld [vmem:[#allocation65_spill] sm:$0xff] }
 0x614   :  { %2017 = vmatprep.subr.bf16.mxu0 %v6559_v63  ;;  %2058 = vmatprep.subr.bf16.mxu1 %v6560_v57  ;;  %v6639_v63 = vld [vmem:[#allocation66_spill] sm:$0xff] }
 0x615   :  { %v5366_v57 = vld [vmem:[%s6021_s1 + $0x4] ss:$16 sps:$4 sm:$0xff]  }
 0x617   :  { %2018 = vmatpush1.bf16.msra.mxu0 %v6561_v24  ;;  %2059 = vmatpush1.bf16.msra.mxu1 %v6562_v50  ;;  %v5372_v24 = vld [vmem:[%s6021_s1 + $0xc] ss:$16 sps:$4 sm:$0xff]  }
 0x618   :  { %2019 = vmatprep.subr.bf16.mxu0 %v6563_v62  ;;  %2060 = vmatprep.subr.bf16.mxu1 %v6564_v9  ;;  %v6640_v9 = vld [vmem:[#allocation11_spill] sm:$0xff] }
 0x61b   :  { %2020 = vmatpush1.bf16.msra.mxu0 %v6565_v10  ;;  %2061 = vmatpush1.bf16.msra.mxu1 %v6566_v11 }
 0x61c   :  { %2021 = vmatprep.subr.bf16.mxu0 %v6567_v12  ;;  %2062 = vmatprep.subr.bf16.mxu1 %v6609_v16 }
 0x61f   :  { %2022 = vmatpush1.bf16.msra.mxu0 %v6610_v18  ;;  %2063 = vmatpush1.bf16.msra.mxu1 %v6611_v34 }
 0x620   :  { %2023 = vmatprep.subr.bf16.mxu0 %v6612_v19  ;;  %2064 = vmatprep.subr.bf16.mxu1 %v6613_v20 }
 0x623   :  { %2024 = vmatpush1.bf16.msra.mxu0 %v6614_v21  ;;  %2065 = vmatpush1.bf16.msra.mxu1 %v6615_v22 }
 0x624   :  { %2025 = vmatprep.subr.bf16.mxu0 %v6616_v52  ;;  %2066 = vmatprep.subr.bf16.mxu1 %v6617_v28 }
 0x627   :  { %2026 = vmatpush1.bf16.msra.mxu0 %v6618_v29  ;;  %2067 = vmatpush1.bf16.msra.mxu1 %v6619_v30 }
 0x628   :  { %2027 = vmatprep.subr.bf16.mxu0 %v6620_v31  ;;  %2068 = vmatprep.subr.bf16.mxu1 %v6621_v33 }
 0x62b   :  { %2028 = vmatpush1.bf16.msra.mxu0 %v6622_v35  ;;  %2069 = vmatpush1.bf16.msra.mxu1 %v6623_v37 }
 0x62c   :  { %2029 = vmatprep.subr.bf16.mxu0 %v6624_v23  ;;  %2070 = vmatprep.subr.bf16.mxu1 %v6625_v51 }
 0x62f   :  { %2030 = vmatpush1.bf16.msra.mxu0 %v6626_v61  ;;  %2071 = vmatpush1.bf16.msra.mxu1 %v6627_v59 }
 0x630   :  { %2031 = vmatprep.subr.bf16.mxu0 %v6628_v60  ;;  %2072 = vmatprep.subr.bf16.mxu1 %v6629_v58 }
 0x633   :  { %2032 = vmatpush1.bf16.msra.mxu0 %v6630_v53  ;;  %2073 = vmatpush1.bf16.msra.mxu1 %v6631_v1 }
 0x634   :  { %2033 = vmatprep.subr.bf16.mxu0 %v6632_v26  ;;  %2074 = vmatprep.subr.bf16.mxu1 %v6633_v27 }
 0x637   :  { %2034 = vmatpush1.bf16.msra.mxu0 %v6634_v0  ;;  %2075 = vmatpush1.bf16.msra.mxu1 %v6635_v55 }
 0x638   :  { %2035 = vmatprep.subr.bf16.mxu0 %v6636_v25  ;;  %2076 = vmatprep.subr.bf16.mxu1 %v6637_v3 }
 0x63b   :  { %2036 = vmatpush1.bf16.msra.mxu0 %v6638_v56  ;;  %2077 = vmatpush1.bf16.msra.mxu1 %v6639_v63 }
 0x63c   :  { %2113 = vmatprep.subr.bf16.mxu0 %v5366_v57  ;;  %2154 = vmatprep.subr.bf16.mxu1 %v5372_v24 }
 0x6b1   :  { %v1793_v50 = vpop.f32.mrb[36].mxu0  ;;  %v1834_v62 = vpop.f32.mrb[36].mxu1 }
 0x6b2   :  { %v1794_v10 = vadd.f32 %v1793_v50, %v6640_v9  ;;  %v1795_v11 = vpop.f32.mrb[37].mxu0  ;;  %v1836_v12 = vpop.f32.mrb[37].mxu1  ;;  %v1835_v28 = vadd.f32 %v1834_v62, %v6482_v36 }
 0x6b3   :  { %v1796_v15 = vadd.f32 %v1795_v11, %v4298_v39  ;;  %v1797_v16 = vpop.f32.mrb[38].mxu0  ;;  %v1838_v18 = vpop.f32.mrb[38].mxu1  ;;  %v1837_v22 = vadd.f32 %v1836_v12, %v6481_v32 }
 0x6b4   :  { %v2865_v34 = vmul.f32 -1.442695, %v1794_v10  ;;  %v1798_v19 = vpop.f32.mrb[39].mxu0  ;;  %v1839_v20 = vpop.f32.mrb[39].mxu1 }
 0x6b5   :  { %v2866_v21 = vmul.f32 -1.442695, %v1796_v15  ;;  %v2867_v52 = vmul.f32 -1.442695, %v1837_v22 }
 0x6b6   :  { %3228 = vpow2.f32 %v2865_v34 }
 0x6b7   :  { %3230 = vpow2.f32 %v2866_v21 }
 0x6b8   :  { %3232 = vpow2.f32 %v2867_v52 }
 0x6b9   :  { %3234 = vtanh.f32 %v1835_v28 }
 0x6c0   :  { %v3229_v29 = vpop.eup %3228 }
 0x6c1   :  { %v3231_v30 = vpop.eup %3230  ;;  %v1844_v31 = vadd.f32 1.0, %v3229_v29 }
 0x6c2   :  { %v1850_v33 = vadd.f32 1.0, %v3231_v30  ;;  %v3233_v35 = vpop.eup %3232 }
 0x6c3   :  { %3236 = vrcp.f32 %v1844_v31  ;;  %v3235_v37 = vpop.eup %3234  ;;  %v1857_v59 = vadd.f32 1.0, %v3233_v35 }
 0x6c4   :  { %3238 = vrcp.f32 %v1850_v33 }
 0x6c5   :  { %3240 = vrcp.f32 %v1857_v59 }
 0x6cd   :  { %v3237_v23 = vpop.eup %3236 }
 0x6ce   :  { %v3239_v51 = vpop.eup %3238  ;;  %v1861_v61 = vmul.f32 %v3237_v23, %v3235_v37 }
 0x6cf   :  { %v1860_v60 = vmul.f32 %v3239_v51, %v5135_v38  ;;  %v2868_v38 = vld [vmem:[%s6020_s0 + $0x28] sm:$0xff]  ;;  %v3241_v16 = vpop.eup %3240 }
 0x6d1   :  { %v1901_v58 = vpop.f32.mrb[40].mxu0  ;;  %v1942_v53 = vpop.f32.mrb[40].mxu1  ;;  %v5380_v1 = vadd.f32 %v1861_v61, %v1860_v60 }
 0x6d2   :  { %v1903_v26 = vpop.f32.mrb[41].mxu0  ;;  %v1944_v27 = vpop.f32.mrb[41].mxu1 }
 0x6d3   :  { %v1953_v0 = vcombine.low %v1901_v58, %v1903_v26  ;;  %v1954_v55 = vcombine.low %v1942_v53, %v1944_v27  ;;  %v1905_v25 = vpop.f32.mrb[42].mxu0  ;;  %v1946_v3 = vpop.f32.mrb[42].mxu1  ;;  %3242 = vtanh.f32 %v5380_v1 }
 0x6d4   :  { %v1906_v56 = vpop.f32.mrb[43].mxu0  ;;  %v1947_v63 = vpop.f32.mrb[43].mxu1  ;;  %v6644_v25 = vld [vmem:[#allocation25_spill] sm:$0xff]  ;;  %v6645_v3 = vld [vmem:[#allocation26_spill] sm:$0xff] }
 0x6d5   :  { %v1961_v50 = vrot.slane %v1953_v0, %v4183_v2  ;;  %v1968_v62 = vrot.slane %v1954_v55, %v4183_v2  ;;  %v6642_v0 = vld [vmem:[#allocation23_spill] sm:$0xff]  ;;  %v6643_v55 = vld [vmem:[#allocation24_spill] sm:$0xff] }
 0x6d6   :  { %v6646_v56 = vld [vmem:[#allocation27_spill] sm:$0xff]  ;;  %v6647_v63 = vld [vmem:[#allocation28_spill] sm:$0xff] }
 0x6d7   :  { %v1969_v10 = vcombine.low %v1961_v50, %v1968_v62  ;;  %v5421_v50 = vld [vmem:[%s6021_s1 + $0xc0] ss:$16 sps:$4 sm:$0xff]   ;;  %v5427_v62 = vld [vmem:[%s6021_s1 + $0xc8] ss:$16 sps:$4 sm:$0xff]  }
 0x6d9   :  { %v1971_v11 = vadd.f32 %v2868_v38, %v1969_v10  ;;  %v5433_v38 = vld [vmem:[%s6021_s1 + $0xe4] ss:$16 sps:$4 sm:$0xff]   ;;  %v5439_v10 = vld [vmem:[%s6021_s1 + $0xec] ss:$16 sps:$4 sm:$0xff]  }
 0x6db   :  { %v2869_v12 = vmul.f32 -1.442695, %v1971_v11  ;;  %v1979_v15 = vrot.slane %v1971_v11, 2  ;;  %v1990_v21 = vrot.slane %v1971_v11, 6  ;;  %v1987_v28 = vrot.slane %v1971_v11, 4 }
 0x6dc   :  { %v5445_v11 = vld [vmem:[%s6021_s1 + $0xe0] ss:$16 sps:$4 sm:$0xff]  }
 0x6dd   :  { %v3243_v18 = vpop.eup %3242  ;;  %3244 = vpow2.f32 %v2869_v12  ;;  %v2870_v34 = vmul.f32 -1.442695, %v1979_v15  ;;  %v2871_v22 = vmul.f32 -1.442695, %v1990_v21  ;;  %v5451_v12 = vld [vmem:[%s6021_s1 + $0xe8] ss:$16 sps:$4 sm:$0xff]  }
 0x6de   :  { %v1864_v19 = vmul.f32 %v3243_v18, %v3241_v16  ;;  %v5457_v15 = vld [vmem:[%s6022_s2 + $0x4] ss:$16 sps:$4 sm:$0xff]   ;;  %v5463_v16 = vld [vmem:[%s6022_s2 + $0xc] ss:$16 sps:$4 sm:$0xff]   ;;  %v5469_v18 = vld [vmem:[%s6022_s2] ss:$16 sps:$4 sm:$0xff]  }
 0x6df   :  { %3246 = vpow2.f32 %v2870_v34  ;;  %v5475_v34 = vld [vmem:[%s6022_s2 + $0x8] ss:$16 sps:$4 sm:$0xff]   ;;  %v5493_v21 = vld [vmem:[%s6022_s2 + $0x20] ss:$16 sps:$4 sm:$0xff]  }
 0x6e0   :  { %v2004_v20 = vpack.c.bf16 %v1864_v19, %v1864_v19  ;;  %3248 = vpow2.f32 %v2871_v22  ;;  %v5481_v19 = vld [vmem:[%s6022_s2 + $0x24] ss:$16 sps:$4 sm:$0xff]   ;;  %v5499_v22 = vld [vmem:[%s6022_s2 + $0x28] ss:$16 sps:$4 sm:$0xff]  }
 0x6e2   :  { %2037 = vmatprep.mubr.bf16.mxu0 %v2004_v20  ;;  %2078 = vmatprep.mubr.bf16.mxu1 %v2004_v20  ;;  %v5487_v20 = vld [vmem:[%s6022_s2 + $0x2c] ss:$16 sps:$4 sm:$0xff]  }
 0x6e7   :  { %v3245_v52 = vpop.eup %3244 }
 0x6e8   :  { %v1975_v29 = vadd.f32 1.0, %v3245_v52  ;;  %v5505_v52 = vld [vmem:[%s6022_s2 + $0x44] ss:$16 sps:$4 sm:$0xff]  }
 0x6e9   :  { %v3247_v30 = vpop.eup %3246 }
 0x6ea   :  { %3250 = vrcp.f32 %v1975_v29  ;;  %v1984_v31 = vadd.f32 1.0, %v3247_v30  ;;  %v3249_v33 = vpop.eup %3248  ;;  %v5517_v29 = vld [vmem:[%s6022_s2 + $0x40] ss:$16 sps:$4 sm:$0xff]   ;;  %v5523_v30 = vld [vmem:[%s6022_s2 + $0x48] ss:$16 sps:$4 sm:$0xff]  }
 0x6eb   :  { %3252 = vtanh.f32 %v1987_v28  ;;  %v1995_v51 = vadd.f32 1.0, %v3249_v33  ;;  %v5511_v28 = vld [vmem:[%s6022_s2 + $0x4c] ss:$16 sps:$4 sm:$0xff]   ;;  %6649 = vst [vmem:[#allocation9_spill] sm:$0xff] %v5517_v29  ;;  %6650 = vst [vmem:[#allocation10_spill] sm:$0xff] %v5523_v30 }
 0x6ec   :  { %3254 = vrcp.f32 %v1984_v31  ;;  %6648 = vst [vmem:[#allocation29_spill] sm:$0xff] %v5511_v28  ;;  %v5529_v31 = vld [vmem:[%s6022_s2 + $0x64] ss:$16 sps:$4 sm:$0xff]   ;;  %v5535_v33 = vld [vmem:[%s6022_s2 + $0x6c] ss:$16 sps:$4 sm:$0xff]  }
 0x6ed   :  { %3256 = vrcp.f32 %v1995_v51  ;;  %6651 = vst [vmem:[#allocation60_spill] sm:$0xff] %v5529_v31  ;;  %6652 = vst [vmem:[#allocation30_spill] sm:$0xff] %v5535_v33  ;;  %v5559_v51 = vld [vmem:[%s6022_s2 + $0x8c] ss:$16 sps:$4 sm:$0xff]  }
 0x6ee   :  { %6656 = vst [vmem:[#allocation34_spill] sm:$0xff] %v5559_v51 }
 0x6f4   :  { %v3251_v35 = vpop.eup %3250 }
 0x6f5   :  { %v3253_v37 = vpop.eup %3252 }
 0x6f6   :  { %v3255_v23 = vpop.eup %3254  ;;  %v1999_v59 = vmul.f32 %v3253_v37, %v3251_v35  ;;  %v5541_v35 = vld [vmem:[%s6022_s2 + $0x60] ss:$16 sps:$4 sm:$0xff]   ;;  %v5547_v37 = vld [vmem:[%s6022_s2 + $0x68] ss:$16 sps:$4 sm:$0xff]  }
 0x6f7   :  { %v1998_v61 = vmul.f32 %v3255_v23, %v5144_v40  ;;  %v3257_v58 = vpop.eup %3256  ;;  %v6641_v40 = vld [vmem:[#allocation22_spill] sm:$0xff]  ;;  %6653 = vst [vmem:[#allocation31_spill] sm:$0xff] %v5541_v35  ;;  %6654 = vst [vmem:[#allocation32_spill] sm:$0xff] %v5547_v37 }
 0x6f8   :  { %v5553_v23 = vld [vmem:[%s6022_s2 + $0x84] ss:$16 sps:$4 sm:$0xff]  }
 0x6f9   :  { %v5389_v60 = vadd.f32 %v1999_v59, %v1998_v61  ;;  %6655 = vst [vmem:[#allocation33_spill] sm:$0xff] %v5553_v23  ;;  %v5565_v61 = vld [vmem:[%s6022_s2 + $0x80] ss:$16 sps:$4 sm:$0xff]   ;;  %v5571_v59 = vld [vmem:[%s6022_s2 + $0x88] ss:$16 sps:$4 sm:$0xff]  }
 0x6fa   :  { %6657 = vst [vmem:[#allocation35_spill] sm:$0xff] %v5565_v61  ;;  %6658 = vst [vmem:[#allocation36_spill] sm:$0xff] %v5571_v59 }
 0x6fb   :  { %3258 = vtanh.f32 %v5389_v60 }
 0x705   :  { %v3259_v53 = vpop.eup %3258 }
 0x706   :  { %v2002_v26 = vmul.f32 %v3259_v53, %v3257_v58  ;;  %v5577_v58 = vld [vmem:[%s6022_s2 + $0xa4] ss:$16 sps:$4 sm:$0xff]   ;;  %v5583_v53 = vld [vmem:[%s6022_s2 + $0xac] ss:$16 sps:$4 sm:$0xff]  }
 0x707   :  { %6659 = vst [vmem:[#allocation37_spill] sm:$0xff] %v5577_v58  ;;  %6660 = vst [vmem:[#allocation38_spill] sm:$0xff] %v5583_v53 }
 0x708   :  { %v2003_v27 = vpack.c.bf16 %v2002_v26, %v2002_v26  ;;  %v5589_v26 = vld [vmem:[%s6022_s2 + $0xa0] ss:$16 sps:$4 sm:$0xff]  }
 0x709   :  { %6661 = vst [vmem:[#allocation39_spill] sm:$0xff] %v5589_v26 }
 0x70a   :  { %2038 = vmatmul.mubr.bf16.vlgmr.msra.gmra.mrb[44].mxu0 %v2003_v27  ;;  %2079 = vmatmul.mubr.bf16.vlgmr.msra.gmra.mrb[44].mxu1 %v2003_v27 }
 0x70b   :  { %2114 = vmatpush1.bf16.msra.mxu0 %v5150_v5  ;;  %2155 = vmatpush1.bf16.msra.mxu1 %v5156_v13 }
 0x70c   :  { %2115 = vmatprep.subr.bf16.mxu0 %v5162_v43  ;;  %2156 = vmatprep.subr.bf16.mxu1 %v5168_v46 }
 0x70d   :  { %2145 = vmatprep.mubr.bf16.mxu0 %v6386_v54  ;;  %2186 = vmatprep.mubr.bf16.mxu1 %v6386_v54 }
 0x70f   :  { %2116 = vmatpush1.bf16.msra.mxu0 %v5176_v48  ;;  %2157 = vmatpush1.bf16.msra.mxu1 %v5182_v44 }
 0x710   :  { %2117 = vmatprep.subr.bf16.mxu0 %v5188_v4  ;;  %2158 = vmatprep.subr.bf16.mxu1 %v5194_v17 }
 0x713   :  { %2118 = vmatpush1.bf16.msra.mxu0 %v5200_v49  ;;  %2159 = vmatpush1.bf16.msra.mxu1 %v5206_v47 }
 0x714   :  { %2119 = vmatprep.subr.bf16.mxu0 %v5212_v6  ;;  %2160 = vmatprep.subr.bf16.mxu1 %v5218_v8 }
 0x717   :  { %2120 = vmatpush1.bf16.msra.mxu0 %v5224_v45  ;;  %2161 = vmatpush1.bf16.msra.mxu1 %v6641_v40 }
 0x718   :  { %2121 = vmatprep.subr.bf16.mxu0 %v6642_v0  ;;  %2162 = vmatprep.subr.bf16.mxu1 %v6643_v55 }
 0x71b   :  { %2122 = vmatpush1.bf16.msra.mxu0 %v6644_v25  ;;  %2163 = vmatpush1.bf16.msra.mxu1 %v6645_v3 }
 0x71c   :  { %2123 = vmatprep.subr.bf16.mxu0 %v6646_v56  ;;  %2164 = vmatprep.subr.bf16.mxu1 %v6647_v63 }
 0x71f   :  { %2124 = vmatpush1.bf16.msra.mxu0 %v5272_v7  ;;  %2165 = vmatpush1.bf16.msra.mxu1 %v5278_v42 }
 0x720   :  { %2125 = vmatprep.subr.bf16.mxu0 %v5284_v14  ;;  %2166 = vmatprep.subr.bf16.mxu1 %v5290_v41 }
 0x723   :  { %2126 = vmatpush1.bf16.msra.mxu0 %v5421_v50  ;;  %2167 = vmatpush1.bf16.msra.mxu1 %v5427_v62 }
 0x724   :  { %2127 = vmatprep.subr.bf16.mxu0 %v5433_v38  ;;  %2168 = vmatprep.subr.bf16.mxu1 %v5439_v10 }
 0x727   :  { %2128 = vmatpush1.bf16.msra.mxu0 %v5445_v11  ;;  %2169 = vmatpush1.bf16.msra.mxu1 %v5451_v12 }
 0x728   :  { %2251 = vmatprep.subr.bf16.mxu0 %v5457_v15  ;;  %2292 = vmatprep.subr.bf16.mxu1 %v5463_v16 }
 0x72a   :  { %2146 = vmatmul.mubr.bf16.vlgmr.msra.gmra.mrb[48].mxu0 %v2003_v27  ;;  %2187 = vmatmul.mubr.bf16.vlgmr.msra.gmra.mrb[48].mxu1 %v2003_v27  ;;  %v5595_v27 = vld [vmem:[%s6022_s2 + $0xa8] ss:$16 sps:$4 sm:$0xff]  }
 0x72b   :  { %2252 = vmatpush1.bf16.msra.mxu0 %v5469_v18  ;;  %2293 = vmatpush1.bf16.msra.mxu1 %v5475_v34  ;;  %6662 = vst [vmem:[#allocation40_spill] sm:$0xff] %v5595_v27 }
 0x72c   :  { %2253 = vmatprep.subr.bf16.mxu0 %v5481_v19  ;;  %2294 = vmatprep.subr.bf16.mxu1 %v5487_v20 }
 0x72f   :  { %2254 = vmatpush1.bf16.msra.mxu0 %v5493_v21  ;;  %2295 = vmatpush1.bf16.msra.mxu1 %v5499_v22 }
 0x730   :  { %2255 = vmatprep.subr.bf16.mxu0 %v5505_v52  ;;  %2296 = vmatprep.subr.bf16.mxu1 %v5511_v28 }
 0x733   :  { %2256 = vmatpush1.bf16.msra.mxu0 %v5517_v29  ;;  %2297 = vmatpush1.bf16.msra.mxu1 %v5523_v30 }
 0x734   :  { %2257 = vmatprep.subr.bf16.mxu0 %v5529_v31  ;;  %2298 = vmatprep.subr.bf16.mxu1 %v5535_v33 }
 0x737   :  { %2258 = vmatpush1.bf16.msra.mxu0 %v5541_v35  ;;  %2299 = vmatpush1.bf16.msra.mxu1 %v5547_v37 }
 0x738   :  { %2259 = vmatprep.subr.bf16.mxu0 %v5553_v23  ;;  %2300 = vmatprep.subr.bf16.mxu1 %v5559_v51 }
 0x73b   :  { %2260 = vmatpush1.bf16.msra.mxu0 %v5565_v61  ;;  %2301 = vmatpush1.bf16.msra.mxu1 %v5571_v59 }
 0x73c   :  { %2261 = vmatprep.subr.bf16.mxu0 %v5577_v58  ;;  %2302 = vmatprep.subr.bf16.mxu1 %v5583_v53  ;;  %v5601_v58 = vld [vmem:[%s6022_s2 + $0xc4] ss:$16 sps:$4 sm:$0xff]   ;;  %v5607_v53 = vld [vmem:[%s6022_s2 + $0xcc] ss:$16 sps:$4 sm:$0xff]  }
 0x73d   :  { %6663 = vst [vmem:[#allocation41_spill] sm:$0xff] %v5601_v58  ;;  %6664 = vst [vmem:[#allocation42_spill] sm:$0xff] %v5607_v53 }
 0x73f   :  { %2262 = vmatpush1.bf16.msra.mxu0 %v5589_v26  ;;  %2303 = vmatpush1.bf16.msra.mxu1 %v5595_v27  ;;  %v5613_v26 = vld [vmem:[%s6022_s2 + $0xc0] ss:$16 sps:$4 sm:$0xff]   ;;  %v5619_v27 = vld [vmem:[%s6022_s2 + $0xc8] ss:$16 sps:$4 sm:$0xff]  }
 0x740   :  { %2263 = vmatprep.subr.bf16.mxu0 %v5601_v58  ;;  %2304 = vmatprep.subr.bf16.mxu1 %v5607_v53  ;;  %6665 = vst [vmem:[#allocation20_spill] sm:$0xff] %v5613_v26  ;;  %6666 = vst [vmem:[#allocation21_spill] sm:$0xff] %v5619_v27  ;;  %v5625_v58 = vld [vmem:[%s6022_s2 + $0xe4] ss:$16 sps:$4 sm:$0xff]   ;;  %v5631_v53 = vld [vmem:[%s6022_s2 + $0xec] ss:$16 sps:$4 sm:$0xff]  }
 0x741   :  { %6667 = vst [vmem:[#allocation43_spill] sm:$0xff] %v5625_v58  ;;  %6668 = vst [vmem:[#allocation44_spill] sm:$0xff] %v5631_v53 }
 0x743   :  { %2264 = vmatpush1.bf16.msra.mxu0 %v5613_v26  ;;  %2305 = vmatpush1.bf16.msra.mxu1 %v5619_v27  ;;  %v5637_v26 = vld [vmem:[%s6022_s2 + $0xe0] ss:$16 sps:$4 sm:$0xff]   ;;  %v5643_v27 = vld [vmem:[%s6022_s2 + $0xe8] ss:$16 sps:$4 sm:$0xff]  }
 0x744   :  { %2265 = vmatprep.subr.bf16.mxu0 %v5625_v58  ;;  %2306 = vmatprep.subr.bf16.mxu1 %v5631_v53  ;;  %6669 = vst [vmem:[#allocation45_spill] sm:$0xff] %v5637_v26  ;;  %6670 = vst [vmem:[#allocation46_spill] sm:$0xff] %v5643_v27  ;;  %v5649_v58 = vld [vmem:[%s6022_s2 + $0x104] ss:$16 sps:$4 sm:$0xff]   ;;  %v5655_v53 = vld [vmem:[%s6022_s2 + $0x10c] ss:$16 sps:$4 sm:$0xff]  }
 0x745   :  { %6671 = vst [vmem:[#allocation47_spill] sm:$0xff] %v5649_v58  ;;  %6672 = vst [vmem:[#allocation48_spill] sm:$0xff] %v5655_v53 }
 0x747   :  { %2266 = vmatpush1.bf16.msra.mxu0 %v5637_v26  ;;  %2307 = vmatpush1.bf16.msra.mxu1 %v5643_v27  ;;  %v5661_v26 = vld [vmem:[%s6022_s2 + $0x100] ss:$16 sps:$4 sm:$0xff]   ;;  %v5667_v27 = vld [vmem:[%s6022_s2 + $0x108] ss:$16 sps:$4 sm:$0xff]  }
 0x748   :  { %2267 = vmatprep.subr.bf16.mxu0 %v5649_v58  ;;  %2308 = vmatprep.subr.bf16.mxu1 %v5655_v53  ;;  %6673 = vst [vmem:[#allocation49_spill] sm:$0xff] %v5661_v26  ;;  %6674 = vst [vmem:[#allocation50_spill] sm:$0xff] %v5667_v27  ;;  %v5673_v58 = vld [vmem:[%s6022_s2 + $0x124] ss:$16 sps:$4 sm:$0xff]   ;;  %v5679_v53 = vld [vmem:[%s6022_s2 + $0x12c] ss:$16 sps:$4 sm:$0xff]  }
 0x749   :  { %6675 = vst [vmem:[#allocation51_spill] sm:$0xff] %v5673_v58  ;;  %6676 = vst [vmem:[#allocation52_spill] sm:$0xff] %v5679_v53 }
 0x74b   :  { %2268 = vmatpush1.bf16.msra.mxu0 %v5661_v26  ;;  %2309 = vmatpush1.bf16.msra.mxu1 %v5667_v27  ;;  %v5685_v26 = vld [vmem:[%s6022_s2 + $0x120] ss:$16 sps:$4 sm:$0xff]   ;;  %v5691_v27 = vld [vmem:[%s6022_s2 + $0x128] ss:$16 sps:$4 sm:$0xff]  }
 0x74c   :  { %2269 = vmatprep.subr.bf16.mxu0 %v5673_v58  ;;  %2310 = vmatprep.subr.bf16.mxu1 %v5679_v53  ;;  %6677 = vst [vmem:[#allocation53_spill] sm:$0xff] %v5685_v26  ;;  %6678 = vst [vmem:[#allocation54_spill] sm:$0xff] %v5691_v27  ;;  %v5697_v58 = vld [vmem:[%s6022_s2 + $0x144] ss:$16 sps:$4 sm:$0xff]   ;;  %v5703_v53 = vld [vmem:[%s6022_s2 + $0x14c] ss:$16 sps:$4 sm:$0xff]  }
 0x74d   :  { %6679 = vst [vmem:[#allocation55_spill] sm:$0xff] %v5697_v58  ;;  %6680 = vst [vmem:[#allocation56_spill] sm:$0xff] %v5703_v53 }
 0x74f   :  { %2270 = vmatpush1.bf16.msra.mxu0 %v5685_v26  ;;  %2311 = vmatpush1.bf16.msra.mxu1 %v5691_v27  ;;  %v5709_v26 = vld [vmem:[%s6022_s2 + $0x140] ss:$16 sps:$4 sm:$0xff]   ;;  %v5715_v27 = vld [vmem:[%s6022_s2 + $0x148] ss:$16 sps:$4 sm:$0xff]  }
 0x750   :  { %2271 = vmatprep.subr.bf16.mxu0 %v5697_v58  ;;  %2312 = vmatprep.subr.bf16.mxu1 %v5703_v53  ;;  %6681 = vst [vmem:[#allocation57_spill] sm:$0xff] %v5709_v26  ;;  %6682 = vst [vmem:[#allocation58_spill] sm:$0xff] %v5715_v27  ;;  %v5721_v58 = vld [vmem:[%s6022_s2 + $0x164] ss:$16 sps:$4 sm:$0xff]   ;;  %v5727_v53 = vld [vmem:[%s6022_s2 + $0x16c] ss:$16 sps:$4 sm:$0xff]  }
 0x751   :  { %6683 = vst [vmem:[#allocation59_spill] sm:$0xff] %v5721_v58  ;;  %6684 = vst [vmem:[#allocation12_spill] sm:$0xff] %v5727_v53 }
 0x753   :  { %2272 = vmatpush1.bf16.msra.mxu0 %v5709_v26  ;;  %2313 = vmatpush1.bf16.msra.mxu1 %v5715_v27  ;;  %v5733_v26 = vld [vmem:[%s6022_s2 + $0x160] ss:$16 sps:$4 sm:$0xff]   ;;  %v5739_v27 = vld [vmem:[%s6022_s2 + $0x168] ss:$16 sps:$4 sm:$0xff]  }
 0x754   :  { %2273 = vmatprep.subr.bf16.mxu0 %v5721_v58  ;;  %2314 = vmatprep.subr.bf16.mxu1 %v5727_v53  ;;  %6685 = vst [vmem:[#allocation13_spill] sm:$0xff] %v5733_v26  ;;  %6686 = vst [vmem:[#allocation14_spill] sm:$0xff] %v5739_v27  ;;  %v5745_v58 = vld [vmem:[%s6022_s2 + $0x184] ss:$16 sps:$4 sm:$0xff]   ;;  %v5751_v53 = vld [vmem:[%s6022_s2 + $0x18c] ss:$16 sps:$4 sm:$0xff]  }
 0x755   :  { %6687 = vst [vmem:[#allocation15_spill] sm:$0xff] %v5745_v58  ;;  %6688 = vst [vmem:[#allocation16_spill] sm:$0xff] %v5751_v53 }
 0x757   :  { %2274 = vmatpush1.bf16.msra.mxu0 %v5733_v26  ;;  %2315 = vmatpush1.bf16.msra.mxu1 %v5739_v27  ;;  %v5757_v26 = vld [vmem:[%s6022_s2 + $0x180] ss:$16 sps:$4 sm:$0xff]   ;;  %v5763_v27 = vld [vmem:[%s6022_s2 + $0x188] ss:$16 sps:$4 sm:$0xff]  }
 0x758   :  { %2275 = vmatprep.subr.bf16.mxu0 %v5745_v58  ;;  %2316 = vmatprep.subr.bf16.mxu1 %v5751_v53  ;;  %6689 = vst [vmem:[#allocation17_spill] sm:$0xff] %v5757_v26  ;;  %6690 = vst [vmem:[#allocation18_spill] sm:$0xff] %v5763_v27  ;;  %v5769_v58 = vld [vmem:[%s6022_s2 + $0x1a4] ss:$16 sps:$4 sm:$0xff]   ;;  %v5775_v53 = vld [vmem:[%s6022_s2 + $0x1ac] ss:$16 sps:$4 sm:$0xff]  }
 0x759   :  { %6691 = vst [vmem:[#allocation19_spill] sm:$0xff] %v5769_v58  ;;  %6692 = vst [vmem:[#allocation61_spill] sm:$0xff] %v5775_v53 }
 0x75b   :  { %2276 = vmatpush1.bf16.msra.mxu0 %v5757_v26  ;;  %2317 = vmatpush1.bf16.msra.mxu1 %v5763_v27  ;;  %v5781_v26 = vld [vmem:[%s6022_s2 + $0x1a0] ss:$16 sps:$4 sm:$0xff]   ;;  %v5787_v27 = vld [vmem:[%s6022_s2 + $0x1a8] ss:$16 sps:$4 sm:$0xff]  }
 0x75c   :  { %2277 = vmatprep.subr.bf16.mxu0 %v5769_v58  ;;  %2318 = vmatprep.subr.bf16.mxu1 %v5775_v53  ;;  %6693 = vst [vmem:[#allocation62_spill] sm:$0xff] %v5781_v26  ;;  %6694 = vst [vmem:[#allocation63_spill] sm:$0xff] %v5787_v27  ;;  %v5793_v58 = vld [vmem:[%s6022_s2 + $0x1c4] ss:$16 sps:$4 sm:$0xff]   ;;  %v5799_v53 = vld [vmem:[%s6022_s2 + $0x1cc] ss:$16 sps:$4 sm:$0xff]  }
 0x75d   :  { %6695 = vst [vmem:[#allocation64_spill] sm:$0xff] %v5793_v58  ;;  %6696 = vst [vmem:[#allocation65_spill] sm:$0xff] %v5799_v53 }
 0x75f   :  { %2278 = vmatpush1.bf16.msra.mxu0 %v5781_v26  ;;  %2319 = vmatpush1.bf16.msra.mxu1 %v5787_v27  ;;  %v5805_v26 = vld [vmem:[%s6022_s2 + $0x1c0] ss:$16 sps:$4 sm:$0xff]   ;;  %v5811_v27 = vld [vmem:[%s6022_s2 + $0x1c8] ss:$16 sps:$4 sm:$0xff]  }
 0x760   :  { %2279 = vmatprep.subr.bf16.mxu0 %v5793_v58  ;;  %2320 = vmatprep.subr.bf16.mxu1 %v5799_v53  ;;  %6697 = vst [vmem:[#allocation66_spill] sm:$0xff] %v5805_v26  ;;  %6698 = vst [vmem:[#allocation22_spill] sm:$0xff] %v5811_v27  ;;  %v5817_v58 = vld [vmem:[%s6022_s2 + $0x1e4] ss:$16 sps:$4 sm:$0xff]   ;;  %v5823_v53 = vld [vmem:[%s6022_s2 + $0x1ec] ss:$16 sps:$4 sm:$0xff]  }
 0x761   :  { %6699 = vst [vmem:[#allocation23_spill] sm:$0xff] %v5817_v58  ;;  %6700 = vst [vmem:[#allocation24_spill] sm:$0xff] %v5823_v53 }
 0x763   :  { %2280 = vmatpush1.bf16.msra.mxu0 %v5805_v26  ;;  %2321 = vmatpush1.bf16.msra.mxu1 %v5811_v27  ;;  %v5829_v26 = vld [vmem:[%s6022_s2 + $0x1e0] ss:$16 sps:$4 sm:$0xff]   ;;  %v5835_v27 = vld [vmem:[%s6022_s2 + $0x1e8] ss:$16 sps:$4 sm:$0xff]  }
 0x764   :  { %2281 = vmatprep.subr.bf16.mxu0 %v5817_v58  ;;  %2322 = vmatprep.subr.bf16.mxu1 %v5823_v53  ;;  %6701 = vst [vmem:[#allocation25_spill] sm:$0xff] %v5829_v26  ;;  %6702 = vst [vmem:[#allocation26_spill] sm:$0xff] %v5835_v27 }
 0x767   :  { %2282 = vmatpush1.bf16.msra.mxu0 %v5829_v26  ;;  %2323 = vmatpush1.bf16.msra.mxu1 %v5835_v27 }
 0x768   :  { %2359 = vmatprep.subr.bf16.mxu0 %v5366_v57  ;;  %2400 = vmatprep.subr.bf16.mxu1 %v5372_v24 }
 0x7dd   :  { %v2039_v58 = vpop.f32.mrb[44].mxu0  ;;  %v2080_v53 = vpop.f32.mrb[44].mxu1 }
 0x7de   :  { %v2040_v59 = vadd.f32 %v2039_v58, %v6640_v9  ;;  %v2041_v61 = vpop.f32.mrb[45].mxu0  ;;  %v2082_v51 = vpop.f32.mrb[45].mxu1  ;;  %v2081_v24 = vadd.f32 %v2080_v53, %v6482_v36 }
 0x7df   :  { %v2042_v23 = vadd.f32 %v2041_v61, %v4298_v39  ;;  %v2043_v26 = vpop.f32.mrb[46].mxu0  ;;  %v2084_v37 = vpop.f32.mrb[46].mxu1  ;;  %v2083_v57 = vadd.f32 %v2082_v51, %v6481_v32 }
 0x7e0   :  { %v2872_v35 = vmul.f32 -1.442695, %v2040_v59  ;;  %v2044_v33 = vpop.f32.mrb[47].mxu0  ;;  %v2085_v31 = vpop.f32.mrb[47].mxu1 }
 0x7e1   :  { %v2873_v30 = vmul.f32 -1.442695, %v2042_v23  ;;  %v2874_v27 = vmul.f32 -1.442695, %v2083_v57 }
 0x7e2   :  { %3260 = vpow2.f32 %v2872_v35 }
 0x7e3   :  { %3262 = vpow2.f32 %v2873_v30 }
 0x7e4   :  { %3264 = vpow2.f32 %v2874_v27 }
 0x7e5   :  { %3266 = vtanh.f32 %v2081_v24 }
 0x7ec   :  { %v3261_v29 = vpop.eup %3260 }
 0x7ed   :  { %v3263_v28 = vpop.eup %3262  ;;  %v2090_v58 = vadd.f32 1.0, %v3261_v29 }
 0x7ee   :  { %v2096_v9 = vadd.f32 1.0, %v3263_v28  ;;  %v3265_v37 = vpop.eup %3264 }
 0x7ef   :  { %3268 = vrcp.f32 %v2090_v58  ;;  %v3267_v61 = vpop.eup %3266  ;;  %v2103_v35 = vadd.f32 1.0, %v3265_v37 }
 0x7f0   :  { %3270 = vrcp.f32 %v2096_v9 }
 0x7f1   :  { %3272 = vrcp.f32 %v2103_v35 }
 0x7f9   :  { %v3269_v33 = vpop.eup %3268 }
 0x7fa   :  { %v3271_v31 = vpop.eup %3270  ;;  %v2107_v23 = vmul.f32 %v3269_v33, %v3267_v61 }
 0x7fb   :  { %v2106_v30 = vmul.f32 %v3271_v31, %v5380_v1  ;;  %v2875_v1 = vld [vmem:[%s6020_s0 + $0x30] sm:$0xff] }
 0x7fd   :  { %v2147_v51 = vpop.f32.mrb[48].mxu0  ;;  %v2188_v59 = vpop.f32.mrb[48].mxu1  ;;  %v5845_v26 = vadd.f32 %v2107_v23, %v2106_v30 }
 0x7fe   :  { %v2149_v53 = vpop.f32.mrb[49].mxu0  ;;  %v2190_v29 = vpop.f32.mrb[49].mxu1 }
 0x7ff   :  { %v2199_v27 = vcombine.low %v2147_v51, %v2149_v53  ;;  %v2200_v57 = vcombine.low %v2188_v59, %v2190_v29  ;;  %v2151_v28 = vpop.f32.mrb[50].mxu0  ;;  %v2192_v24 = vpop.f32.mrb[50].mxu1  ;;  %3274 = vtanh.f32 %v5845_v26 }
 0x800   :  { %v2152_v9 = vpop.f32.mrb[51].mxu0  ;;  %v2193_v58 = vpop.f32.mrb[51].mxu1 }
 0x801   :  { %v2207_v61 = vrot.slane %v2199_v27, %v4183_v2  ;;  %v2214_v37 = vrot.slane %v2200_v57, %v4183_v2  ;;  %v3273_v30 = vpop.eup %3272 }
 0x803   :  { %v2215_v33 = vcombine.low %v2207_v61, %v2214_v37 }
 0x805   :  { %v2217_v31 = vadd.f32 %v2875_v1, %v2215_v33 }
 0x807   :  { %v2876_v23 = vmul.f32 -1.442695, %v2217_v31  ;;  %v2225_v35 = vrot.slane %v2217_v31, 2  ;;  %v2236_v28 = vrot.slane %v2217_v31, 6  ;;  %v2233_v24 = vrot.slane %v2217_v31, 4 }
 0x809   :  { %v3275_v51 = vpop.eup %3274  ;;  %3276 = vpow2.f32 %v2876_v23  ;;  %v2877_v59 = vmul.f32 -1.442695, %v2225_v35  ;;  %v2878_v27 = vmul.f32 -1.442695, %v2236_v28 }
 0x80a   :  { %v2110_v53 = vmul.f32 %v3275_v51, %v3273_v30 }
 0x80b   :  { %3278 = vpow2.f32 %v2877_v59 }
 0x80c   :  { %v2250_v29 = vpack.c.bf16 %v2110_v53, %v2110_v53  ;;  %3280 = vpow2.f32 %v2878_v27  ;;  %v6744_v27 = vld [vmem:[#allocation17_spill] sm:$0xff] }
 0x80e   :  { %2283 = vmatprep.mubr.bf16.mxu0 %v2250_v29  ;;  %2324 = vmatprep.mubr.bf16.mxu1 %v2250_v29 }
 0x813   :  { %v3277_v57 = vpop.eup %3276 }
 0x814   :  { %v2221_v9 = vadd.f32 1.0, %v3277_v57  ;;  %v6745_v57 = vld [vmem:[#allocation18_spill] sm:$0xff] }
 0x815   :  { %v3279_v58 = vpop.eup %3278 }
 0x816   :  { %3282 = vrcp.f32 %v2221_v9  ;;  %v2230_v61 = vadd.f32 1.0, %v3279_v58  ;;  %v3281_v37 = vpop.eup %3280  ;;  %v6747_v9 = vld [vmem:[#allocation61_spill] sm:$0xff]  ;;  %v6748_v58 = vld [vmem:[#allocation62_spill] sm:$0xff] }
 0x817   :  { %3284 = vtanh.f32 %v2233_v24  ;;  %v2241_v35 = vadd.f32 1.0, %v3281_v37  ;;  %v6746_v24 = vld [vmem:[#allocation19_spill] sm:$0xff]  ;;  %v6750_v37 = vld [vmem:[#allocation64_spill] sm:$0xff] }
 0x818   :  { %3286 = vrcp.f32 %v2230_v61  ;;  %v6749_v61 = vld [vmem:[#allocation63_spill] sm:$0xff] }
 0x819   :  { %3288 = vrcp.f32 %v2241_v35  ;;  %v6754_v35 = vld [vmem:[#allocation23_spill] sm:$0xff] }
 0x820   :  { %v3283_v1 = vpop.eup %3282 }
 0x821   :  { %v3285_v33 = vpop.eup %3284 }
 0x822   :  { %v3287_v23 = vpop.eup %3286  ;;  %v2245_v51 = vmul.f32 %v3285_v33, %v3283_v1  ;;  %v6751_v1 = vld [vmem:[#allocation65_spill] sm:$0xff]  ;;  %v6752_v33 = vld [vmem:[#allocation66_spill] sm:$0xff] }
 0x823   :  { %v2244_v30 = vmul.f32 %v3287_v23, %v5389_v60  ;;  %v3289_v31 = vpop.eup %3288  ;;  %v6721_v60 = vld [vmem:[#allocation21_spill] sm:$0xff]  ;;  %v6753_v23 = vld [vmem:[#allocation22_spill] sm:$0xff] }
 0x825   :  { %v5854_v59 = vadd.f32 %v2245_v51, %v2244_v30  ;;  %v6755_v30 = vld [vmem:[#allocation24_spill] sm:$0xff]  ;;  %v6756_v51 = vld [vmem:[#allocation25_spill] sm:$0xff] }
 0x827   :  { %3290 = vtanh.f32 %v5854_v59 }
 0x831   :  { %v3291_v53 = vpop.eup %3290 }
 0x832   :  { %v2248_v29 = vmul.f32 %v3291_v53, %v3289_v31  ;;  %v6757_v31 = vld [vmem:[#allocation26_spill] sm:$0xff]  ;;  %v6758_v53 = vmov 0.0  }
 0x834   :  { %v2249_v28 = vpack.c.bf16 %v2248_v29, %v2248_v29 }
 0x836   :  { %2284 = vmatmul.mubr.bf16.vlgmr.msra.gmra.mrb[52].mxu0 %v2249_v28  ;;  %2325 = vmatmul.mubr.bf16.vlgmr.msra.gmra.mrb[52].mxu1 %v2249_v28 }
 0x837   :  { %2360 = vmatpush1.bf16.msra.mxu0 %v5150_v5  ;;  %2401 = vmatpush1.bf16.msra.mxu1 %v5156_v13  ;;  %v6704_v5 = vld [vmem:[#allocation9_spill] sm:$0xff]  ;;  %v6705_v13 = vld [vmem:[#allocation10_spill] sm:$0xff] }
 0x838   :  { %2361 = vmatprep.subr.bf16.mxu0 %v5162_v43  ;;  %2402 = vmatprep.subr.bf16.mxu1 %v5168_v46  ;;  %v6706_v43 = vld [vmem:[#allocation60_spill] sm:$0xff]  ;;  %v6707_v46 = vld [vmem:[#allocation30_spill] sm:$0xff] }
 0x839   :  { %2391 = vmatprep.mubr.bf16.mxu0 %v6386_v54  ;;  %2432 = vmatprep.mubr.bf16.mxu1 %v6386_v54  ;;  %v6703_v54 = vld [vmem:[#allocation29_spill] sm:$0xff] }
 0x83b   :  { %2362 = vmatpush1.bf16.msra.mxu0 %v5176_v48  ;;  %2403 = vmatpush1.bf16.msra.mxu1 %v5182_v44  ;;  %v6708_v48 = vld [vmem:[#allocation31_spill] sm:$0xff]  ;;  %v6709_v44 = vld [vmem:[#allocation32_spill] sm:$0xff] }
 0x83c   :  { %2363 = vmatprep.subr.bf16.mxu0 %v5188_v4  ;;  %2404 = vmatprep.subr.bf16.mxu1 %v5194_v17  ;;  %v6710_v4 = vld [vmem:[#allocation33_spill] sm:$0xff]  ;;  %v6711_v17 = vld [vmem:[#allocation34_spill] sm:$0xff] }
 0x83f   :  { %2364 = vmatpush1.bf16.msra.mxu0 %v5200_v49  ;;  %2405 = vmatpush1.bf16.msra.mxu1 %v5206_v47  ;;  %v6712_v49 = vld [vmem:[#allocation35_spill] sm:$0xff]  ;;  %v6713_v47 = vld [vmem:[#allocation36_spill] sm:$0xff] }
 0x840   :  { %2365 = vmatprep.subr.bf16.mxu0 %v5212_v6  ;;  %2406 = vmatprep.subr.bf16.mxu1 %v5218_v8  ;;  %v6714_v6 = vld [vmem:[#allocation37_spill] sm:$0xff]  ;;  %v6715_v8 = vld [vmem:[#allocation38_spill] sm:$0xff] }
 0x843   :  { %2366 = vmatpush1.bf16.msra.mxu0 %v5224_v45  ;;  %2407 = vmatpush1.bf16.msra.mxu1 %v6641_v40  ;;  %v6716_v45 = vld [vmem:[#allocation39_spill] sm:$0xff] }
 0x844   :  { %2367 = vmatprep.subr.bf16.mxu0 %v6642_v0  ;;  %2408 = vmatprep.subr.bf16.mxu1 %v6643_v55  ;;  %v6722_v40 = vld [vmem:[#allocation43_spill] sm:$0xff]  ;;  %v6723_v0 = vld [vmem:[#allocation44_spill] sm:$0xff]  ;;  %v6724_v55 = vld [vmem:[#allocation45_spill] sm:$0xff] }
 0x847   :  { %2368 = vmatpush1.bf16.msra.mxu0 %v6644_v25  ;;  %2409 = vmatpush1.bf16.msra.mxu1 %v6645_v3  ;;  %v6725_v25 = vld [vmem:[#allocation46_spill] sm:$0xff]  ;;  %v6726_v3 = vld [vmem:[#allocation47_spill] sm:$0xff] }
 0x848   :  { %2369 = vmatprep.subr.bf16.mxu0 %v6646_v56  ;;  %2410 = vmatprep.subr.bf16.mxu1 %v6647_v63  ;;  %v6727_v56 = vld [vmem:[#allocation48_spill] sm:$0xff]  ;;  %v6728_v63 = vld [vmem:[#allocation49_spill] sm:$0xff] }
 0x84b   :  { %2370 = vmatpush1.bf16.msra.mxu0 %v5272_v7  ;;  %2411 = vmatpush1.bf16.msra.mxu1 %v5278_v42  ;;  %v6717_v42 = vld [vmem:[#allocation40_spill] sm:$0xff] }
 0x84c   :  { %2371 = vmatprep.subr.bf16.mxu0 %v5284_v14  ;;  %2412 = vmatprep.subr.bf16.mxu1 %v5290_v41  ;;  %v6718_v14 = vld [vmem:[#allocation41_spill] sm:$0xff]  ;;  %v6719_v41 = vld [vmem:[#allocation42_spill] sm:$0xff]  ;;  %v6720_v7 = vld [vmem:[#allocation20_spill] sm:$0xff] }
 0x84f   :  { %2372 = vmatpush1.bf16.msra.mxu0 %v5421_v50  ;;  %2413 = vmatpush1.bf16.msra.mxu1 %v5427_v62  ;;  %v6729_v50 = vld [vmem:[#allocation50_spill] sm:$0xff]  ;;  %v6730_v62 = vld [vmem:[#allocation51_spill] sm:$0xff] }
 0x850   :  { %2373 = vmatprep.subr.bf16.mxu0 %v5433_v38  ;;  %2414 = vmatprep.subr.bf16.mxu1 %v5439_v10  ;;  %v6731_v38 = vld [vmem:[#allocation52_spill] sm:$0xff]  ;;  %v6732_v10 = vld [vmem:[#allocation53_spill] sm:$0xff] }
 0x853   :  { %2374 = vmatpush1.bf16.msra.mxu0 %v5445_v11  ;;  %2415 = vmatpush1.bf16.msra.mxu1 %v5451_v12  ;;  %v6733_v11 = vld [vmem:[#allocation54_spill] sm:$0xff]  ;;  %v6734_v12 = vld [vmem:[#allocation55_spill] sm:$0xff] }
 0x854   :  { %2497 = vmatprep.subr.bf16.mxu0 %v5457_v15  ;;  %2538 = vmatprep.subr.bf16.mxu1 %v5463_v16  ;;  %v6735_v15 = vld [vmem:[#allocation56_spill] sm:$0xff]  ;;  %v6736_v16 = vld [vmem:[#allocation57_spill] sm:$0xff] }
 0x856   :  { %2392 = vmatmul.mubr.bf16.vlgmr.msra.gmra.mrb[56].mxu0 %v2249_v28  ;;  %2433 = vmatmul.mubr.bf16.vlgmr.msra.gmra.mrb[56].mxu1 %v2249_v28 }
 0x857   :  { %2498 = vmatpush1.bf16.msra.mxu0 %v5469_v18  ;;  %2539 = vmatpush1.bf16.msra.mxu1 %v5475_v34  ;;  %v6737_v18 = vld [vmem:[#allocation58_spill] sm:$0xff]  ;;  %v6738_v34 = vld [vmem:[#allocation59_spill] sm:$0xff] }
 0x858   :  { %2499 = vmatprep.subr.bf16.mxu0 %v5481_v19  ;;  %2540 = vmatprep.subr.bf16.mxu1 %v5487_v20  ;;  %v6739_v19 = vld [vmem:[#allocation12_spill] sm:$0xff]  ;;  %v6740_v20 = vld [vmem:[#allocation13_spill] sm:$0xff] }
 0x85b   :  { %2500 = vmatpush1.bf16.msra.mxu0 %v5493_v21  ;;  %2541 = vmatpush1.bf16.msra.mxu1 %v5499_v22  ;;  %v6741_v21 = vld [vmem:[#allocation14_spill] sm:$0xff]  ;;  %v6742_v22 = vld [vmem:[#allocation15_spill] sm:$0xff] }
 0x85c   :  { %2501 = vmatprep.subr.bf16.mxu0 %v5505_v52  ;;  %2542 = vmatprep.subr.bf16.mxu1 %v6703_v54  ;;  %v6743_v52 = vld [vmem:[#allocation16_spill] sm:$0xff]  ;;  %v6759_v54 = vld [vmem:[#allocation11_spill] sm:$0xff] }
 0x85f   :  { %2502 = vmatpush1.bf16.msra.mxu0 %v6704_v5  ;;  %2543 = vmatpush1.bf16.msra.mxu1 %v6705_v13 }
 0x860   :  { %2503 = vmatprep.subr.bf16.mxu0 %v6706_v43  ;;  %2544 = vmatprep.subr.bf16.mxu1 %v6707_v46 }
 0x863   :  { %2504 = vmatpush1.bf16.msra.mxu0 %v6708_v48  ;;  %2545 = vmatpush1.bf16.msra.mxu1 %v6709_v44 }
 0x864   :  { %2505 = vmatprep.subr.bf16.mxu0 %v6710_v4  ;;  %2546 = vmatprep.subr.bf16.mxu1 %v6711_v17 }
 0x867   :  { %2506 = vmatpush1.bf16.msra.mxu0 %v6712_v49  ;;  %2547 = vmatpush1.bf16.msra.mxu1 %v6713_v47 }
 0x868   :  { %2507 = vmatprep.subr.bf16.mxu0 %v6714_v6  ;;  %2548 = vmatprep.subr.bf16.mxu1 %v6715_v8 }
 0x86b   :  { %2508 = vmatpush1.bf16.msra.mxu0 %v6716_v45  ;;  %2549 = vmatpush1.bf16.msra.mxu1 %v6717_v42 }
 0x86c   :  { %2509 = vmatprep.subr.bf16.mxu0 %v6718_v14  ;;  %2550 = vmatprep.subr.bf16.mxu1 %v6719_v41 }
 0x86f   :  { %2510 = vmatpush1.bf16.msra.mxu0 %v6720_v7  ;;  %2551 = vmatpush1.bf16.msra.mxu1 %v6721_v60 }
 0x870   :  { %2511 = vmatprep.subr.bf16.mxu0 %v6722_v40  ;;  %2552 = vmatprep.subr.bf16.mxu1 %v6723_v0 }
 0x873   :  { %2512 = vmatpush1.bf16.msra.mxu0 %v6724_v55  ;;  %2553 = vmatpush1.bf16.msra.mxu1 %v6725_v25 }
 0x874   :  { %2513 = vmatprep.subr.bf16.mxu0 %v6726_v3  ;;  %2554 = vmatprep.subr.bf16.mxu1 %v6727_v56 }
 0x877   :  { %2514 = vmatpush1.bf16.msra.mxu0 %v6728_v63  ;;  %2555 = vmatpush1.bf16.msra.mxu1 %v6729_v50 }
 0x878   :  { %2515 = vmatprep.subr.bf16.mxu0 %v6730_v62  ;;  %2556 = vmatprep.subr.bf16.mxu1 %v6731_v38 }
 0x87b   :  { %2516 = vmatpush1.bf16.msra.mxu0 %v6732_v10  ;;  %2557 = vmatpush1.bf16.msra.mxu1 %v6733_v11 }
 0x87c   :  { %2517 = vmatprep.subr.bf16.mxu0 %v6734_v12  ;;  %2558 = vmatprep.subr.bf16.mxu1 %v6735_v15 }
 0x87f   :  { %2518 = vmatpush1.bf16.msra.mxu0 %v6736_v16  ;;  %2559 = vmatpush1.bf16.msra.mxu1 %v6737_v18 }
 0x880   :  { %2519 = vmatprep.subr.bf16.mxu0 %v6738_v34  ;;  %2560 = vmatprep.subr.bf16.mxu1 %v6739_v19 }
 0x883   :  { %2520 = vmatpush1.bf16.msra.mxu0 %v6740_v20  ;;  %2561 = vmatpush1.bf16.msra.mxu1 %v6741_v21 }
 0x884   :  { %2521 = vmatprep.subr.bf16.mxu0 %v6742_v22  ;;  %2562 = vmatprep.subr.bf16.mxu1 %v6743_v52 }
 0x887   :  { %2522 = vmatpush1.bf16.msra.mxu0 %v6744_v27  ;;  %2563 = vmatpush1.bf16.msra.mxu1 %v6745_v57 }
 0x888   :  { %2523 = vmatprep.subr.bf16.mxu0 %v6746_v24  ;;  %2564 = vmatprep.subr.bf16.mxu1 %v6747_v9 }
 0x88b   :  { %2524 = vmatpush1.bf16.msra.mxu0 %v6748_v58  ;;  %2565 = vmatpush1.bf16.msra.mxu1 %v6749_v61 }
 0x88c   :  { %2525 = vmatprep.subr.bf16.mxu0 %v6750_v37  ;;  %2566 = vmatprep.subr.bf16.mxu1 %v6751_v1 }
 0x88f   :  { %2526 = vmatpush1.bf16.msra.mxu0 %v6752_v33  ;;  %2567 = vmatpush1.bf16.msra.mxu1 %v6753_v23 }
 0x890   :  { %2527 = vmatprep.subr.bf16.mxu0 %v6754_v35  ;;  %2568 = vmatprep.subr.bf16.mxu1 %v6755_v30 }
 0x893   :  { %2528 = vmatpush1.bf16.msra.mxu0 %v6756_v51  ;;  %2569 = vmatpush1.bf16.msra.mxu1 %v6757_v31 }
 0x894   :  { %2907 = vmatprep.subr.bf16.mxu0 %v6758_v53 }
 0x909   :  { %v2285_v29 = vpop.f32.mrb[52].mxu0  ;;  %v2326_v28 = vpop.f32.mrb[52].mxu1 }
 0x90a   :  { %v2286_v5 = vadd.f32 %v2285_v29, %v6759_v54  ;;  %v2287_v13 = vpop.f32.mrb[53].mxu0  ;;  %v2328_v43 = vpop.f32.mrb[53].mxu1  ;;  %v2327_v45 = vadd.f32 %v2326_v28, %v6482_v36 }
 0x90b   :  { %v2288_v46 = vadd.f32 %v2287_v13, %v4298_v39  ;;  %v2289_v48 = vpop.f32.mrb[54].mxu0  ;;  %v2330_v44 = vpop.f32.mrb[54].mxu1  ;;  %v2329_v6 = vadd.f32 %v2328_v43, %v6481_v32 }
 0x90c   :  { %v2879_v4 = vmul.f32 -1.442695, %v2286_v5  ;;  %v2290_v17 = vpop.f32.mrb[55].mxu0  ;;  %v2331_v49 = vpop.f32.mrb[55].mxu1 }
 0x90d   :  { %v2880_v47 = vmul.f32 -1.442695, %v2288_v46  ;;  %v2881_v8 = vmul.f32 -1.442695, %v2329_v6  ;;  %v3076_v49 = vld [vmem:[%s6024_s4] sm:$0xff]   ;;  %v3079_v6 = vld [vmem:[%s6024_s4 + $0x18] sm:$0xff]  }
 0x90e   :  { %3292 = vpow2.f32 %v2879_v4 }
 0x90f   :  { %3294 = vpow2.f32 %v2880_v47  ;;  %v3078_v47 = vld [vmem:[%s6024_s4 + $0x10] sm:$0xff]  }
 0x910   :  { %3296 = vpow2.f32 %v2881_v8  ;;  %v3080_v8 = vld [vmem:[%s6024_s4 + $0x20] sm:$0xff]  }
 0x911   :  { %3298 = vtanh.f32 %v2327_v45  ;;  %v3081_v45 = vld [vmem:[%s6024_s4 + $0x28] sm:$0xff]  }
 0x918   :  { %v3293_v42 = vpop.eup %3292 }
 0x919   :  { %v3295_v14 = vpop.eup %3294  ;;  %v2336_v41 = vadd.f32 1.0, %v3293_v42  ;;  %v3082_v42 = vld [vmem:[%s6024_s4 + $0x30] sm:$0xff]  }
 0x91a   :  { %v2342_v7 = vadd.f32 1.0, %v3295_v14  ;;  %v3297_v60 = vpop.eup %3296  ;;  %v3083_v14 = vld [vmem:[%s6024_s4 + $0x38] sm:$0xff]  }
 0x91b   :  { %3300 = vrcp.f32 %v2336_v41  ;;  %v3299_v40 = vpop.eup %3298  ;;  %v2349_v3 = vadd.f32 1.0, %v3297_v60 }
 0x91c   :  { %3302 = vrcp.f32 %v2342_v7 }
 0x91d   :  { %3304 = vrcp.f32 %v2349_v3 }
 0x925   :  { %v3301_v0 = vpop.eup %3300 }
 0x926   :  { %v3303_v55 = vpop.eup %3302  ;;  %v2353_v25 = vmul.f32 %v3301_v0, %v3299_v40 }
 0x927   :  { %v2352_v56 = vmul.f32 %v3303_v55, %v5845_v26  ;;  %v2882_v26 = vld [vmem:[%s6020_s0 + $0x38] sm:$0xff]  ;;  %v3305_v57 = vpop.eup %3304 }
 0x929   :  { %v2393_v63 = vpop.f32.mrb[56].mxu0  ;;  %v2434_v50 = vpop.f32.mrb[56].mxu1  ;;  %v5959_v62 = vadd.f32 %v2353_v25, %v2352_v56 }
 0x92a   :  { %v2395_v38 = vpop.f32.mrb[57].mxu0  ;;  %v2436_v10 = vpop.f32.mrb[57].mxu1 }
 0x92b   :  { %v2445_v11 = vcombine.low %v2393_v63, %v2395_v38  ;;  %v2446_v12 = vcombine.low %v2434_v50, %v2436_v10  ;;  %v2397_v15 = vpop.f32.mrb[58].mxu0  ;;  %v2438_v16 = vpop.f32.mrb[58].mxu1  ;;  %3306 = vtanh.f32 %v5959_v62 }
 0x92c   :  { %v2398_v18 = vpop.f32.mrb[59].mxu0  ;;  %v2439_v34 = vpop.f32.mrb[59].mxu1 }
 0x92d   :  { %v2453_v19 = vrot.slane %v2445_v11, %v4183_v2  ;;  %v2460_v20 = vrot.slane %v2446_v12, %v4183_v2 }
 0x92f   :  { %v2461_v21 = vcombine.low %v2453_v19, %v2460_v20 }
 0x931   :  { %v2463_v22 = vadd.f32 %v2882_v26, %v2461_v21 }
 0x933   :  { %v2883_v52 = vmul.f32 -1.442695, %v2463_v22  ;;  %v2471_v27 = vrot.slane %v2463_v22, 2  ;;  %v2482_v37 = vrot.slane %v2463_v22, 6  ;;  %v2479_v33 = vrot.slane %v2463_v22, 4 }
 0x935   :  { %v3307_v24 = vpop.eup %3306  ;;  %3308 = vpow2.f32 %v2883_v52  ;;  %v2884_v9 = vmul.f32 -1.442695, %v2471_v27  ;;  %v2885_v1 = vmul.f32 -1.442695, %v2482_v37 }
 0x936   :  { %v2356_v58 = vmul.f32 %v3307_v24, %v3305_v57  ;;  %v2889_v57 = vld [vmem:[%s6025_s5] ss:$0 sm:$0xff] }
 0x937   :  { %3310 = vpow2.f32 %v2884_v9 }
 0x938   :  { %v2496_v61 = vpack.c.bf16 %v2356_v58, %v2356_v58  ;;  %3312 = vpow2.f32 %v2885_v1 }
 0x93a   :  { %2529 = vmatprep.mubr.bf16.mxu0 %v2496_v61  ;;  %2570 = vmatprep.mubr.bf16.mxu1 %v2496_v61 }
 0x93f   :  { %v3309_v2 = vpop.eup %3308 }
 0x940   :  { %v2467_v23 = vadd.f32 1.0, %v3309_v2 }
 0x941   :  { %v3311_v35 = vpop.eup %3310 }
 0x942   :  { %3314 = vrcp.f32 %v2467_v23  ;;  %v2476_v30 = vadd.f32 1.0, %v3311_v35  ;;  %v3313_v51 = vpop.eup %3312 }
 0x943   :  { %3316 = vtanh.f32 %v2479_v33  ;;  %v2487_v5 = vadd.f32 1.0, %v3313_v51 }
 0x944   :  { %3318 = vrcp.f32 %v2476_v30 }
 0x945   :  { %3320 = vrcp.f32 %v2487_v5 }
 0x94c   :  { %v3315_v31 = vpop.eup %3314 }
 0x94d   :  { %v3317_v29 = vpop.eup %3316 }
 0x94e   :  { %v3319_v28 = vpop.eup %3318  ;;  %v2491_v43 = vmul.f32 %v3317_v29, %v3315_v31 }
 0x94f   :  { %v2490_v13 = vmul.f32 %v3319_v28, %v5854_v59  ;;  %v3321_v48 = vpop.eup %3320  ;;  %v3077_v59 = vld [vmem:[%s6024_s4 + $0x8] sm:$0xff]  }
 0x951   :  { %v2492_v46 = vadd.f32 %v2491_v43, %v2490_v13 }
 0x953   :  { %3322 = vtanh.f32 %v2492_v46  ;;  %2604 = vst [vmem:[#allocation3] sm:$0x3] %v2492_v46 }
 0x95d   :  { %v3323_v44 = vpop.eup %3322 }
 0x95e   :  { %v2494_v4 = vmul.f32 %v3323_v44, %v3321_v48 }
 0x960   :  { %v2495_v17 = vpack.c.bf16 %v2494_v4, %v2494_v4  ;;  %2603 = vst [vmem:[#allocation2] sm:$0x3] %v2494_v4 }
 0x962   :  { %2530 = vmatmul.mubr.bf16.vlgmr.msra.gmra.mrb[60].mxu0 %v2495_v17  ;;  %2571 = vmatmul.mubr.bf16.vlgmr.msra.gmra.mrb[60].mxu1 %v2495_v17 }
 0x963   :  { %2908 = vmatpush3.bf16.msra.mxu0 %v3076_v49  ;;  %2923 = vmatprep.mubr.msk.bf16.mxu0 %vm3559_vm0, %v6758_v53 }
 0x964   :  { %2909 = vmatprep.subr.bf16.mxu0 %v6758_v53 }
 0x967   :  { %2910 = vmatpush3.bf16.msra.mxu0 %v3077_v59 }
 0x968   :  { %2911 = vmatprep.subr.bf16.mxu0 %v6758_v53 }
 0x96b   :  { %2912 = vmatpush3.bf16.msra.mxu0 %v3078_v47 }
 0x96c   :  { %2913 = vmatprep.subr.bf16.mxu0 %v6758_v53 }
 0x96f   :  { %2914 = vmatpush3.bf16.msra.mxu0 %v3079_v6 }
 0x970   :  { %2915 = vmatprep.subr.bf16.mxu0 %v6758_v53 }
 0x973   :  { %2916 = vmatpush3.bf16.msra.mxu0 %v3080_v8 }
 0x974   :  { %2917 = vmatprep.subr.bf16.mxu0 %v6758_v53 }
 0x977   :  { %2918 = vmatpush3.bf16.msra.mxu0 %v3081_v45 }
 0x978   :  { %2919 = vmatprep.subr.bf16.mxu0 %v6758_v53 }
 0x97b   :  { %2920 = vmatpush3.bf16.msra.mxu0 %v3082_v42 }
 0x97c   :  { %2921 = vmatprep.subr.bf16.mxu0 %v6758_v53 }
 0x97f   :  { %2922 = vmatpush3.bf16.msra.mxu0 %v3083_v14 }
 0xa35   :  { %v2531_v41 = vpop.f32.mrb[60].mxu0  ;;  %v2572_v7 = vpop.f32.mrb[60].mxu1 }
 0xa36   :  { %v2532_v60 = vadd.f32 %v2531_v41, %v6759_v54  ;;  %v2533_v40 = vpop.f32.mrb[61].mxu0  ;;  %v2574_v0 = vpop.f32.mrb[61].mxu1  ;;  %v2573_v11 = vadd.f32 %v2572_v7, %v6482_v36 }
 0xa37   :  { %v2534_v55 = vadd.f32 %v2533_v40, %v4298_v39  ;;  %v2535_v25 = vpop.f32.mrb[62].mxu0  ;;  %v2576_v3 = vpop.f32.mrb[62].mxu1  ;;  %v2575_v10 = vadd.f32 %v2574_v0, %v6481_v32 }
 0xa38   :  { %v2886_v56 = vmul.f32 -1.442695, %v2532_v60  ;;  %v2536_v63 = vpop.f32.mrb[63].mxu0  ;;  %v2577_v50 = vpop.f32.mrb[63].mxu1 }
 0xa39   :  { %v2887_v38 = vmul.f32 -1.442695, %v2534_v55  ;;  %v2888_v53 = vmul.f32 -1.442695, %v2575_v10 }
 0xa3a   :  { %3324 = vpow2.f32 %v2886_v56 }
 0xa3b   :  { %3326 = vpow2.f32 %v2887_v38 }
 0xa3c   :  { %3328 = vpow2.f32 %v2888_v53 }
 0xa3d   :  { %3330 = vtanh.f32 %v2573_v11 }
 0xa44   :  { %v3325_v12 = vpop.eup %3324 }
 0xa45   :  { %v3327_v15 = vpop.eup %3326  ;;  %v2582_v54 = vadd.f32 1.0, %v3325_v12 }
 0xa46   :  { %v2588_v16 = vadd.f32 1.0, %v3327_v15  ;;  %v3329_v39 = vpop.eup %3328 }
 0xa47   :  { %3332 = vrcp.f32 %v2582_v54  ;;  %v3331_v18 = vpop.eup %3330  ;;  %v2595_v26 = vadd.f32 1.0, %v3329_v39 }
 0xa48   :  { %3334 = vrcp.f32 %v2588_v16 }
 0xa49   :  { %3336 = vrcp.f32 %v2595_v26 }
 0xa51   :  { %v3333_v34 = vpop.eup %3332 }
 0xa52   :  { %v3335_v19 = vpop.eup %3334  ;;  %v2599_v20 = vmul.f32 %v3333_v34, %v3331_v18 }
 0xa53   :  { %v2598_v21 = vmul.f32 %v3335_v19, %v5959_v62  ;;  %v3337_v36 = vpop.eup %3336 }
 0xa55   :  { %v2600_v32 = vadd.f32 %v2599_v20, %v2598_v21 }
 0xa57   :  { %3338 = vtanh.f32 %v2600_v32  ;;  %2606 = vst [vmem:[#allocation5] sm:$0x3] %v2600_v32 }
 0xa61   :  { %v3339_v22 = vpop.eup %3338 }
 0xa62   :  { %v2602_v52 = vmul.f32 %v3339_v22, %v3337_v36 }
 0xa64   :  { %2605 = vst [vmem:[#allocation4] sm:$0x3] %v2602_v52  ;;  %v2610_v27 = vpack.c.bf16 %v2602_v52, %v2602_v52 }
 0xa66   :  { %2924 = vmatmul.mubr.bf16.vlgmr.msra.gmra.mrb[64].mxu0 %v2610_v27 }
 0xb39   :  { %v2716_v24 = vpop.f32.mrb[64].mxu0 }
 0xb3a   :  { %v2717_v9 = vadd.f32 %v2889_v57, %v2716_v24  ;;  %v2925_v62 = vpop.f32.mrb[65].mxu0 }
 0xb3b   :  { %v2719_v58 = vpop.f32.mrb[66].mxu0 }
 0xb3c   :  { %v2926_v61 = vpop.f32.mrb[67].mxu0  ;;  %2723 = vst.msk [vmem:[#allocation6] sm:$0x3] %vm2722_vm1, %v2717_v9 }
 0xb3d   :  { %3543 = shalt.err (!%p3540_p4)
}
 0xb3e   :  { %s3544_s5 = scalar_lea.hbm %s6026_s6, 32 }
 0xb3f   :  { %p3545_p5 = scmp.ne.s32.totalorder %s6026_s6, %s3544_s5  ;;  %p3548_p6 = scmp.lt.u32.totalorder %s3544_s5, %s6026_s6 }
 0xb41   :  { %p3550_p7 = pnand %p3548_p6, %p3545_p5 }
 0xb43   :  { %3553 = shalt.err (!%p3550_p7)
}
 0xb44   :  { %2733 = dma.vmem_to_hbm [thread:$0]  %s2731_s8, 32, %s6026_s6, [#allocation7]  }
 0xb45   :  { %3554 = dma.done.wait [#allocation7], 32  }
 0xb46   :  { %3555 = vsyncadd [#allocation7], 4294967264 }
 0xb47   :  { %2737 = vsyncpa [#allocation7], 1 }

</bundles_post_ra>
